<compile_context>
chip_gen: v5e
topology: v5e:2x2
jax: 0.10.0
libtpu: 0.0.40
codegen_flags: <defaults>
</compile_context>

<pallas_src>
import functools

import numpy as np
import jax
import jax.numpy as jnp
from jax.experimental import pallas as pl
from jax.experimental.pallas import tpu as pltpu

SUB = 8


def _round_up(x, m):
    return (x + m - 1) // m * m


def _pad2(a, rows, cols):
    a = jnp.asarray(a, jnp.float32)
    out = jnp.zeros((rows, cols), jnp.float32)
    return out.at[: a.shape[0], : a.shape[1]].set(a)


# ----------------------------- fused Pallas kernel ---------------------------------
def _fused_seq_kernel(
    x_warm_ref, a_warm_ref, henc0_ref, hdec0_ref,
    wxe_ref, whzre_ref, whhe_ref, bxe_ref, bhzre_ref, bhhe_ref, wle_ref, ble_ref,
    wxd_ref, whzrd_ref, whhd_ref, bxd_ref, bhzrd_ref, bhhd_ref, wld_ref, bld_ref,
    y_ref,
    catxe_ref, cathe_ref, catxd_ref, cathd_ref,
    *, n_real, cfg,
):
    f32 = jnp.float32
    t_warm = x_warm_ref.shape[0]
    out_steps = y_ref.shape[0]
    NP = a_warm_ref.shape[1]
    F = x_warm_ref.shape[2]

    dot = lambda a, b: jnp.dot(a, b, preferred_element_type=f32)
    # contract last dim of both operands: (R, K) x (NP, K) -> (R, NP)  (row broadcast, no transpose)
    rowdot = lambda a, b: jax.lax.dot_general(
        a, b, (((1,), (1,)), ((), ())), preferred_element_type=f32)

    ones_row = jnp.ones((1, NP), f32)

    # S = -D^{-1/2} A D^{-1/2}  (ChebConv, K=2, sym norm, lambda_max=2, zero diagonal).
    # A is assumed symmetric (distance graph), so row-sum degrees serve both sides.
    def laplacian(A):
        deg_c = jnp.sum(A, axis=1, keepdims=True)           # (NP, 1) row-sum degrees
        deg_r = rowdot(ones_row, A)                          # (1, NP) same degrees, row layout
        dinv_c = jnp.where(deg_c > 0.0, jax.lax.rsqrt(jnp.maximum(deg_c, 1e-12)), 0.0)
        dinv_r = jnp.where(deg_r > 0.0, jax.lax.rsqrt(jnp.maximum(deg_r, 1e-12)), 0.0)
        return -(dinv_c * A * dinv_r)

    # One GConvGRU cell.  Chebyshev orders fused: [Xin | S@Xin] against row-stacked weights,
    # gates packed along the output/lane axis (x-path: z|r|h, h-path: z|r).
    def gconv_gru(S, Xin, H, wx_ref, whzr_ref, whh_ref, bx_ref, bhzr_ref, bhh_ref,
                  catx_ref, cath_ref):
        inw = catx_ref.shape[1] // 2
        hid = cath_ref.shape[1] // 2
        catx_ref[:, :inw] = Xin
        catx_ref[:, inw:] = dot(S, Xin)
        cath_ref[:, :hid] = H
        cath_ref[:, hid:] = dot(S, H)
        gx = dot(catx_ref[...], wx_ref[...]) + bx_ref[...]          # (NP, 3*hid)  z|r|h
        ghzr = dot(cath_ref[...], whzr_ref[...]) + bhzr_ref[...]    # (NP, 2*hid)  z|r
        Z = jax.nn.sigmoid(gx[:, 0:hid] + ghzr[:, 0:hid])
        R = jax.nn.sigmoid(gx[:, hid:2 * hid] + ghzr[:, hid:2 * hid])
        HR = H * R
        cath_ref[:, :hid] = HR                                      # reuse scratch for [HR | S@HR]
        cath_ref[:, hid:] = dot(S, HR)
        ghh = dot(cath_ref[...], whh_ref[...]) + bhh_ref[...]       # (NP, hid)
        Ht = jnp.tanh(gx[:, 2 * hid:3 * hid] + ghh)
        return Z * H + (1.0 - Z) * Ht

    # Encoder GConvGRU -> ReLU -> Linear (z) -> Decoder GConvGRU -> ReLU -> Linear (y).
    # The same graph (S) feeds both cells, as in the reference warm-up/rollout loops.
    def step(S, X, h_enc, h_dec):
        h_enc_n = gconv_gru(S, X, h_enc, wxe_ref, whzre_ref, whhe_ref,
                            bxe_ref, bhzre_ref, bhhe_ref, catxe_ref, cathe_ref)
        z = dot(jnp.maximum(h_enc_n, 0.0), wle_ref[...]) + ble_ref[...]
        h_dec_n = gconv_gru(S, z, h_dec, wxd_ref, whzrd_ref, whhd_ref,
                            bxd_ref, bhzrd_ref, bhhd_ref, catxd_ref, cathd_ref)
        y = dot(jnp.maximum(h_dec_n, 0.0), wld_ref[...]) + bld_ref[...]
        return h_enc_n, h_dec_n, y

    # ---------------- warm-up over observed snapshots (precomputed dense adjacency) ----
    def warm_body(t, carry):
        h_enc, h_dec, _ = carry
        h_enc, h_dec, y = step(laplacian(a_warm_ref[t]), x_warm_ref[t], h_enc, h_dec)
        return h_enc, h_dec, y

    init = (henc0_ref[...], hdec0_ref[...], jnp.zeros((NP, F), f32))
    h_enc, h_dec, y = jax.lax.fori_loop(0, t_warm, warm_body, init, unroll=True)
    y_ref[0] = y                                       # first prediction = last warm-up y_hat

    # ---------------- autoregressive rollout (h_enc / h_dec frozen, as in the reference) --
    sx = cfg["max_x"] - cfg["min_x"]
    sy = cfg["max_y"] - cfg["min_y"]
    inv_ew = 1.0 / (cfg["max_ew"] - cfg["min_ew"])
    # hoisted invariants: padded-node validity mask + coordinate-lane selector (built once)
    r_i = jax.lax.broadcasted_iota(jnp.int32, (NP, NP), 0)
    c_i = jax.lax.broadcasted_iota(jnp.int32, (NP, NP), 1)
    valid_pad = (r_i < n_real) & (c_i < n_real)
    lane2 = jax.lax.broadcasted_iota(jnp.int32, (2, F), 1)
    row2 = jax.lax.broadcasted_iota(jnp.int32, (2, F), 0)
    sel_xy = (lane2 == row2).astype(f32)               # rows = one-hot selectors of lanes 0 / 1

    def roll_body(i, y_prev):
        # adjacency from the previous prediction's (x, y) — built entirely in VMEM
        p_r = rowdot(sel_xy, y_prev)                   # (2, NP) both coords in row layout
        px_r = p_r[0:1, :] * sx + cfg["min_x"]
        py_r = p_r[1:2, :] * sy + cfg["min_y"]
        px_c = y_prev[:, 0:1] * sx + cfg["min_x"]
        py_c = y_prev[:, 1:2] * sy + cfg["min_y"]
        dx = px_c - px_r
        dy = py_c - py_r
        dist = jnp.sqrt(dx * dx + dy * dy)
        valid = valid_pad & (dist < cfg["visual_range"]) & (dist > 0.0)
        A = jnp.where(valid, (dist - cfg["min_ew"]) * inv_ew, 0.0)
        _, _, y_new = step(laplacian(A), y_prev, h_enc, h_dec)   # hidden states NOT advanced
        y_ref[1 + i] = y_new
        return y_new

    jax.lax.fori_loop(0, out_steps - 1, roll_body, y, unroll=True)


# ----------------------------- parameter init ---------------------------------
def _glorot_block(key, fi, fo, rows, cols):
    lim = float(np.sqrt(6.0 / (fi + fo)))
    w = jax.random.uniform(key, (fi, fo), jnp.float32, -lim, lim)
    return jnp.zeros((rows, cols), jnp.float32).at[:fi, :fo].set(w)


def _init_cell(key, in_dim, hid_dim, lin_out_dim):
    """GConvGRU(in_dim -> hid_dim, K=2, sym) + Linear(hid_dim -> lin_out_dim).

    Weights are packed so each gate needs a single MXU push:
      * Chebyshev orders row-stacked:   [W_T0 ; W_T1]  -> multiplied by [Xin | S@Xin]
      * gates packed along lanes:        x-path z|r|h,  h-path z|r,  candidate separate
    Dims are padded only to multiples of 8 (compact, no 128x128 padding).
    """
    in_p = _round_up(in_dim, SUB)
    hid_p = _round_up(hid_dim, SUB)
    out_p = _round_up(lin_out_dim, SUB)
    ks = jax.random.split(key, 16)

    def cheb_packed(keys, fi, fi_p, n_gates):
        w = jnp.zeros((2 * fi_p, n_gates * hid_p), jnp.float32)
        lim = float(np.sqrt(6.0 / (fi + hid_dim)))
        for k in range(2):                               # Chebyshev order T0, T1
            for g in range(n_gates):
                blk = jax.random.uniform(keys[k * n_gates + g], (fi, hid_dim),
                                         jnp.float32, -lim, lim)
                w = w.at[k * fi_p:k * fi_p + fi, g * hid_p:g * hid_p + hid_dim].set(blk)
        return w

    wx = cheb_packed(ks[0:6], in_dim, in_p, 3)           # x-path gates   z | r | h
    whzr = cheb_packed(ks[6:10], hid_dim, hid_p, 2)      # h-path gates   z | r
    whh = cheb_packed(ks[10:12], hid_dim, hid_p, 1)      # candidate gate (applied to H*R)
    bx = jnp.zeros((1, 3 * hid_p), jnp.float32)          # ChebConv biases: zeros (PyG default)
    bhzr = jnp.zeros((1, 2 * hid_p), jnp.float32)
    bhh = jnp.zeros((1, hid_p), jnp.float32)
    wl = _glorot_block(ks[12], hid_dim, lin_out_dim, hid_p, out_p)
    bl = jnp.zeros((1, out_p), jnp.float32).at[0, :lin_out_dim].set(
        0.01 * jax.random.normal(ks[13], (lin_out_dim,), jnp.float32))
    return {"wx": wx, "whzr": whzr, "whh": whh, "bx": bx, "bhzr": bhzr,
            "bhh": bhh, "wl": wl, "bl": bl}


# ----------------------------- model ---------------------------------
class GraphSeqGeneratorPallas:
    def __init__(self, key, node_feat_dim, enc_hidden_dim, enc_latent_dim, dec_hidden_dim,
                 pred_horizon, min_max_x, min_max_y, min_max_edge_weight, visual_range):
        k_enc, k_dec = jax.random.split(key)
        self.node_feat_dim = node_feat_dim
        self.out_steps = pred_horizon
        self.f_in_p = _round_up(node_feat_dim, SUB)
        self.lat_p = _round_up(enc_latent_dim, SUB)
        self.hid_e_p = _round_up(enc_hidden_dim, SUB)
        self.hid_d_p = _round_up(dec_hidden_dim, SUB)
        self.enc = _init_cell(k_enc, node_feat_dim, enc_hidden_dim, enc_latent_dim)
        self.dec = _init_cell(k_dec, enc_latent_dim, dec_hidden_dim, node_feat_dim)
        self.cfg = dict(min_x=float(min_max_x[0]), max_x=float(min_max_x[1]),
                        min_y=float(min_max_y[0]), max_y=float(min_max_y[1]),
                        min_ew=float(min_max_edge_weight[0]), max_ew=float(min_max_edge_weight[1]),
                        visual_range=float(visual_range))

    @staticmethod
    def _dense_adj(edge_index, edge_weight, NP):
        # data-dependent scatter (warm-up graphs only) stays in plain JAX outside the kernel;
        # zero the diagonal here (remove_self_loops) so the kernel never has to.
        A = jnp.zeros((NP, NP), jnp.float32)
        A = A.at[edge_index[0], edge_index[1]].add(edge_weight.astype(jnp.float32))
        idx = jnp.arange(NP)
        return A.at[idx, idx].set(0.0)

    def __call__(self, xs, edge_indices, edge_weights, h_enc=None, h_dec=None):
        N = int(xs[0].shape[0])
        NP = _round_up(max(N, SUB), SUB)
        F, LAT, HE, HD = self.f_in_p, self.lat_p, self.hid_e_p, self.hid_d_p

        x_warm = jnp.stack([_pad2(x, NP, F) for x in xs])                     # (T_warm, NP, F)
        a_warm = jnp.stack([self._dense_adj(ei, ew, NP)
                            for ei, ew in zip(edge_indices, edge_weights)])   # (T_warm, NP, NP)
        h_enc0 = jnp.zeros((NP, HE), jnp.float32) if h_enc is None else _pad2(h_enc, NP, HE)
        h_dec0 = jnp.zeros((NP, HD), jnp.float32) if h_dec is None else _pad2(h_dec, NP, HD)

        e, d = self.enc, self.dec
        params = (e["wx"], e["whzr"], e["whh"], e["bx"], e["bhzr"], e["bhh"], e["wl"], e["bl"],
                  d["wx"], d["whzr"], d["whh"], d["bx"], d["bhzr"], d["bhh"], d["wl"], d["bl"])

        # explicit scoped-VMEM budget: everything (inputs, weights, output, scratch) is resident
        vmem_bytes = 4 * (x_warm.size + a_warm.size + h_enc0.size + h_dec0.size
                          + sum(int(p.size) for p in params)
                          + self.out_steps * NP * F
                          + NP * (2 * F + 2 * HE + 2 * LAT + 2 * HD))
        vmem_limit = int(min(64 * 2 ** 20, max(16 * 2 ** 20, 4 * vmem_bytes)))

        kern = functools.partial(_fused_seq_kernel, n_real=N, cfg=self.cfg)
        vmem = pltpu.MemorySpace.VMEM

        y_seq = pl.pallas_call(
            kern,
            out_shape=jax.ShapeDtypeStruct((self.out_steps, NP, F), jnp.float32),
            in_specs=[pl.BlockSpec(memory_space=vmem)] * (4 + len(params)),
            out_specs=pl.BlockSpec(memory_space=vmem),
            scratch_shapes=[pltpu.VMEM((NP, 2 * F), jnp.float32),    # enc [X  | S@X ]
                            pltpu.VMEM((NP, 2 * HE), jnp.float32),   # enc [H  | S@H ] / [HR | S@HR]
                            pltpu.VMEM((NP, 2 * LAT), jnp.float32),  # dec [z  | S@z ]
                            pltpu.VMEM((NP, 2 * HD), jnp.float32)],  # dec [H  | S@H ] / [HR | S@HR]
            compiler_params=pltpu.CompilerParams(vmem_limit_bytes=vmem_limit),
        )(x_warm, a_warm, h_enc0, h_dec0, *params)

        # predictions: last warm-up output + every rollout output
        return [y_seq[i, :N, :self.node_feat_dim] for i in range(self.out_steps)]


# ----------------------------- demo ---------------------------------
if __name__ == "__main__":
    key = jax.random.PRNGKey(0)
    N = 16                 # nodes (boids)
    node_feat_dim = 4      # [x, y, vx, vy] normalized
    enc_hidden_dim = 32
    enc_latent_dim = 8
    dec_hidden_dim = 32
    pred_horizon = 3
    snapshot_count = 2
    min_max_x = (0.0, 100.0)
    min_max_y = (0.0, 100.0)
    min_max_edge_weight = (0.0, 50.0)
    visual_range = 40.0

    k_model, k_data = jax.random.split(key)
    model = GraphSeqGeneratorPallas(k_model, node_feat_dim, enc_hidden_dim, enc_latent_dim,
                                    dec_hidden_dim, pred_horizon, min_max_x, min_max_y,
                                    min_max_edge_weight, visual_range)

    xs, eis, ews = [], [], []
    dk = k_data
    for _ in range(snapshot_count):
        dk, ks = jax.random.split(dk)
        x = jax.random.uniform(ks, (N, node_feat_dim), jnp.float32)
        coords = (np.asarray(x[:, :2])
                  * np.array([[min_max_x[1] - min_max_x[0], min_max_y[1] - min_max_y[0]]])
                  + np.array([[min_max_x[0], min_max_y[0]]]))
        d = np.linalg.norm(coords[:, None, :] - coords[None, :, :], axis=2)
        idx = np.where((d < visual_range) & (d > 0))
        ei = jnp.asarray(np.stack(idx, axis=0), jnp.int32)
        ew = jnp.asarray((d[idx] - min_max_edge_weight[0])
                         / (min_max_edge_weight[1] - min_max_edge_weight[0]), jnp.float32)
        xs.append(x)
        eis.append(ei)
        ews.append(ew)

    preds = model(xs, eis, ews, h_enc=None, h_dec=None)
    preds = [jax.block_until_ready(p) for p in preds]
    assert len(preds) == pred_horizon
    assert all(p.shape == (N, node_feat_dim) for p in preds)
    assert all(bool(jnp.all(jnp.isfinite(p))) for p in preds)
    print("KERNEL_OK")
</pallas_src>

<mosaic_0001>
module attributes {stable_mosaic.version = 11 : i64} {
  func.func @_fused_seq_kernel(%arg0: memref<2x16x8xf32, #tpu.memory_space<vmem>>, %arg1: memref<2x16x16xf32, #tpu.memory_space<vmem>>, %arg2: memref<16x32xf32, #tpu.memory_space<vmem>>, %arg3: memref<16x32xf32, #tpu.memory_space<vmem>>, %arg4: memref<16x96xf32, #tpu.memory_space<vmem>>, %arg5: memref<64x64xf32, #tpu.memory_space<vmem>>, %arg6: memref<64x32xf32, #tpu.memory_space<vmem>>, %arg7: memref<1x96xf32, #tpu.memory_space<vmem>>, %arg8: memref<1x64xf32, #tpu.memory_space<vmem>>, %arg9: memref<1x32xf32, #tpu.memory_space<vmem>>, %arg10: memref<32x8xf32, #tpu.memory_space<vmem>>, %arg11: memref<1x8xf32, #tpu.memory_space<vmem>>, %arg12: memref<16x96xf32, #tpu.memory_space<vmem>>, %arg13: memref<64x64xf32, #tpu.memory_space<vmem>>, %arg14: memref<64x32xf32, #tpu.memory_space<vmem>>, %arg15: memref<1x96xf32, #tpu.memory_space<vmem>>, %arg16: memref<1x64xf32, #tpu.memory_space<vmem>>, %arg17: memref<1x32xf32, #tpu.memory_space<vmem>>, %arg18: memref<32x8xf32, #tpu.memory_space<vmem>>, %arg19: memref<1x8xf32, #tpu.memory_space<vmem>>, %arg20: memref<3x16x8xf32, #tpu.memory_space<vmem>>, %arg21: memref<16x16xf32, #tpu.memory_space<vmem>>, %arg22: memref<16x64xf32, #tpu.memory_space<vmem>>, %arg23: memref<16x16xf32, #tpu.memory_space<vmem>>, %arg24: memref<16x64xf32, #tpu.memory_space<vmem>>) attributes {dimension_semantics = [], scalar_prefetch = 0 : i64, scratch_operands = 4 : i64, tpu.core_type = #tpu.core_type<tc>} {
    %cst = arith.constant 1.000000e+00 : f32
    %0 = vector.broadcast %cst : f32 to vector<1x16xf32>
    %c0 = arith.constant 0 : index
    %c0_0 = arith.constant 0 : index
    %1 = vector.load %arg2[%c0, %c0_0] : memref<16x32xf32, #tpu.memory_space<vmem>>, vector<16x32xf32>
    %c0_1 = arith.constant 0 : index
    %c0_2 = arith.constant 0 : index
    %2 = vector.load %arg3[%c0_1, %c0_2] : memref<16x32xf32, #tpu.memory_space<vmem>>, vector<16x32xf32>
    %cst_3 = arith.constant 0.000000e+00 : f32
    %3 = vector.broadcast %cst_3 : f32 to vector<16x8xf32>
    %c0_i32 = arith.constant 0 : i32
    %4 = arith.index_cast %c0_i32 : i32 to index
    %c0_4 = arith.constant 0 : index
    %c0_5 = arith.constant 0 : index
    %5 = vector.load %arg1[%4, %c0_4, %c0_5] : memref<2x16x16xf32, #tpu.memory_space<vmem>>, vector<1x16x16xf32>
    %6 = vector.shape_cast %5 : vector<1x16x16xf32> to vector<16x16xf32>
    %cst_6 = arith.constant dense<0.000000e+00> : vector<16xf32>
    %7 = vector.multi_reduction <add>, %6, %cst_6 [1] : vector<16x16xf32> to vector<16xf32>
    %8 = vector.shape_cast %7 : vector<16xf32> to vector<16x1xf32>
    %cst_7 = arith.constant dense<0.000000e+00> : vector<1x16xf32>
    %9 = tpu.matmul %0, %6, %cst_7 {dimension_numbers = #tpu.dot_dimension_numbers<[1], [1], [0], [0], [0, 0, 1, 0], [], []>} : vector<1x16xf32>, vector<16x16xf32>, vector<1x16xf32> -> vector<1x16xf32>
    %cst_8 = arith.constant 0.000000e+00 : f32
    %10 = vector.broadcast %cst_8 : f32 to vector<16x1xf32>
    %11 = arith.cmpf ogt, %8, %10 : vector<16x1xf32>
    %cst_9 = arith.constant 9.99999996E-13 : f32
    %12 = vector.broadcast %cst_9 : f32 to vector<16x1xf32>
    %13 = arith.maximumf %8, %12 : vector<16x1xf32>
    %14 = math.rsqrt %13 : vector<16x1xf32>
    %cst_10 = arith.constant 0.000000e+00 : f32
    %15 = vector.broadcast %cst_10 : f32 to vector<16x1xf32>
    %16 = arith.select %11, %14, %15 : vector<16x1xi1>, vector<16x1xf32>
    %cst_11 = arith.constant 0.000000e+00 : f32
    %17 = vector.broadcast %cst_11 : f32 to vector<1x16xf32>
    %18 = arith.cmpf ogt, %9, %17 : vector<1x16xf32>
    %cst_12 = arith.constant 9.99999996E-13 : f32
    %19 = vector.broadcast %cst_12 : f32 to vector<1x16xf32>
    %20 = arith.maximumf %9, %19 : vector<1x16xf32>
    %21 = math.rsqrt %20 : vector<1x16xf32>
    %cst_13 = arith.constant 0.000000e+00 : f32
    %22 = vector.broadcast %cst_13 : f32 to vector<1x16xf32>
    %23 = arith.select %18, %21, %22 : vector<1x16xi1>, vector<1x16xf32>
    %24 = vector.broadcast %16 : vector<16x1xf32> to vector<16x16xf32>
    %25 = arith.mulf %24, %6 : vector<16x16xf32>
    %26 = vector.broadcast %23 : vector<1x16xf32> to vector<16x16xf32>
    %27 = arith.mulf %25, %26 : vector<16x16xf32>
    %cst_14 = arith.constant 0.000000e+00 : f32
    %28 = vector.broadcast %cst_14 : f32 to vector<16x16xf32>
    %29 = arith.subf %28, %27 : vector<16x16xf32>
    %30 = arith.index_cast %c0_i32 : i32 to index
    %c0_15 = arith.constant 0 : index
    %c0_16 = arith.constant 0 : index
    %31 = vector.load %arg0[%30, %c0_15, %c0_16] : memref<2x16x8xf32, #tpu.memory_space<vmem>>, vector<1x16x8xf32>
    %32 = vector.shape_cast %31 : vector<1x16x8xf32> to vector<16x8xf32>
    %c0_17 = arith.constant 0 : index
    %c0_18 = arith.constant 0 : index
    %33 = vector.load %arg21[%c0_17, %c0_18] : memref<16x16xf32, #tpu.memory_space<vmem>>, vector<16x8xf32>
    tpu.vector_store %arg21[%c0_17, %c0_18], %32 {strides = array<i32>} : memref<16x16xf32, #tpu.memory_space<vmem>>, vector<16x8xf32>,
    %cst_19 = arith.constant dense<0.000000e+00> : vector<16x8xf32>
    %34 = tpu.matmul %29, %32, %cst_19 {dimension_numbers = #tpu.dot_dimension_numbers<[1], [0], [0], [1], [0, 0, 1, 1], [], []>} : vector<16x16xf32>, vector<16x8xf32>, vector<16x8xf32> -> vector<16x8xf32>
    %c0_20 = arith.constant 0 : index
    %c8 = arith.constant 8 : index
    %35 = vector.load %arg21[%c0_20, %c8] : memref<16x16xf32, #tpu.memory_space<vmem>>, vector<16x8xf32>
    tpu.vector_store %arg21[%c0_20, %c8], %34 {strides = array<i32>} : memref<16x16xf32, #tpu.memory_space<vmem>>, vector<16x8xf32>,
    %c0_21 = arith.constant 0 : index
    %c0_22 = arith.constant 0 : index
    %36 = vector.load %arg22[%c0_21, %c0_22] : memref<16x64xf32, #tpu.memory_space<vmem>>, vector<16x32xf32>
    tpu.vector_store %arg22[%c0_21, %c0_22], %1 {strides = array<i32>} : memref<16x64xf32, #tpu.memory_space<vmem>>, vector<16x32xf32>,
    %cst_23 = arith.constant dense<0.000000e+00> : vector<16x32xf32>
    %37 = tpu.matmul %29, %1, %cst_23 {dimension_numbers = #tpu.dot_dimension_numbers<[1], [0], [0], [1], [0, 0, 1, 1], [], []>} : vector<16x16xf32>, vector<16x32xf32>, vector<16x32xf32> -> vector<16x32xf32>
    %c0_24 = arith.constant 0 : index
    %c32 = arith.constant 32 : index
    %38 = vector.load %arg22[%c0_24, %c32] : memref<16x64xf32, #tpu.memory_space<vmem>>, vector<16x32xf32>
    tpu.vector_store %arg22[%c0_24, %c32], %37 {strides = array<i32>} : memref<16x64xf32, #tpu.memory_space<vmem>>, vector<16x32xf32>,
    %c0_25 = arith.constant 0 : index
    %c0_26 = arith.constant 0 : index
    %39 = vector.load %arg21[%c0_25, %c0_26] : memref<16x16xf32, #tpu.memory_space<vmem>>, vector<16x16xf32>
    %c0_27 = arith.constant 0 : index
    %c0_28 = arith.constant 0 : index
    %40 = vector.load %arg4[%c0_27, %c0_28] : memref<16x96xf32, #tpu.memory_space<vmem>>, vector<16x96xf32>
    %cst_29 = arith.constant dense<0.000000e+00> : vector<16x96xf32>
    %41 = tpu.matmul %39, %40, %cst_29 {dimension_numbers = #tpu.dot_dimension_numbers<[1], [0], [0], [1], [0, 0, 1, 1], [], []>} : vector<16x16xf32>, vector<16x96xf32>, vector<16x96xf32> -> vector<16x96xf32>
    %c0_30 = arith.constant 0 : index
    %c0_31 = arith.constant 0 : index
    %42 = vector.load %arg7[%c0_30, %c0_31] : memref<1x96xf32, #tpu.memory_space<vmem>>, vector<1x96xf32>
    %43 = vector.broadcast %42 : vector<1x96xf32> to vector<16x96xf32>
    %44 = arith.addf %41, %43 : vector<16x96xf32>
    %c0_32 = arith.constant 0 : index
    %c0_33 = arith.constant 0 : index
    %45 = vector.load %arg22[%c0_32, %c0_33] : memref<16x64xf32, #tpu.memory_space<vmem>>, vector<16x64xf32>
    %c0_34 = arith.constant 0 : index
    %c0_35 = arith.constant 0 : index
    %46 = vector.load %arg5[%c0_34, %c0_35] : memref<64x64xf32, #tpu.memory_space<vmem>>, vector<64x64xf32>
    %cst_36 = arith.constant dense<0.000000e+00> : vector<16x64xf32>
    %47 = tpu.matmul %45, %46, %cst_36 {dimension_numbers = #tpu.dot_dimension_numbers<[1], [0], [0], [1], [0, 0, 1, 1], [], []>} : vector<16x64xf32>, vector<64x64xf32>, vector<16x64xf32> -> vector<16x64xf32>
    %c0_37 = arith.constant 0 : index
    %c0_38 = arith.constant 0 : index
    %48 = vector.load %arg8[%c0_37, %c0_38] : memref<1x64xf32, #tpu.memory_space<vmem>>, vector<1x64xf32>
    %49 = vector.broadcast %48 : vector<1x64xf32> to vector<16x64xf32>
    %50 = arith.addf %47, %49 : vector<16x64xf32>
    %51 = vector.extract_strided_slice %44 {offsets = [0, 0], sizes = [16, 32], strides = [1, 1]} : vector<16x96xf32> to vector<16x32xf32>
    %52 = vector.extract_strided_slice %50 {offsets = [0, 0], sizes = [16, 32], strides = [1, 1]} : vector<16x64xf32> to vector<16x32xf32>
    %53 = arith.addf %51, %52 : vector<16x32xf32>
    %54 = arith.negf %53 : vector<16x32xf32>
    %55 = math.exp %54 : vector<16x32xf32>
    %cst_39 = arith.constant 1.000000e+00 : f32
    %56 = vector.broadcast %cst_39 : f32 to vector<16x32xf32>
    %57 = arith.addf %56, %55 : vector<16x32xf32>
    %58 = arith.divf %56, %57 : vector<16x32xf32>
    %59 = vector.extract_strided_slice %44 {offsets = [0, 32], sizes = [16, 32], strides = [1, 1]} : vector<16x96xf32> to vector<16x32xf32>
    %60 = vector.extract_strided_slice %50 {offsets = [0, 32], sizes = [16, 32], strides = [1, 1]} : vector<16x64xf32> to vector<16x32xf32>
    %61 = arith.addf %59, %60 : vector<16x32xf32>
    %62 = arith.negf %61 : vector<16x32xf32>
    %63 = math.exp %62 : vector<16x32xf32>
    %cst_40 = arith.constant 1.000000e+00 : f32
    %64 = vector.broadcast %cst_40 : f32 to vector<16x32xf32>
    %65 = arith.addf %64, %63 : vector<16x32xf32>
    %66 = arith.divf %64, %65 : vector<16x32xf32>
    %67 = arith.mulf %1, %66 : vector<16x32xf32>
    %c0_41 = arith.constant 0 : index
    %c0_42 = arith.constant 0 : index
    %68 = vector.load %arg22[%c0_41, %c0_42] : memref<16x64xf32, #tpu.memory_space<vmem>>, vector<16x32xf32>
    tpu.vector_store %arg22[%c0_41, %c0_42], %67 {strides = array<i32>} : memref<16x64xf32, #tpu.memory_space<vmem>>, vector<16x32xf32>,
    %cst_43 = arith.constant dense<0.000000e+00> : vector<16x32xf32>
    %69 = tpu.matmul %29, %67, %cst_43 {dimension_numbers = #tpu.dot_dimension_numbers<[1], [0], [0], [1], [0, 0, 1, 1], [], []>} : vector<16x16xf32>, vector<16x32xf32>, vector<16x32xf32> -> vector<16x32xf32>
    %c0_44 = arith.constant 0 : index
    %c32_45 = arith.constant 32 : index
    %70 = vector.load %arg22[%c0_44, %c32_45] : memref<16x64xf32, #tpu.memory_space<vmem>>, vector<16x32xf32>
    tpu.vector_store %arg22[%c0_44, %c32_45], %69 {strides = array<i32>} : memref<16x64xf32, #tpu.memory_space<vmem>>, vector<16x32xf32>,
    %c0_46 = arith.constant 0 : index
    %c0_47 = arith.constant 0 : index
    %71 = vector.load %arg22[%c0_46, %c0_47] : memref<16x64xf32, #tpu.memory_space<vmem>>, vector<16x64xf32>
    %c0_48 = arith.constant 0 : index
    %c0_49 = arith.constant 0 : index
    %72 = vector.load %arg6[%c0_48, %c0_49] : memref<64x32xf32, #tpu.memory_space<vmem>>, vector<64x32xf32>
    %cst_50 = arith.constant dense<0.000000e+00> : vector<16x32xf32>
    %73 = tpu.matmul %71, %72, %cst_50 {dimension_numbers = #tpu.dot_dimension_numbers<[1], [0], [0], [1], [0, 0, 1, 1], [], []>} : vector<16x64xf32>, vector<64x32xf32>, vector<16x32xf32> -> vector<16x32xf32>
    %c0_51 = arith.constant 0 : index
    %c0_52 = arith.constant 0 : index
    %74 = vector.load %arg9[%c0_51, %c0_52] : memref<1x32xf32, #tpu.memory_space<vmem>>, vector<1x32xf32>
    %75 = vector.broadcast %74 : vector<1x32xf32> to vector<16x32xf32>
    %76 = arith.addf %73, %75 : vector<16x32xf32>
    %77 = vector.extract_strided_slice %44 {offsets = [0, 64], sizes = [16, 32], strides = [1, 1]} : vector<16x96xf32> to vector<16x32xf32>
    %78 = arith.addf %77, %76 : vector<16x32xf32>
    %79 = math.tanh %78 : vector<16x32xf32>
    %80 = arith.mulf %58, %1 : vector<16x32xf32>
    %cst_53 = arith.constant 1.000000e+00 : f32
    %81 = vector.broadcast %cst_53 : f32 to vector<16x32xf32>
    %82 = arith.subf %81, %58 : vector<16x32xf32>
    %83 = arith.mulf %82, %79 : vector<16x32xf32>
    %84 = arith.addf %80, %83 : vector<16x32xf32>
    %cst_54 = arith.constant 0.000000e+00 : f32
    %85 = vector.broadcast %cst_54 : f32 to vector<16x32xf32>
    %86 = arith.maximumf %84, %85 : vector<16x32xf32>
    %c0_55 = arith.constant 0 : index
    %c0_56 = arith.constant 0 : index
    %87 = vector.load %arg10[%c0_55, %c0_56] : memref<32x8xf32, #tpu.memory_space<vmem>>, vector<32x8xf32>
    %cst_57 = arith.constant dense<0.000000e+00> : vector<16x8xf32>
    %88 = tpu.matmul %86, %87, %cst_57 {dimension_numbers = #tpu.dot_dimension_numbers<[1], [0], [0], [1], [0, 0, 1, 1], [], []>} : vector<16x32xf32>, vector<32x8xf32>, vector<16x8xf32> -> vector<16x8xf32>
    %c0_58 = arith.constant 0 : index
    %c0_59 = arith.constant 0 : index
    %89 = vector.load %arg11[%c0_58, %c0_59] : memref<1x8xf32, #tpu.memory_space<vmem>>, vector<1x8xf32>
    %90 = vector.broadcast %89 : vector<1x8xf32> to vector<16x8xf32>
    %91 = arith.addf %88, %90 : vector<16x8xf32>
    %c0_60 = arith.constant 0 : index
    %c0_61 = arith.constant 0 : index
    %92 = vector.load %arg23[%c0_60, %c0_61] : memref<16x16xf32, #tpu.memory_space<vmem>>, vector<16x8xf32>
    tpu.vector_store %arg23[%c0_60, %c0_61], %91 {strides = array<i32>} : memref<16x16xf32, #tpu.memory_space<vmem>>, vector<16x8xf32>,
    %cst_62 = arith.constant dense<0.000000e+00> : vector<16x8xf32>
    %93 = tpu.matmul %29, %91, %cst_62 {dimension_numbers = #tpu.dot_dimension_numbers<[1], [0], [0], [1], [0, 0, 1, 1], [], []>} : vector<16x16xf32>, vector<16x8xf32>, vector<16x8xf32> -> vector<16x8xf32>
    %c0_63 = arith.constant 0 : index
    %c8_64 = arith.constant 8 : index
    %94 = vector.load %arg23[%c0_63, %c8_64] : memref<16x16xf32, #tpu.memory_space<vmem>>, vector<16x8xf32>
    tpu.vector_store %arg23[%c0_63, %c8_64], %93 {strides = array<i32>} : memref<16x16xf32, #tpu.memory_space<vmem>>, vector<16x8xf32>,
    %c0_65 = arith.constant 0 : index
    %c0_66 = arith.constant 0 : index
    %95 = vector.load %arg24[%c0_65, %c0_66] : memref<16x64xf32, #tpu.memory_space<vmem>>, vector<16x32xf32>
    tpu.vector_store %arg24[%c0_65, %c0_66], %2 {strides = array<i32>} : memref<16x64xf32, #tpu.memory_space<vmem>>, vector<16x32xf32>,
    %cst_67 = arith.constant dense<0.000000e+00> : vector<16x32xf32>
    %96 = tpu.matmul %29, %2, %cst_67 {dimension_numbers = #tpu.dot_dimension_numbers<[1], [0], [0], [1], [0, 0, 1, 1], [], []>} : vector<16x16xf32>, vector<16x32xf32>, vector<16x32xf32> -> vector<16x32xf32>
    %c0_68 = arith.constant 0 : index
    %c32_69 = arith.constant 32 : index
    %97 = vector.load %arg24[%c0_68, %c32_69] : memref<16x64xf32, #tpu.memory_space<vmem>>, vector<16x32xf32>
    tpu.vector_store %arg24[%c0_68, %c32_69], %96 {strides = array<i32>} : memref<16x64xf32, #tpu.memory_space<vmem>>, vector<16x32xf32>,
    %c0_70 = arith.constant 0 : index
    %c0_71 = arith.constant 0 : index
    %98 = vector.load %arg23[%c0_70, %c0_71] : memref<16x16xf32, #tpu.memory_space<vmem>>, vector<16x16xf32>
    %c0_72 = arith.constant 0 : index
    %c0_73 = arith.constant 0 : index
    %99 = vector.load %arg12[%c0_72, %c0_73] : memref<16x96xf32, #tpu.memory_space<vmem>>, vector<16x96xf32>
    %cst_74 = arith.constant dense<0.000000e+00> : vector<16x96xf32>
    %100 = tpu.matmul %98, %99, %cst_74 {dimension_numbers = #tpu.dot_dimension_numbers<[1], [0], [0], [1], [0, 0, 1, 1], [], []>} : vector<16x16xf32>, vector<16x96xf32>, vector<16x96xf32> -> vector<16x96xf32>
    %c0_75 = arith.constant 0 : index
    %c0_76 = arith.constant 0 : index
    %101 = vector.load %arg15[%c0_75, %c0_76] : memref<1x96xf32, #tpu.memory_space<vmem>>, vector<1x96xf32>
    %102 = vector.broadcast %101 : vector<1x96xf32> to vector<16x96xf32>
    %103 = arith.addf %100, %102 : vector<16x96xf32>
    %c0_77 = arith.constant 0 : index
    %c0_78 = arith.constant 0 : index
    %104 = vector.load %arg24[%c0_77, %c0_78] : memref<16x64xf32, #tpu.memory_space<vmem>>, vector<16x64xf32>
    %c0_79 = arith.constant 0 : index
    %c0_80 = arith.constant 0 : index
    %105 = vector.load %arg13[%c0_79, %c0_80] : memref<64x64xf32, #tpu.memory_space<vmem>>, vector<64x64xf32>
    %cst_81 = arith.constant dense<0.000000e+00> : vector<16x64xf32>
    %106 = tpu.matmul %104, %105, %cst_81 {dimension_numbers = #tpu.dot_dimension_numbers<[1], [0], [0], [1], [0, 0, 1, 1], [], []>} : vector<16x64xf32>, vector<64x64xf32>, vector<16x64xf32> -> vector<16x64xf32>
    %c0_82 = arith.constant 0 : index
    %c0_83 = arith.constant 0 : index
    %107 = vector.load %arg16[%c0_82, %c0_83] : memref<1x64xf32, #tpu.memory_space<vmem>>, vector<1x64xf32>
    %108 = vector.broadcast %107 : vector<1x64xf32> to vector<16x64xf32>
    %109 = arith.addf %106, %108 : vector<16x64xf32>
    %110 = vector.extract_strided_slice %103 {offsets = [0, 0], sizes = [16, 32], strides = [1, 1]} : vector<16x96xf32> to vector<16x32xf32>
    %111 = vector.extract_strided_slice %109 {offsets = [0, 0], sizes = [16, 32], strides = [1, 1]} : vector<16x64xf32> to vector<16x32xf32>
    %112 = arith.addf %110, %111 : vector<16x32xf32>
    %113 = arith.negf %112 : vector<16x32xf32>
    %114 = math.exp %113 : vector<16x32xf32>
    %cst_84 = arith.constant 1.000000e+00 : f32
    %115 = vector.broadcast %cst_84 : f32 to vector<16x32xf32>
    %116 = arith.addf %115, %114 : vector<16x32xf32>
    %117 = arith.divf %115, %116 : vector<16x32xf32>
    %118 = vector.extract_strided_slice %103 {offsets = [0, 32], sizes = [16, 32], strides = [1, 1]} : vector<16x96xf32> to vector<16x32xf32>
    %119 = vector.extract_strided_slice %109 {offsets = [0, 32], sizes = [16, 32], strides = [1, 1]} : vector<16x64xf32> to vector<16x32xf32>
    %120 = arith.addf %118, %119 : vector<16x32xf32>
    %121 = arith.negf %120 : vector<16x32xf32>
    %122 = math.exp %121 : vector<16x32xf32>
    %cst_85 = arith.constant 1.000000e+00 : f32
    %123 = vector.broadcast %cst_85 : f32 to vector<16x32xf32>
    %124 = arith.addf %123, %122 : vector<16x32xf32>
    %125 = arith.divf %123, %124 : vector<16x32xf32>
    %126 = arith.mulf %2, %125 : vector<16x32xf32>
    %c0_86 = arith.constant 0 : index
    %c0_87 = arith.constant 0 : index
    %127 = vector.load %arg24[%c0_86, %c0_87] : memref<16x64xf32, #tpu.memory_space<vmem>>, vector<16x32xf32>
    tpu.vector_store %arg24[%c0_86, %c0_87], %126 {strides = array<i32>} : memref<16x64xf32, #tpu.memory_space<vmem>>, vector<16x32xf32>,
    %cst_88 = arith.constant dense<0.000000e+00> : vector<16x32xf32>
    %128 = tpu.matmul %29, %126, %cst_88 {dimension_numbers = #tpu.dot_dimension_numbers<[1], [0], [0], [1], [0, 0, 1, 1], [], []>} : vector<16x16xf32>, vector<16x32xf32>, vector<16x32xf32> -> vector<16x32xf32>
    %c0_89 = arith.constant 0 : index
    %c32_90 = arith.constant 32 : index
    %129 = vector.load %arg24[%c0_89, %c32_90] : memref<16x64xf32, #tpu.memory_space<vmem>>, vector<16x32xf32>
    tpu.vector_store %arg24[%c0_89, %c32_90], %128 {strides = array<i32>} : memref<16x64xf32, #tpu.memory_space<vmem>>, vector<16x32xf32>,
    %c0_91 = arith.constant 0 : index
    %c0_92 = arith.constant 0 : index
    %130 = vector.load %arg24[%c0_91, %c0_92] : memref<16x64xf32, #tpu.memory_space<vmem>>, vector<16x64xf32>
    %c0_93 = arith.constant 0 : index
    %c0_94 = arith.constant 0 : index
    %131 = vector.load %arg14[%c0_93, %c0_94] : memref<64x32xf32, #tpu.memory_space<vmem>>, vector<64x32xf32>
    %cst_95 = arith.constant dense<0.000000e+00> : vector<16x32xf32>
    %132 = tpu.matmul %130, %131, %cst_95 {dimension_numbers = #tpu.dot_dimension_numbers<[1], [0], [0], [1], [0, 0, 1, 1], [], []>} : vector<16x64xf32>, vector<64x32xf32>, vector<16x32xf32> -> vector<16x32xf32>
    %c0_96 = arith.constant 0 : index
    %c0_97 = arith.constant 0 : index
    %133 = vector.load %arg17[%c0_96, %c0_97] : memref<1x32xf32, #tpu.memory_space<vmem>>, vector<1x32xf32>
    %134 = vector.broadcast %133 : vector<1x32xf32> to vector<16x32xf32>
    %135 = arith.addf %132, %134 : vector<16x32xf32>
    %136 = vector.extract_strided_slice %103 {offsets = [0, 64], sizes = [16, 32], strides = [1, 1]} : vector<16x96xf32> to vector<16x32xf32>
    %137 = arith.addf %136, %135 : vector<16x32xf32>
    %138 = math.tanh %137 : vector<16x32xf32>
    %139 = arith.mulf %117, %2 : vector<16x32xf32>
    %cst_98 = arith.constant 1.000000e+00 : f32
    %140 = vector.broadcast %cst_98 : f32 to vector<16x32xf32>
    %141 = arith.subf %140, %117 : vector<16x32xf32>
    %142 = arith.mulf %141, %138 : vector<16x32xf32>
    %143 = arith.addf %139, %142 : vector<16x32xf32>
    %cst_99 = arith.constant 0.000000e+00 : f32
    %144 = vector.broadcast %cst_99 : f32 to vector<16x32xf32>
    %145 = arith.maximumf %143, %144 : vector<16x32xf32>
    %c0_100 = arith.constant 0 : index
    %c0_101 = arith.constant 0 : index
    %146 = vector.load %arg18[%c0_100, %c0_101] : memref<32x8xf32, #tpu.memory_space<vmem>>, vector<32x8xf32>
    %cst_102 = arith.constant dense<0.000000e+00> : vector<16x8xf32>
    %147 = tpu.matmul %145, %146, %cst_102 {dimension_numbers = #tpu.dot_dimension_numbers<[1], [0], [0], [1], [0, 0, 1, 1], [], []>} : vector<16x32xf32>, vector<32x8xf32>, vector<16x8xf32> -> vector<16x8xf32>
    %c0_103 = arith.constant 0 : index
    %c0_104 = arith.constant 0 : index
    %148 = vector.load %arg19[%c0_103, %c0_104] : memref<1x8xf32, #tpu.memory_space<vmem>>, vector<1x8xf32>
    %149 = vector.broadcast %148 : vector<1x8xf32> to vector<16x8xf32>
    %150 = arith.addf %147, %149 : vector<16x8xf32>
    %c1_i32 = arith.constant 1 : i32
    %151 = arith.index_cast %c1_i32 : i32 to index
    %c0_105 = arith.constant 0 : index
    %c0_106 = arith.constant 0 : index
    %152 = vector.load %arg1[%151, %c0_105, %c0_106] : memref<2x16x16xf32, #tpu.memory_space<vmem>>, vector<1x16x16xf32>
    %153 = vector.shape_cast %152 : vector<1x16x16xf32> to vector<16x16xf32>
    %cst_107 = arith.constant dense<0.000000e+00> : vector<16xf32>
    %154 = vector.multi_reduction <add>, %153, %cst_107 [1] : vector<16x16xf32> to vector<16xf32>
    %155 = vector.shape_cast %154 : vector<16xf32> to vector<16x1xf32>
    %cst_108 = arith.constant dense<0.000000e+00> : vector<1x16xf32>
    %156 = tpu.matmul %0, %153, %cst_108 {dimension_numbers = #tpu.dot_dimension_numbers<[1], [1], [0], [0], [0, 0, 1, 0], [], []>} : vector<1x16xf32>, vector<16x16xf32>, vector<1x16xf32> -> vector<1x16xf32>
    %cst_109 = arith.constant 0.000000e+00 : f32
    %157 = vector.broadcast %cst_109 : f32 to vector<16x1xf32>
    %158 = arith.cmpf ogt, %155, %157 : vector<16x1xf32>
    %cst_110 = arith.constant 9.99999996E-13 : f32
    %159 = vector.broadcast %cst_110 : f32 to vector<16x1xf32>
    %160 = arith.maximumf %155, %159 : vector<16x1xf32>
    %161 = math.rsqrt %160 : vector<16x1xf32>
    %cst_111 = arith.constant 0.000000e+00 : f32
    %162 = vector.broadcast %cst_111 : f32 to vector<16x1xf32>
    %163 = arith.select %158, %161, %162 : vector<16x1xi1>, vector<16x1xf32>
    %cst_112 = arith.constant 0.000000e+00 : f32
    %164 = vector.broadcast %cst_112 : f32 to vector<1x16xf32>
    %165 = arith.cmpf ogt, %156, %164 : vector<1x16xf32>
    %cst_113 = arith.constant 9.99999996E-13 : f32
    %166 = vector.broadcast %cst_113 : f32 to vector<1x16xf32>
    %167 = arith.maximumf %156, %166 : vector<1x16xf32>
    %168 = math.rsqrt %167 : vector<1x16xf32>
    %cst_114 = arith.constant 0.000000e+00 : f32
    %169 = vector.broadcast %cst_114 : f32 to vector<1x16xf32>
    %170 = arith.select %165, %168, %169 : vector<1x16xi1>, vector<1x16xf32>
    %171 = vector.broadcast %163 : vector<16x1xf32> to vector<16x16xf32>
    %172 = arith.mulf %171, %153 : vector<16x16xf32>
    %173 = vector.broadcast %170 : vector<1x16xf32> to vector<16x16xf32>
    %174 = arith.mulf %172, %173 : vector<16x16xf32>
    %cst_115 = arith.constant 0.000000e+00 : f32
    %175 = vector.broadcast %cst_115 : f32 to vector<16x16xf32>
    %176 = arith.subf %175, %174 : vector<16x16xf32>
    %177 = arith.index_cast %c1_i32 : i32 to index
    %c0_116 = arith.constant 0 : index
    %c0_117 = arith.constant 0 : index
    %178 = vector.load %arg0[%177, %c0_116, %c0_117] : memref<2x16x8xf32, #tpu.memory_space<vmem>>, vector<1x16x8xf32>
    %179 = vector.shape_cast %178 : vector<1x16x8xf32> to vector<16x8xf32>
    %c0_118 = arith.constant 0 : index
    %c0_119 = arith.constant 0 : index
    %180 = vector.load %arg21[%c0_118, %c0_119] : memref<16x16xf32, #tpu.memory_space<vmem>>, vector<16x8xf32>
    tpu.vector_store %arg21[%c0_118, %c0_119], %179 {strides = array<i32>} : memref<16x16xf32, #tpu.memory_space<vmem>>, vector<16x8xf32>,
    %cst_120 = arith.constant dense<0.000000e+00> : vector<16x8xf32>
    %181 = tpu.matmul %176, %179, %cst_120 {dimension_numbers = #tpu.dot_dimension_numbers<[1], [0], [0], [1], [0, 0, 1, 1], [], []>} : vector<16x16xf32>, vector<16x8xf32>, vector<16x8xf32> -> vector<16x8xf32>
    %c0_121 = arith.constant 0 : index
    %c8_122 = arith.constant 8 : index
    %182 = vector.load %arg21[%c0_121, %c8_122] : memref<16x16xf32, #tpu.memory_space<vmem>>, vector<16x8xf32>
    tpu.vector_store %arg21[%c0_121, %c8_122], %181 {strides = array<i32>} : memref<16x16xf32, #tpu.memory_space<vmem>>, vector<16x8xf32>,
    %c0_123 = arith.constant 0 : index
    %c0_124 = arith.constant 0 : index
    %183 = vector.load %arg22[%c0_123, %c0_124] : memref<16x64xf32, #tpu.memory_space<vmem>>, vector<16x32xf32>
    tpu.vector_store %arg22[%c0_123, %c0_124], %84 {strides = array<i32>} : memref<16x64xf32, #tpu.memory_space<vmem>>, vector<16x32xf32>,
    %cst_125 = arith.constant dense<0.000000e+00> : vector<16x32xf32>
    %184 = tpu.matmul %176, %84, %cst_125 {dimension_numbers = #tpu.dot_dimension_numbers<[1], [0], [0], [1], [0, 0, 1, 1], [], []>} : vector<16x16xf32>, vector<16x32xf32>, vector<16x32xf32> -> vector<16x32xf32>
    %c0_126 = arith.constant 0 : index
    %c32_127 = arith.constant 32 : index
    %185 = vector.load %arg22[%c0_126, %c32_127] : memref<16x64xf32, #tpu.memory_space<vmem>>, vector<16x32xf32>
    tpu.vector_store %arg22[%c0_126, %c32_127], %184 {strides = array<i32>} : memref<16x64xf32, #tpu.memory_space<vmem>>, vector<16x32xf32>,
    %c0_128 = arith.constant 0 : index
    %c0_129 = arith.constant 0 : index
    %186 = vector.load %arg21[%c0_128, %c0_129] : memref<16x16xf32, #tpu.memory_space<vmem>>, vector<16x16xf32>
    %c0_130 = arith.constant 0 : index
    %c0_131 = arith.constant 0 : index
    %187 = vector.load %arg4[%c0_130, %c0_131] : memref<16x96xf32, #tpu.memory_space<vmem>>, vector<16x96xf32>
    %cst_132 = arith.constant dense<0.000000e+00> : vector<16x96xf32>
    %188 = tpu.matmul %186, %187, %cst_132 {dimension_numbers = #tpu.dot_dimension_numbers<[1], [0], [0], [1], [0, 0, 1, 1], [], []>} : vector<16x16xf32>, vector<16x96xf32>, vector<16x96xf32> -> vector<16x96xf32>
    %c0_133 = arith.constant 0 : index
    %c0_134 = arith.constant 0 : index
    %189 = vector.load %arg7[%c0_133, %c0_134] : memref<1x96xf32, #tpu.memory_space<vmem>>, vector<1x96xf32>
    %190 = vector.broadcast %189 : vector<1x96xf32> to vector<16x96xf32>
    %191 = arith.addf %188, %190 : vector<16x96xf32>
    %c0_135 = arith.constant 0 : index
    %c0_136 = arith.constant 0 : index
    %192 = vector.load %arg22[%c0_135, %c0_136] : memref<16x64xf32, #tpu.memory_space<vmem>>, vector<16x64xf32>
    %c0_137 = arith.constant 0 : index
    %c0_138 = arith.constant 0 : index
    %193 = vector.load %arg5[%c0_137, %c0_138] : memref<64x64xf32, #tpu.memory_space<vmem>>, vector<64x64xf32>
    %cst_139 = arith.constant dense<0.000000e+00> : vector<16x64xf32>
    %194 = tpu.matmul %192, %193, %cst_139 {dimension_numbers = #tpu.dot_dimension_numbers<[1], [0], [0], [1], [0, 0, 1, 1], [], []>} : vector<16x64xf32>, vector<64x64xf32>, vector<16x64xf32> -> vector<16x64xf32>
    %c0_140 = arith.constant 0 : index
    %c0_141 = arith.constant 0 : index
    %195 = vector.load %arg8[%c0_140, %c0_141] : memref<1x64xf32, #tpu.memory_space<vmem>>, vector<1x64xf32>
    %196 = vector.broadcast %195 : vector<1x64xf32> to vector<16x64xf32>
    %197 = arith.addf %194, %196 : vector<16x64xf32>
    %198 = vector.extract_strided_slice %191 {offsets = [0, 0], sizes = [16, 32], strides = [1, 1]} : vector<16x96xf32> to vector<16x32xf32>
    %199 = vector.extract_strided_slice %197 {offsets = [0, 0], sizes = [16, 32], strides = [1, 1]} : vector<16x64xf32> to vector<16x32xf32>
    %200 = arith.addf %198, %199 : vector<16x32xf32>
    %201 = arith.negf %200 : vector<16x32xf32>
    %202 = math.exp %201 : vector<16x32xf32>
    %cst_142 = arith.constant 1.000000e+00 : f32
    %203 = vector.broadcast %cst_142 : f32 to vector<16x32xf32>
    %204 = arith.addf %203, %202 : vector<16x32xf32>
    %205 = arith.divf %203, %204 : vector<16x32xf32>
    %206 = vector.extract_strided_slice %191 {offsets = [0, 32], sizes = [16, 32], strides = [1, 1]} : vector<16x96xf32> to vector<16x32xf32>
    %207 = vector.extract_strided_slice %197 {offsets = [0, 32], sizes = [16, 32], strides = [1, 1]} : vector<16x64xf32> to vector<16x32xf32>
    %208 = arith.addf %206, %207 : vector<16x32xf32>
    %209 = arith.negf %208 : vector<16x32xf32>
    %210 = math.exp %209 : vector<16x32xf32>
    %cst_143 = arith.constant 1.000000e+00 : f32
    %211 = vector.broadcast %cst_143 : f32 to vector<16x32xf32>
    %212 = arith.addf %211, %210 : vector<16x32xf32>
    %213 = arith.divf %211, %212 : vector<16x32xf32>
    %214 = arith.mulf %84, %213 : vector<16x32xf32>
    %c0_144 = arith.constant 0 : index
    %c0_145 = arith.constant 0 : index
    %215 = vector.load %arg22[%c0_144, %c0_145] : memref<16x64xf32, #tpu.memory_space<vmem>>, vector<16x32xf32>
    tpu.vector_store %arg22[%c0_144, %c0_145], %214 {strides = array<i32>} : memref<16x64xf32, #tpu.memory_space<vmem>>, vector<16x32xf32>,
    %cst_146 = arith.constant dense<0.000000e+00> : vector<16x32xf32>
    %216 = tpu.matmul %176, %214, %cst_146 {dimension_numbers = #tpu.dot_dimension_numbers<[1], [0], [0], [1], [0, 0, 1, 1], [], []>} : vector<16x16xf32>, vector<16x32xf32>, vector<16x32xf32> -> vector<16x32xf32>
    %c0_147 = arith.constant 0 : index
    %c32_148 = arith.constant 32 : index
    %217 = vector.load %arg22[%c0_147, %c32_148] : memref<16x64xf32, #tpu.memory_space<vmem>>, vector<16x32xf32>
    tpu.vector_store %arg22[%c0_147, %c32_148], %216 {strides = array<i32>} : memref<16x64xf32, #tpu.memory_space<vmem>>, vector<16x32xf32>,
    %c0_149 = arith.constant 0 : index
    %c0_150 = arith.constant 0 : index
    %218 = vector.load %arg22[%c0_149, %c0_150] : memref<16x64xf32, #tpu.memory_space<vmem>>, vector<16x64xf32>
    %c0_151 = arith.constant 0 : index
    %c0_152 = arith.constant 0 : index
    %219 = vector.load %arg6[%c0_151, %c0_152] : memref<64x32xf32, #tpu.memory_space<vmem>>, vector<64x32xf32>
    %cst_153 = arith.constant dense<0.000000e+00> : vector<16x32xf32>
    %220 = tpu.matmul %218, %219, %cst_153 {dimension_numbers = #tpu.dot_dimension_numbers<[1], [0], [0], [1], [0, 0, 1, 1], [], []>} : vector<16x64xf32>, vector<64x32xf32>, vector<16x32xf32> -> vector<16x32xf32>
    %c0_154 = arith.constant 0 : index
    %c0_155 = arith.constant 0 : index
    %221 = vector.load %arg9[%c0_154, %c0_155] : memref<1x32xf32, #tpu.memory_space<vmem>>, vector<1x32xf32>
    %222 = vector.broadcast %221 : vector<1x32xf32> to vector<16x32xf32>
    %223 = arith.addf %220, %222 : vector<16x32xf32>
    %224 = vector.extract_strided_slice %191 {offsets = [0, 64], sizes = [16, 32], strides = [1, 1]} : vector<16x96xf32> to vector<16x32xf32>
    %225 = arith.addf %224, %223 : vector<16x32xf32>
    %226 = math.tanh %225 : vector<16x32xf32>
    %227 = arith.mulf %205, %84 : vector<16x32xf32>
    %cst_156 = arith.constant 1.000000e+00 : f32
    %228 = vector.broadcast %cst_156 : f32 to vector<16x32xf32>
    %229 = arith.subf %228, %205 : vector<16x32xf32>
    %230 = arith.mulf %229, %226 : vector<16x32xf32>
    %231 = arith.addf %227, %230 : vector<16x32xf32>
    %cst_157 = arith.constant 0.000000e+00 : f32
    %232 = vector.broadcast %cst_157 : f32 to vector<16x32xf32>
    %233 = arith.maximumf %231, %232 : vector<16x32xf32>
    %c0_158 = arith.constant 0 : index
    %c0_159 = arith.constant 0 : index
    %234 = vector.load %arg10[%c0_158, %c0_159] : memref<32x8xf32, #tpu.memory_space<vmem>>, vector<32x8xf32>
    %cst_160 = arith.constant dense<0.000000e+00> : vector<16x8xf32>
    %235 = tpu.matmul %233, %234, %cst_160 {dimension_numbers = #tpu.dot_dimension_numbers<[1], [0], [0], [1], [0, 0, 1, 1], [], []>} : vector<16x32xf32>, vector<32x8xf32>, vector<16x8xf32> -> vector<16x8xf32>
    %c0_161 = arith.constant 0 : index
    %c0_162 = arith.constant 0 : index
    %236 = vector.load %arg11[%c0_161, %c0_162] : memref<1x8xf32, #tpu.memory_space<vmem>>, vector<1x8xf32>
    %237 = vector.broadcast %236 : vector<1x8xf32> to vector<16x8xf32>
    %238 = arith.addf %235, %237 : vector<16x8xf32>
    %c0_163 = arith.constant 0 : index
    %c0_164 = arith.constant 0 : index
    %239 = vector.load %arg23[%c0_163, %c0_164] : memref<16x16xf32, #tpu.memory_space<vmem>>, vector<16x8xf32>
    tpu.vector_store %arg23[%c0_163, %c0_164], %238 {strides = array<i32>} : memref<16x16xf32, #tpu.memory_space<vmem>>, vector<16x8xf32>,
    %cst_165 = arith.constant dense<0.000000e+00> : vector<16x8xf32>
    %240 = tpu.matmul %176, %238, %cst_165 {dimension_numbers = #tpu.dot_dimension_numbers<[1], [0], [0], [1], [0, 0, 1, 1], [], []>} : vector<16x16xf32>, vector<16x8xf32>, vector<16x8xf32> -> vector<16x8xf32>
    %c0_166 = arith.constant 0 : index
    %c8_167 = arith.constant 8 : index
    %241 = vector.load %arg23[%c0_166, %c8_167] : memref<16x16xf32, #tpu.memory_space<vmem>>, vector<16x8xf32>
    tpu.vector_store %arg23[%c0_166, %c8_167], %240 {strides = array<i32>} : memref<16x16xf32, #tpu.memory_space<vmem>>, vector<16x8xf32>,
    %c0_168 = arith.constant 0 : index
    %c0_169 = arith.constant 0 : index
    %242 = vector.load %arg24[%c0_168, %c0_169] : memref<16x64xf32, #tpu.memory_space<vmem>>, vector<16x32xf32>
    tpu.vector_store %arg24[%c0_168, %c0_169], %143 {strides = array<i32>} : memref<16x64xf32, #tpu.memory_space<vmem>>, vector<16x32xf32>,
    %cst_170 = arith.constant dense<0.000000e+00> : vector<16x32xf32>
    %243 = tpu.matmul %176, %143, %cst_170 {dimension_numbers = #tpu.dot_dimension_numbers<[1], [0], [0], [1], [0, 0, 1, 1], [], []>} : vector<16x16xf32>, vector<16x32xf32>, vector<16x32xf32> -> vector<16x32xf32>
    %c0_171 = arith.constant 0 : index
    %c32_172 = arith.constant 32 : index
    %244 = vector.load %arg24[%c0_171, %c32_172] : memref<16x64xf32, #tpu.memory_space<vmem>>, vector<16x32xf32>
    tpu.vector_store %arg24[%c0_171, %c32_172], %243 {strides = array<i32>} : memref<16x64xf32, #tpu.memory_space<vmem>>, vector<16x32xf32>,
    %c0_173 = arith.constant 0 : index
    %c0_174 = arith.constant 0 : index
    %245 = vector.load %arg23[%c0_173, %c0_174] : memref<16x16xf32, #tpu.memory_space<vmem>>, vector<16x16xf32>
    %c0_175 = arith.constant 0 : index
    %c0_176 = arith.constant 0 : index
    %246 = vector.load %arg12[%c0_175, %c0_176] : memref<16x96xf32, #tpu.memory_space<vmem>>, vector<16x96xf32>
    %cst_177 = arith.constant dense<0.000000e+00> : vector<16x96xf32>
    %247 = tpu.matmul %245, %246, %cst_177 {dimension_numbers = #tpu.dot_dimension_numbers<[1], [0], [0], [1], [0, 0, 1, 1], [], []>} : vector<16x16xf32>, vector<16x96xf32>, vector<16x96xf32> -> vector<16x96xf32>
    %c0_178 = arith.constant 0 : index
    %c0_179 = arith.constant 0 : index
    %248 = vector.load %arg15[%c0_178, %c0_179] : memref<1x96xf32, #tpu.memory_space<vmem>>, vector<1x96xf32>
    %249 = vector.broadcast %248 : vector<1x96xf32> to vector<16x96xf32>
    %250 = arith.addf %247, %249 : vector<16x96xf32>
    %c0_180 = arith.constant 0 : index
    %c0_181 = arith.constant 0 : index
    %251 = vector.load %arg24[%c0_180, %c0_181] : memref<16x64xf32, #tpu.memory_space<vmem>>, vector<16x64xf32>
    %c0_182 = arith.constant 0 : index
    %c0_183 = arith.constant 0 : index
    %252 = vector.load %arg13[%c0_182, %c0_183] : memref<64x64xf32, #tpu.memory_space<vmem>>, vector<64x64xf32>
    %cst_184 = arith.constant dense<0.000000e+00> : vector<16x64xf32>
    %253 = tpu.matmul %251, %252, %cst_184 {dimension_numbers = #tpu.dot_dimension_numbers<[1], [0], [0], [1], [0, 0, 1, 1], [], []>} : vector<16x64xf32>, vector<64x64xf32>, vector<16x64xf32> -> vector<16x64xf32>
    %c0_185 = arith.constant 0 : index
    %c0_186 = arith.constant 0 : index
    %254 = vector.load %arg16[%c0_185, %c0_186] : memref<1x64xf32, #tpu.memory_space<vmem>>, vector<1x64xf32>
    %255 = vector.broadcast %254 : vector<1x64xf32> to vector<16x64xf32>
    %256 = arith.addf %253, %255 : vector<16x64xf32>
    %257 = vector.extract_strided_slice %250 {offsets = [0, 0], sizes = [16, 32], strides = [1, 1]} : vector<16x96xf32> to vector<16x32xf32>
    %258 = vector.extract_strided_slice %256 {offsets = [0, 0], sizes = [16, 32], strides = [1, 1]} : vector<16x64xf32> to vector<16x32xf32>
    %259 = arith.addf %257, %258 : vector<16x32xf32>
    %260 = arith.negf %259 : vector<16x32xf32>
    %261 = math.exp %260 : vector<16x32xf32>
    %cst_187 = arith.constant 1.000000e+00 : f32
    %262 = vector.broadcast %cst_187 : f32 to vector<16x32xf32>
    %263 = arith.addf %262, %261 : vector<16x32xf32>
    %264 = arith.divf %262, %263 : vector<16x32xf32>
    %265 = vector.extract_strided_slice %250 {offsets = [0, 32], sizes = [16, 32], strides = [1, 1]} : vector<16x96xf32> to vector<16x32xf32>
    %266 = vector.extract_strided_slice %256 {offsets = [0, 32], sizes = [16, 32], strides = [1, 1]} : vector<16x64xf32> to vector<16x32xf32>
    %267 = arith.addf %265, %266 : vector<16x32xf32>
    %268 = arith.negf %267 : vector<16x32xf32>
    %269 = math.exp %268 : vector<16x32xf32>
    %cst_188 = arith.constant 1.000000e+00 : f32
    %270 = vector.broadcast %cst_188 : f32 to vector<16x32xf32>
    %271 = arith.addf %270, %269 : vector<16x32xf32>
    %272 = arith.divf %270, %271 : vector<16x32xf32>
    %273 = arith.mulf %143, %272 : vector<16x32xf32>
    %c0_189 = arith.constant 0 : index
    %c0_190 = arith.constant 0 : index
    %274 = vector.load %arg24[%c0_189, %c0_190] : memref<16x64xf32, #tpu.memory_space<vmem>>, vector<16x32xf32>
    tpu.vector_store %arg24[%c0_189, %c0_190], %273 {strides = array<i32>} : memref<16x64xf32, #tpu.memory_space<vmem>>, vector<16x32xf32>,
    %cst_191 = arith.constant dense<0.000000e+00> : vector<16x32xf32>
    %275 = tpu.matmul %176, %273, %cst_191 {dimension_numbers = #tpu.dot_dimension_numbers<[1], [0], [0], [1], [0, 0, 1, 1], [], []>} : vector<16x16xf32>, vector<16x32xf32>, vector<16x32xf32> -> vector<16x32xf32>
    %c0_192 = arith.constant 0 : index
    %c32_193 = arith.constant 32 : index
    %276 = vector.load %arg24[%c0_192, %c32_193] : memref<16x64xf32, #tpu.memory_space<vmem>>, vector<16x32xf32>
    tpu.vector_store %arg24[%c0_192, %c32_193], %275 {strides = array<i32>} : memref<16x64xf32, #tpu.memory_space<vmem>>, vector<16x32xf32>,
    %c0_194 = arith.constant 0 : index
    %c0_195 = arith.constant 0 : index
    %277 = vector.load %arg24[%c0_194, %c0_195] : memref<16x64xf32, #tpu.memory_space<vmem>>, vector<16x64xf32>
    %c0_196 = arith.constant 0 : index
    %c0_197 = arith.constant 0 : index
    %278 = vector.load %arg14[%c0_196, %c0_197] : memref<64x32xf32, #tpu.memory_space<vmem>>, vector<64x32xf32>
    %cst_198 = arith.constant dense<0.000000e+00> : vector<16x32xf32>
    %279 = tpu.matmul %277, %278, %cst_198 {dimension_numbers = #tpu.dot_dimension_numbers<[1], [0], [0], [1], [0, 0, 1, 1], [], []>} : vector<16x64xf32>, vector<64x32xf32>, vector<16x32xf32> -> vector<16x32xf32>
    %c0_199 = arith.constant 0 : index
    %c0_200 = arith.constant 0 : index
    %280 = vector.load %arg17[%c0_199, %c0_200] : memref<1x32xf32, #tpu.memory_space<vmem>>, vector<1x32xf32>
    %281 = vector.broadcast %280 : vector<1x32xf32> to vector<16x32xf32>
    %282 = arith.addf %279, %281 : vector<16x32xf32>
    %283 = vector.extract_strided_slice %250 {offsets = [0, 64], sizes = [16, 32], strides = [1, 1]} : vector<16x96xf32> to vector<16x32xf32>
    %284 = arith.addf %283, %282 : vector<16x32xf32>
    %285 = math.tanh %284 : vector<16x32xf32>
    %286 = arith.mulf %264, %143 : vector<16x32xf32>
    %cst_201 = arith.constant 1.000000e+00 : f32
    %287 = vector.broadcast %cst_201 : f32 to vector<16x32xf32>
    %288 = arith.subf %287, %264 : vector<16x32xf32>
    %289 = arith.mulf %288, %285 : vector<16x32xf32>
    %290 = arith.addf %286, %289 : vector<16x32xf32>
    %cst_202 = arith.constant 0.000000e+00 : f32
    %291 = vector.broadcast %cst_202 : f32 to vector<16x32xf32>
    %292 = arith.maximumf %290, %291 : vector<16x32xf32>
    %c0_203 = arith.constant 0 : index
    %c0_204 = arith.constant 0 : index
    %293 = vector.load %arg18[%c0_203, %c0_204] : memref<32x8xf32, #tpu.memory_space<vmem>>, vector<32x8xf32>
    %cst_205 = arith.constant dense<0.000000e+00> : vector<16x8xf32>
    %294 = tpu.matmul %292, %293, %cst_205 {dimension_numbers = #tpu.dot_dimension_numbers<[1], [0], [0], [1], [0, 0, 1, 1], [], []>} : vector<16x32xf32>, vector<32x8xf32>, vector<16x8xf32> -> vector<16x8xf32>
    %c0_206 = arith.constant 0 : index
    %c0_207 = arith.constant 0 : index
    %295 = vector.load %arg19[%c0_206, %c0_207] : memref<1x8xf32, #tpu.memory_space<vmem>>, vector<1x8xf32>
    %296 = vector.broadcast %295 : vector<1x8xf32> to vector<16x8xf32>
    %297 = arith.addf %294, %296 : vector<16x8xf32>
    %c2_i32 = arith.constant 2 : i32
    %c0_208 = arith.constant 0 : index
    %c0_209 = arith.constant 0 : index
    %c0_210 = arith.constant 0 : index
    %298 = vector.load %arg20[%c0_208, %c0_209, %c0_210] : memref<3x16x8xf32, #tpu.memory_space<vmem>>, vector<1x16x8xf32>
    %299 = vector.shape_cast %298 : vector<1x16x8xf32> to vector<16x8xf32>
    %300 = vector.shape_cast %297 : vector<16x8xf32> to vector<1x16x8xf32>
    tpu.vector_store %arg20[%c0_208, %c0_209, %c0_210], %300 {strides = array<i32>} : memref<3x16x8xf32, #tpu.memory_space<vmem>>, vector<1x16x8xf32>,
    %301 = tpu.iota {dimensions = array<i32: 0>} : vector<16x16xi32>
    %302 = tpu.iota {dimensions = array<i32: 1>} : vector<16x16xi32>
    %c16_i32 = arith.constant 16 : i32
    %303 = vector.broadcast %c16_i32 : i32 to vector<16x16xi32>
    %304 = arith.cmpi slt, %301, %303 : vector<16x16xi32>
    %c16_i32_211 = arith.constant 16 : i32
    %305 = vector.broadcast %c16_i32_211 : i32 to vector<16x16xi32>
    %306 = arith.cmpi slt, %302, %305 : vector<16x16xi32>
    %307 = arith.andi %304, %306 : vector<16x16xi1>
    %308 = tpu.iota {dimensions = array<i32: 1>} : vector<2x8xi32>
    %309 = tpu.iota {dimensions = array<i32: 0>} : vector<2x8xi32>
    %310 = arith.cmpi eq, %308, %309 : vector<2x8xi32>
    %311 = arith.extui %310 : vector<2x8xi1> to vector<2x8xi32>
    %312 = arith.sitofp %311 : vector<2x8xi32> to vector<2x8xf32>
    %c0_i32_212 = arith.constant 0 : i32
    %cst_213 = arith.constant dense<0.000000e+00> : vector<2x16xf32>
    %313 = tpu.matmul %312, %297, %cst_213 {dimension_numbers = #tpu.dot_dimension_numbers<[1], [1], [0], [0], [0, 0, 1, 0], [], []>} : vector<2x8xf32>, vector<16x8xf32>, vector<2x16xf32> -> vector<2x16xf32>
    %314 = vector.extract_strided_slice %313 {offsets = [0, 0], sizes = [1, 16], strides = [1, 1]} : vector<2x16xf32> to vector<1x16xf32>
    %cst_214 = arith.constant 1.000000e+02 : f32
    %315 = vector.broadcast %cst_214 : f32 to vector<1x16xf32>
    %316 = arith.mulf %314, %315 : vector<1x16xf32>
    %cst_215 = arith.constant 0.000000e+00 : f32
    %317 = vector.broadcast %cst_215 : f32 to vector<1x16xf32>
    %318 = arith.addf %316, %317 : vector<1x16xf32>
    %319 = vector.extract_strided_slice %313 {offsets = [1, 0], sizes = [1, 16], strides = [1, 1]} : vector<2x16xf32> to vector<1x16xf32>
    %cst_216 = arith.constant 1.000000e+02 : f32
    %320 = vector.broadcast %cst_216 : f32 to vector<1x16xf32>
    %321 = arith.mulf %319, %320 : vector<1x16xf32>
    %cst_217 = arith.constant 0.000000e+00 : f32
    %322 = vector.broadcast %cst_217 : f32 to vector<1x16xf32>
    %323 = arith.addf %321, %322 : vector<1x16xf32>
    %324 = vector.extract_strided_slice %297 {offsets = [0, 0], sizes = [16, 1], strides = [1, 1]} : vector<16x8xf32> to vector<16x1xf32>
    %cst_218 = arith.constant 1.000000e+02 : f32
    %325 = vector.broadcast %cst_218 : f32 to vector<16x1xf32>
    %326 = arith.mulf %324, %325 : vector<16x1xf32>
    %cst_219 = arith.constant 0.000000e+00 : f32
    %327 = vector.broadcast %cst_219 : f32 to vector<16x1xf32>
    %328 = arith.addf %326, %327 : vector<16x1xf32>
    %329 = vector.extract_strided_slice %297 {offsets = [0, 1], sizes = [16, 1], strides = [1, 1]} : vector<16x8xf32> to vector<16x1xf32>
    %cst_220 = arith.constant 1.000000e+02 : f32
    %330 = vector.broadcast %cst_220 : f32 to vector<16x1xf32>
    %331 = arith.mulf %329, %330 : vector<16x1xf32>
    %cst_221 = arith.constant 0.000000e+00 : f32
    %332 = vector.broadcast %cst_221 : f32 to vector<16x1xf32>
    %333 = arith.addf %331, %332 : vector<16x1xf32>
    %334 = vector.broadcast %328 : vector<16x1xf32> to vector<16x16xf32>
    %335 = vector.broadcast %318 : vector<1x16xf32> to vector<16x16xf32>
    %336 = arith.subf %334, %335 : vector<16x16xf32>
    %337 = vector.broadcast %333 : vector<16x1xf32> to vector<16x16xf32>
    %338 = vector.broadcast %323 : vector<1x16xf32> to vector<16x16xf32>
    %339 = arith.subf %337, %338 : vector<16x16xf32>
    %340 = arith.mulf %336, %336 : vector<16x16xf32>
    %341 = arith.mulf %339, %339 : vector<16x16xf32>
    %342 = arith.addf %340, %341 : vector<16x16xf32>
    %343 = math.sqrt %342 : vector<16x16xf32>
    %cst_222 = arith.constant 4.000000e+01 : f32
    %344 = vector.broadcast %cst_222 : f32 to vector<16x16xf32>
    %345 = arith.cmpf olt, %343, %344 : vector<16x16xf32>
    %346 = arith.andi %307, %345 : vector<16x16xi1>
    %cst_223 = arith.constant 0.000000e+00 : f32
    %347 = vector.broadcast %cst_223 : f32 to vector<16x16xf32>
    %348 = arith.cmpf ogt, %343, %347 : vector<16x16xf32>
    %349 = arith.andi %346, %348 : vector<16x16xi1>
    %cst_224 = arith.constant 0.000000e+00 : f32
    %350 = vector.broadcast %cst_224 : f32 to vector<16x16xf32>
    %351 = arith.subf %343, %350 : vector<16x16xf32>
    %cst_225 = arith.constant 2.000000e-02 : f32
    %352 = vector.broadcast %cst_225 : f32 to vector<16x16xf32>
    %353 = arith.mulf %351, %352 : vector<16x16xf32>
    %cst_226 = arith.constant 0.000000e+00 : f32
    %354 = vector.broadcast %cst_226 : f32 to vector<16x16xf32>
    %355 = arith.select %349, %353, %354 : vector<16x16xi1>, vector<16x16xf32>
    %cst_227 = arith.constant dense<0.000000e+00> : vector<16xf32>
    %356 = vector.multi_reduction <add>, %355, %cst_227 [1] : vector<16x16xf32> to vector<16xf32>
    %357 = vector.shape_cast %356 : vector<16xf32> to vector<16x1xf32>
    %cst_228 = arith.constant dense<0.000000e+00> : vector<1x16xf32>
    %358 = tpu.matmul %0, %355, %cst_228 {dimension_numbers = #tpu.dot_dimension_numbers<[1], [1], [0], [0], [0, 0, 1, 0], [], []>} : vector<1x16xf32>, vector<16x16xf32>, vector<1x16xf32> -> vector<1x16xf32>
    %cst_229 = arith.constant 0.000000e+00 : f32
    %359 = vector.broadcast %cst_229 : f32 to vector<16x1xf32>
    %360 = arith.cmpf ogt, %357, %359 : vector<16x1xf32>
    %cst_230 = arith.constant 9.99999996E-13 : f32
    %361 = vector.broadcast %cst_230 : f32 to vector<16x1xf32>
    %362 = arith.maximumf %357, %361 : vector<16x1xf32>
    %363 = math.rsqrt %362 : vector<16x1xf32>
    %cst_231 = arith.constant 0.000000e+00 : f32
    %364 = vector.broadcast %cst_231 : f32 to vector<16x1xf32>
    %365 = arith.select %360, %363, %364 : vector<16x1xi1>, vector<16x1xf32>
    %cst_232 = arith.constant 0.000000e+00 : f32
    %366 = vector.broadcast %cst_232 : f32 to vector<1x16xf32>
    %367 = arith.cmpf ogt, %358, %366 : vector<1x16xf32>
    %cst_233 = arith.constant 9.99999996E-13 : f32
    %368 = vector.broadcast %cst_233 : f32 to vector<1x16xf32>
    %369 = arith.maximumf %358, %368 : vector<1x16xf32>
    %370 = math.rsqrt %369 : vector<1x16xf32>
    %cst_234 = arith.constant 0.000000e+00 : f32
    %371 = vector.broadcast %cst_234 : f32 to vector<1x16xf32>
    %372 = arith.select %367, %370, %371 : vector<1x16xi1>, vector<1x16xf32>
    %373 = vector.broadcast %365 : vector<16x1xf32> to vector<16x16xf32>
    %374 = arith.mulf %373, %355 : vector<16x16xf32>
    %375 = vector.broadcast %372 : vector<1x16xf32> to vector<16x16xf32>
    %376 = arith.mulf %374, %375 : vector<16x16xf32>
    %cst_235 = arith.constant 0.000000e+00 : f32
    %377 = vector.broadcast %cst_235 : f32 to vector<16x16xf32>
    %378 = arith.subf %377, %376 : vector<16x16xf32>
    %c0_236 = arith.constant 0 : index
    %c0_237 = arith.constant 0 : index
    %379 = vector.load %arg21[%c0_236, %c0_237] : memref<16x16xf32, #tpu.memory_space<vmem>>, vector<16x8xf32>
    tpu.vector_store %arg21[%c0_236, %c0_237], %297 {strides = array<i32>} : memref<16x16xf32, #tpu.memory_space<vmem>>, vector<16x8xf32>,
    %cst_238 = arith.constant dense<0.000000e+00> : vector<16x8xf32>
    %380 = tpu.matmul %378, %297, %cst_238 {dimension_numbers = #tpu.dot_dimension_numbers<[1], [0], [0], [1], [0, 0, 1, 1], [], []>} : vector<16x16xf32>, vector<16x8xf32>, vector<16x8xf32> -> vector<16x8xf32>
    %c0_239 = arith.constant 0 : index
    %c8_240 = arith.constant 8 : index
    %381 = vector.load %arg21[%c0_239, %c8_240] : memref<16x16xf32, #tpu.memory_space<vmem>>, vector<16x8xf32>
    tpu.vector_store %arg21[%c0_239, %c8_240], %380 {strides = array<i32>} : memref<16x16xf32, #tpu.memory_space<vmem>>, vector<16x8xf32>,
    %c0_241 = arith.constant 0 : index
    %c0_242 = arith.constant 0 : index
    %382 = vector.load %arg22[%c0_241, %c0_242] : memref<16x64xf32, #tpu.memory_space<vmem>>, vector<16x32xf32>
    tpu.vector_store %arg22[%c0_241, %c0_242], %231 {strides = array<i32>} : memref<16x64xf32, #tpu.memory_space<vmem>>, vector<16x32xf32>,
    %cst_243 = arith.constant dense<0.000000e+00> : vector<16x32xf32>
    %383 = tpu.matmul %378, %231, %cst_243 {dimension_numbers = #tpu.dot_dimension_numbers<[1], [0], [0], [1], [0, 0, 1, 1], [], []>} : vector<16x16xf32>, vector<16x32xf32>, vector<16x32xf32> -> vector<16x32xf32>
    %c0_244 = arith.constant 0 : index
    %c32_245 = arith.constant 32 : index
    %384 = vector.load %arg22[%c0_244, %c32_245] : memref<16x64xf32, #tpu.memory_space<vmem>>, vector<16x32xf32>
    tpu.vector_store %arg22[%c0_244, %c32_245], %383 {strides = array<i32>} : memref<16x64xf32, #tpu.memory_space<vmem>>, vector<16x32xf32>,
    %c0_246 = arith.constant 0 : index
    %c0_247 = arith.constant 0 : index
    %385 = vector.load %arg21[%c0_246, %c0_247] : memref<16x16xf32, #tpu.memory_space<vmem>>, vector<16x16xf32>
    %c0_248 = arith.constant 0 : index
    %c0_249 = arith.constant 0 : index
    %386 = vector.load %arg4[%c0_248, %c0_249] : memref<16x96xf32, #tpu.memory_space<vmem>>, vector<16x96xf32>
    %cst_250 = arith.constant dense<0.000000e+00> : vector<16x96xf32>
    %387 = tpu.matmul %385, %386, %cst_250 {dimension_numbers = #tpu.dot_dimension_numbers<[1], [0], [0], [1], [0, 0, 1, 1], [], []>} : vector<16x16xf32>, vector<16x96xf32>, vector<16x96xf32> -> vector<16x96xf32>
    %c0_251 = arith.constant 0 : index
    %c0_252 = arith.constant 0 : index
    %388 = vector.load %arg7[%c0_251, %c0_252] : memref<1x96xf32, #tpu.memory_space<vmem>>, vector<1x96xf32>
    %389 = vector.broadcast %388 : vector<1x96xf32> to vector<16x96xf32>
    %390 = arith.addf %387, %389 : vector<16x96xf32>
    %c0_253 = arith.constant 0 : index
    %c0_254 = arith.constant 0 : index
    %391 = vector.load %arg22[%c0_253, %c0_254] : memref<16x64xf32, #tpu.memory_space<vmem>>, vector<16x64xf32>
    %c0_255 = arith.constant 0 : index
    %c0_256 = arith.constant 0 : index
    %392 = vector.load %arg5[%c0_255, %c0_256] : memref<64x64xf32, #tpu.memory_space<vmem>>, vector<64x64xf32>
    %cst_257 = arith.constant dense<0.000000e+00> : vector<16x64xf32>
    %393 = tpu.matmul %391, %392, %cst_257 {dimension_numbers = #tpu.dot_dimension_numbers<[1], [0], [0], [1], [0, 0, 1, 1], [], []>} : vector<16x64xf32>, vector<64x64xf32>, vector<16x64xf32> -> vector<16x64xf32>
    %c0_258 = arith.constant 0 : index
    %c0_259 = arith.constant 0 : index
    %394 = vector.load %arg8[%c0_258, %c0_259] : memref<1x64xf32, #tpu.memory_space<vmem>>, vector<1x64xf32>
    %395 = vector.broadcast %394 : vector<1x64xf32> to vector<16x64xf32>
    %396 = arith.addf %393, %395 : vector<16x64xf32>
    %397 = vector.extract_strided_slice %390 {offsets = [0, 0], sizes = [16, 32], strides = [1, 1]} : vector<16x96xf32> to vector<16x32xf32>
    %398 = vector.extract_strided_slice %396 {offsets = [0, 0], sizes = [16, 32], strides = [1, 1]} : vector<16x64xf32> to vector<16x32xf32>
    %399 = arith.addf %397, %398 : vector<16x32xf32>
    %400 = arith.negf %399 : vector<16x32xf32>
    %401 = math.exp %400 : vector<16x32xf32>
    %cst_260 = arith.constant 1.000000e+00 : f32
    %402 = vector.broadcast %cst_260 : f32 to vector<16x32xf32>
    %403 = arith.addf %402, %401 : vector<16x32xf32>
    %404 = arith.divf %402, %403 : vector<16x32xf32>
    %405 = vector.extract_strided_slice %390 {offsets = [0, 32], sizes = [16, 32], strides = [1, 1]} : vector<16x96xf32> to vector<16x32xf32>
    %406 = vector.extract_strided_slice %396 {offsets = [0, 32], sizes = [16, 32], strides = [1, 1]} : vector<16x64xf32> to vector<16x32xf32>
    %407 = arith.addf %405, %406 : vector<16x32xf32>
    %408 = arith.negf %407 : vector<16x32xf32>
    %409 = math.exp %408 : vector<16x32xf32>
    %cst_261 = arith.constant 1.000000e+00 : f32
    %410 = vector.broadcast %cst_261 : f32 to vector<16x32xf32>
    %411 = arith.addf %410, %409 : vector<16x32xf32>
    %412 = arith.divf %410, %411 : vector<16x32xf32>
    %413 = arith.mulf %231, %412 : vector<16x32xf32>
    %c0_262 = arith.constant 0 : index
    %c0_263 = arith.constant 0 : index
    %414 = vector.load %arg22[%c0_262, %c0_263] : memref<16x64xf32, #tpu.memory_space<vmem>>, vector<16x32xf32>
    tpu.vector_store %arg22[%c0_262, %c0_263], %413 {strides = array<i32>} : memref<16x64xf32, #tpu.memory_space<vmem>>, vector<16x32xf32>,
    %cst_264 = arith.constant dense<0.000000e+00> : vector<16x32xf32>
    %415 = tpu.matmul %378, %413, %cst_264 {dimension_numbers = #tpu.dot_dimension_numbers<[1], [0], [0], [1], [0, 0, 1, 1], [], []>} : vector<16x16xf32>, vector<16x32xf32>, vector<16x32xf32> -> vector<16x32xf32>
    %c0_265 = arith.constant 0 : index
    %c32_266 = arith.constant 32 : index
    %416 = vector.load %arg22[%c0_265, %c32_266] : memref<16x64xf32, #tpu.memory_space<vmem>>, vector<16x32xf32>
    tpu.vector_store %arg22[%c0_265, %c32_266], %415 {strides = array<i32>} : memref<16x64xf32, #tpu.memory_space<vmem>>, vector<16x32xf32>,
    %c0_267 = arith.constant 0 : index
    %c0_268 = arith.constant 0 : index
    %417 = vector.load %arg22[%c0_267, %c0_268] : memref<16x64xf32, #tpu.memory_space<vmem>>, vector<16x64xf32>
    %c0_269 = arith.constant 0 : index
    %c0_270 = arith.constant 0 : index
    %418 = vector.load %arg6[%c0_269, %c0_270] : memref<64x32xf32, #tpu.memory_space<vmem>>, vector<64x32xf32>
    %cst_271 = arith.constant dense<0.000000e+00> : vector<16x32xf32>
    %419 = tpu.matmul %417, %418, %cst_271 {dimension_numbers = #tpu.dot_dimension_numbers<[1], [0], [0], [1], [0, 0, 1, 1], [], []>} : vector<16x64xf32>, vector<64x32xf32>, vector<16x32xf32> -> vector<16x32xf32>
    %c0_272 = arith.constant 0 : index
    %c0_273 = arith.constant 0 : index
    %420 = vector.load %arg9[%c0_272, %c0_273] : memref<1x32xf32, #tpu.memory_space<vmem>>, vector<1x32xf32>
    %421 = vector.broadcast %420 : vector<1x32xf32> to vector<16x32xf32>
    %422 = arith.addf %419, %421 : vector<16x32xf32>
    %423 = vector.extract_strided_slice %390 {offsets = [0, 64], sizes = [16, 32], strides = [1, 1]} : vector<16x96xf32> to vector<16x32xf32>
    %424 = arith.addf %423, %422 : vector<16x32xf32>
    %425 = math.tanh %424 : vector<16x32xf32>
    %426 = arith.mulf %404, %231 : vector<16x32xf32>
    %cst_274 = arith.constant 1.000000e+00 : f32
    %427 = vector.broadcast %cst_274 : f32 to vector<16x32xf32>
    %428 = arith.subf %427, %404 : vector<16x32xf32>
    %429 = arith.mulf %428, %425 : vector<16x32xf32>
    %430 = arith.addf %426, %429 : vector<16x32xf32>
    %cst_275 = arith.constant 0.000000e+00 : f32
    %431 = vector.broadcast %cst_275 : f32 to vector<16x32xf32>
    %432 = arith.maximumf %430, %431 : vector<16x32xf32>
    %c0_276 = arith.constant 0 : index
    %c0_277 = arith.constant 0 : index
    %433 = vector.load %arg10[%c0_276, %c0_277] : memref<32x8xf32, #tpu.memory_space<vmem>>, vector<32x8xf32>
    %cst_278 = arith.constant dense<0.000000e+00> : vector<16x8xf32>
    %434 = tpu.matmul %432, %433, %cst_278 {dimension_numbers = #tpu.dot_dimension_numbers<[1], [0], [0], [1], [0, 0, 1, 1], [], []>} : vector<16x32xf32>, vector<32x8xf32>, vector<16x8xf32> -> vector<16x8xf32>
    %c0_279 = arith.constant 0 : index
    %c0_280 = arith.constant 0 : index
    %435 = vector.load %arg11[%c0_279, %c0_280] : memref<1x8xf32, #tpu.memory_space<vmem>>, vector<1x8xf32>
    %436 = vector.broadcast %435 : vector<1x8xf32> to vector<16x8xf32>
    %437 = arith.addf %434, %436 : vector<16x8xf32>
    %c0_281 = arith.constant 0 : index
    %c0_282 = arith.constant 0 : index
    %438 = vector.load %arg23[%c0_281, %c0_282] : memref<16x16xf32, #tpu.memory_space<vmem>>, vector<16x8xf32>
    tpu.vector_store %arg23[%c0_281, %c0_282], %437 {strides = array<i32>} : memref<16x16xf32, #tpu.memory_space<vmem>>, vector<16x8xf32>,
    %cst_283 = arith.constant dense<0.000000e+00> : vector<16x8xf32>
    %439 = tpu.matmul %378, %437, %cst_283 {dimension_numbers = #tpu.dot_dimension_numbers<[1], [0], [0], [1], [0, 0, 1, 1], [], []>} : vector<16x16xf32>, vector<16x8xf32>, vector<16x8xf32> -> vector<16x8xf32>
    %c0_284 = arith.constant 0 : index
    %c8_285 = arith.constant 8 : index
    %440 = vector.load %arg23[%c0_284, %c8_285] : memref<16x16xf32, #tpu.memory_space<vmem>>, vector<16x8xf32>
    tpu.vector_store %arg23[%c0_284, %c8_285], %439 {strides = array<i32>} : memref<16x16xf32, #tpu.memory_space<vmem>>, vector<16x8xf32>,
    %c0_286 = arith.constant 0 : index
    %c0_287 = arith.constant 0 : index
    %441 = vector.load %arg24[%c0_286, %c0_287] : memref<16x64xf32, #tpu.memory_space<vmem>>, vector<16x32xf32>
    tpu.vector_store %arg24[%c0_286, %c0_287], %290 {strides = array<i32>} : memref<16x64xf32, #tpu.memory_space<vmem>>, vector<16x32xf32>,
    %cst_288 = arith.constant dense<0.000000e+00> : vector<16x32xf32>
    %442 = tpu.matmul %378, %290, %cst_288 {dimension_numbers = #tpu.dot_dimension_numbers<[1], [0], [0], [1], [0, 0, 1, 1], [], []>} : vector<16x16xf32>, vector<16x32xf32>, vector<16x32xf32> -> vector<16x32xf32>
    %c0_289 = arith.constant 0 : index
    %c32_290 = arith.constant 32 : index
    %443 = vector.load %arg24[%c0_289, %c32_290] : memref<16x64xf32, #tpu.memory_space<vmem>>, vector<16x32xf32>
    tpu.vector_store %arg24[%c0_289, %c32_290], %442 {strides = array<i32>} : memref<16x64xf32, #tpu.memory_space<vmem>>, vector<16x32xf32>,
    %c0_291 = arith.constant 0 : index
    %c0_292 = arith.constant 0 : index
    %444 = vector.load %arg23[%c0_291, %c0_292] : memref<16x16xf32, #tpu.memory_space<vmem>>, vector<16x16xf32>
    %c0_293 = arith.constant 0 : index
    %c0_294 = arith.constant 0 : index
    %445 = vector.load %arg12[%c0_293, %c0_294] : memref<16x96xf32, #tpu.memory_space<vmem>>, vector<16x96xf32>
    %cst_295 = arith.constant dense<0.000000e+00> : vector<16x96xf32>
    %446 = tpu.matmul %444, %445, %cst_295 {dimension_numbers = #tpu.dot_dimension_numbers<[1], [0], [0], [1], [0, 0, 1, 1], [], []>} : vector<16x16xf32>, vector<16x96xf32>, vector<16x96xf32> -> vector<16x96xf32>
    %c0_296 = arith.constant 0 : index
    %c0_297 = arith.constant 0 : index
    %447 = vector.load %arg15[%c0_296, %c0_297] : memref<1x96xf32, #tpu.memory_space<vmem>>, vector<1x96xf32>
    %448 = vector.broadcast %447 : vector<1x96xf32> to vector<16x96xf32>
    %449 = arith.addf %446, %448 : vector<16x96xf32>
    %c0_298 = arith.constant 0 : index
    %c0_299 = arith.constant 0 : index
    %450 = vector.load %arg24[%c0_298, %c0_299] : memref<16x64xf32, #tpu.memory_space<vmem>>, vector<16x64xf32>
    %c0_300 = arith.constant 0 : index
    %c0_301 = arith.constant 0 : index
    %451 = vector.load %arg13[%c0_300, %c0_301] : memref<64x64xf32, #tpu.memory_space<vmem>>, vector<64x64xf32>
    %cst_302 = arith.constant dense<0.000000e+00> : vector<16x64xf32>
    %452 = tpu.matmul %450, %451, %cst_302 {dimension_numbers = #tpu.dot_dimension_numbers<[1], [0], [0], [1], [0, 0, 1, 1], [], []>} : vector<16x64xf32>, vector<64x64xf32>, vector<16x64xf32> -> vector<16x64xf32>
    %c0_303 = arith.constant 0 : index
    %c0_304 = arith.constant 0 : index
    %453 = vector.load %arg16[%c0_303, %c0_304] : memref<1x64xf32, #tpu.memory_space<vmem>>, vector<1x64xf32>
    %454 = vector.broadcast %453 : vector<1x64xf32> to vector<16x64xf32>
    %455 = arith.addf %452, %454 : vector<16x64xf32>
    %456 = vector.extract_strided_slice %449 {offsets = [0, 0], sizes = [16, 32], strides = [1, 1]} : vector<16x96xf32> to vector<16x32xf32>
    %457 = vector.extract_strided_slice %455 {offsets = [0, 0], sizes = [16, 32], strides = [1, 1]} : vector<16x64xf32> to vector<16x32xf32>
    %458 = arith.addf %456, %457 : vector<16x32xf32>
    %459 = arith.negf %458 : vector<16x32xf32>
    %460 = math.exp %459 : vector<16x32xf32>
    %cst_305 = arith.constant 1.000000e+00 : f32
    %461 = vector.broadcast %cst_305 : f32 to vector<16x32xf32>
    %462 = arith.addf %461, %460 : vector<16x32xf32>
    %463 = arith.divf %461, %462 : vector<16x32xf32>
    %464 = vector.extract_strided_slice %449 {offsets = [0, 32], sizes = [16, 32], strides = [1, 1]} : vector<16x96xf32> to vector<16x32xf32>
    %465 = vector.extract_strided_slice %455 {offsets = [0, 32], sizes = [16, 32], strides = [1, 1]} : vector<16x64xf32> to vector<16x32xf32>
    %466 = arith.addf %464, %465 : vector<16x32xf32>
    %467 = arith.negf %466 : vector<16x32xf32>
    %468 = math.exp %467 : vector<16x32xf32>
    %cst_306 = arith.constant 1.000000e+00 : f32
    %469 = vector.broadcast %cst_306 : f32 to vector<16x32xf32>
    %470 = arith.addf %469, %468 : vector<16x32xf32>
    %471 = arith.divf %469, %470 : vector<16x32xf32>
    %472 = arith.mulf %290, %471 : vector<16x32xf32>
    %c0_307 = arith.constant 0 : index
    %c0_308 = arith.constant 0 : index
    %473 = vector.load %arg24[%c0_307, %c0_308] : memref<16x64xf32, #tpu.memory_space<vmem>>, vector<16x32xf32>
    tpu.vector_store %arg24[%c0_307, %c0_308], %472 {strides = array<i32>} : memref<16x64xf32, #tpu.memory_space<vmem>>, vector<16x32xf32>,
    %cst_309 = arith.constant dense<0.000000e+00> : vector<16x32xf32>
    %474 = tpu.matmul %378, %472, %cst_309 {dimension_numbers = #tpu.dot_dimension_numbers<[1], [0], [0], [1], [0, 0, 1, 1], [], []>} : vector<16x16xf32>, vector<16x32xf32>, vector<16x32xf32> -> vector<16x32xf32>
    %c0_310 = arith.constant 0 : index
    %c32_311 = arith.constant 32 : index
    %475 = vector.load %arg24[%c0_310, %c32_311] : memref<16x64xf32, #tpu.memory_space<vmem>>, vector<16x32xf32>
    tpu.vector_store %arg24[%c0_310, %c32_311], %474 {strides = array<i32>} : memref<16x64xf32, #tpu.memory_space<vmem>>, vector<16x32xf32>,
    %c0_312 = arith.constant 0 : index
    %c0_313 = arith.constant 0 : index
    %476 = vector.load %arg24[%c0_312, %c0_313] : memref<16x64xf32, #tpu.memory_space<vmem>>, vector<16x64xf32>
    %c0_314 = arith.constant 0 : index
    %c0_315 = arith.constant 0 : index
    %477 = vector.load %arg14[%c0_314, %c0_315] : memref<64x32xf32, #tpu.memory_space<vmem>>, vector<64x32xf32>
    %cst_316 = arith.constant dense<0.000000e+00> : vector<16x32xf32>
    %478 = tpu.matmul %476, %477, %cst_316 {dimension_numbers = #tpu.dot_dimension_numbers<[1], [0], [0], [1], [0, 0, 1, 1], [], []>} : vector<16x64xf32>, vector<64x32xf32>, vector<16x32xf32> -> vector<16x32xf32>
    %c0_317 = arith.constant 0 : index
    %c0_318 = arith.constant 0 : index
    %479 = vector.load %arg17[%c0_317, %c0_318] : memref<1x32xf32, #tpu.memory_space<vmem>>, vector<1x32xf32>
    %480 = vector.broadcast %479 : vector<1x32xf32> to vector<16x32xf32>
    %481 = arith.addf %478, %480 : vector<16x32xf32>
    %482 = vector.extract_strided_slice %449 {offsets = [0, 64], sizes = [16, 32], strides = [1, 1]} : vector<16x96xf32> to vector<16x32xf32>
    %483 = arith.addf %482, %481 : vector<16x32xf32>
    %484 = math.tanh %483 : vector<16x32xf32>
    %485 = arith.mulf %463, %290 : vector<16x32xf32>
    %cst_319 = arith.constant 1.000000e+00 : f32
    %486 = vector.broadcast %cst_319 : f32 to vector<16x32xf32>
    %487 = arith.subf %486, %463 : vector<16x32xf32>
    %488 = arith.mulf %487, %484 : vector<16x32xf32>
    %489 = arith.addf %485, %488 : vector<16x32xf32>
    %cst_320 = arith.constant 0.000000e+00 : f32
    %490 = vector.broadcast %cst_320 : f32 to vector<16x32xf32>
    %491 = arith.maximumf %489, %490 : vector<16x32xf32>
    %c0_321 = arith.constant 0 : index
    %c0_322 = arith.constant 0 : index
    %492 = vector.load %arg18[%c0_321, %c0_322] : memref<32x8xf32, #tpu.memory_space<vmem>>, vector<32x8xf32>
    %cst_323 = arith.constant dense<0.000000e+00> : vector<16x8xf32>
    %493 = tpu.matmul %491, %492, %cst_323 {dimension_numbers = #tpu.dot_dimension_numbers<[1], [0], [0], [1], [0, 0, 1, 1], [], []>} : vector<16x32xf32>, vector<32x8xf32>, vector<16x8xf32> -> vector<16x8xf32>
    %c0_324 = arith.constant 0 : index
    %c0_325 = arith.constant 0 : index
    %494 = vector.load %arg19[%c0_324, %c0_325] : memref<1x8xf32, #tpu.memory_space<vmem>>, vector<1x8xf32>
    %495 = vector.broadcast %494 : vector<1x8xf32> to vector<16x8xf32>
    %496 = arith.addf %493, %495 : vector<16x8xf32>
    %c1_i32_326 = arith.constant 1 : i32
    %497 = arith.addi %c1_i32_326, %c0_i32_212 : i32
    %498 = arith.index_cast %497 : i32 to index
    %c0_327 = arith.constant 0 : index
    %c0_328 = arith.constant 0 : index
    %499 = vector.load %arg20[%498, %c0_327, %c0_328] : memref<3x16x8xf32, #tpu.memory_space<vmem>>, vector<1x16x8xf32>
    %500 = vector.shape_cast %499 : vector<1x16x8xf32> to vector<16x8xf32>
    %501 = vector.shape_cast %496 : vector<16x8xf32> to vector<1x16x8xf32>
    tpu.vector_store %arg20[%498, %c0_327, %c0_328], %501 {strides = array<i32>} : memref<3x16x8xf32, #tpu.memory_space<vmem>>, vector<1x16x8xf32>,
    %c1_i32_329 = arith.constant 1 : i32
    %cst_330 = arith.constant dense<0.000000e+00> : vector<2x16xf32>
    %502 = tpu.matmul %312, %496, %cst_330 {dimension_numbers = #tpu.dot_dimension_numbers<[1], [1], [0], [0], [0, 0, 1, 0], [], []>} : vector<2x8xf32>, vector<16x8xf32>, vector<2x16xf32> -> vector<2x16xf32>
    %503 = vector.extract_strided_slice %502 {offsets = [0, 0], sizes = [1, 16], strides = [1, 1]} : vector<2x16xf32> to vector<1x16xf32>
    %cst_331 = arith.constant 1.000000e+02 : f32
    %504 = vector.broadcast %cst_331 : f32 to vector<1x16xf32>
    %505 = arith.mulf %503, %504 : vector<1x16xf32>
    %cst_332 = arith.constant 0.000000e+00 : f32
    %506 = vector.broadcast %cst_332 : f32 to vector<1x16xf32>
    %507 = arith.addf %505, %506 : vector<1x16xf32>
    %508 = vector.extract_strided_slice %502 {offsets = [1, 0], sizes = [1, 16], strides = [1, 1]} : vector<2x16xf32> to vector<1x16xf32>
    %cst_333 = arith.constant 1.000000e+02 : f32
    %509 = vector.broadcast %cst_333 : f32 to vector<1x16xf32>
    %510 = arith.mulf %508, %509 : vector<1x16xf32>
    %cst_334 = arith.constant 0.000000e+00 : f32
    %511 = vector.broadcast %cst_334 : f32 to vector<1x16xf32>
    %512 = arith.addf %510, %511 : vector<1x16xf32>
    %513 = vector.extract_strided_slice %496 {offsets = [0, 0], sizes = [16, 1], strides = [1, 1]} : vector<16x8xf32> to vector<16x1xf32>
    %cst_335 = arith.constant 1.000000e+02 : f32
    %514 = vector.broadcast %cst_335 : f32 to vector<16x1xf32>
    %515 = arith.mulf %513, %514 : vector<16x1xf32>
    %cst_336 = arith.constant 0.000000e+00 : f32
    %516 = vector.broadcast %cst_336 : f32 to vector<16x1xf32>
    %517 = arith.addf %515, %516 : vector<16x1xf32>
    %518 = vector.extract_strided_slice %496 {offsets = [0, 1], sizes = [16, 1], strides = [1, 1]} : vector<16x8xf32> to vector<16x1xf32>
    %cst_337 = arith.constant 1.000000e+02 : f32
    %519 = vector.broadcast %cst_337 : f32 to vector<16x1xf32>
    %520 = arith.mulf %518, %519 : vector<16x1xf32>
    %cst_338 = arith.constant 0.000000e+00 : f32
    %521 = vector.broadcast %cst_338 : f32 to vector<16x1xf32>
    %522 = arith.addf %520, %521 : vector<16x1xf32>
    %523 = vector.broadcast %517 : vector<16x1xf32> to vector<16x16xf32>
    %524 = vector.broadcast %507 : vector<1x16xf32> to vector<16x16xf32>
    %525 = arith.subf %523, %524 : vector<16x16xf32>
    %526 = vector.broadcast %522 : vector<16x1xf32> to vector<16x16xf32>
    %527 = vector.broadcast %512 : vector<1x16xf32> to vector<16x16xf32>
    %528 = arith.subf %526, %527 : vector<16x16xf32>
    %529 = arith.mulf %525, %525 : vector<16x16xf32>
    %530 = arith.mulf %528, %528 : vector<16x16xf32>
    %531 = arith.addf %529, %530 : vector<16x16xf32>
    %532 = math.sqrt %531 : vector<16x16xf32>
    %cst_339 = arith.constant 4.000000e+01 : f32
    %533 = vector.broadcast %cst_339 : f32 to vector<16x16xf32>
    %534 = arith.cmpf olt, %532, %533 : vector<16x16xf32>
    %535 = arith.andi %307, %534 : vector<16x16xi1>
    %cst_340 = arith.constant 0.000000e+00 : f32
    %536 = vector.broadcast %cst_340 : f32 to vector<16x16xf32>
    %537 = arith.cmpf ogt, %532, %536 : vector<16x16xf32>
    %538 = arith.andi %535, %537 : vector<16x16xi1>
    %cst_341 = arith.constant 0.000000e+00 : f32
    %539 = vector.broadcast %cst_341 : f32 to vector<16x16xf32>
    %540 = arith.subf %532, %539 : vector<16x16xf32>
    %cst_342 = arith.constant 2.000000e-02 : f32
    %541 = vector.broadcast %cst_342 : f32 to vector<16x16xf32>
    %542 = arith.mulf %540, %541 : vector<16x16xf32>
    %cst_343 = arith.constant 0.000000e+00 : f32
    %543 = vector.broadcast %cst_343 : f32 to vector<16x16xf32>
    %544 = arith.select %538, %542, %543 : vector<16x16xi1>, vector<16x16xf32>
    %cst_344 = arith.constant dense<0.000000e+00> : vector<16xf32>
    %545 = vector.multi_reduction <add>, %544, %cst_344 [1] : vector<16x16xf32> to vector<16xf32>
    %546 = vector.shape_cast %545 : vector<16xf32> to vector<16x1xf32>
    %cst_345 = arith.constant dense<0.000000e+00> : vector<1x16xf32>
    %547 = tpu.matmul %0, %544, %cst_345 {dimension_numbers = #tpu.dot_dimension_numbers<[1], [1], [0], [0], [0, 0, 1, 0], [], []>} : vector<1x16xf32>, vector<16x16xf32>, vector<1x16xf32> -> vector<1x16xf32>
    %cst_346 = arith.constant 0.000000e+00 : f32
    %548 = vector.broadcast %cst_346 : f32 to vector<16x1xf32>
    %549 = arith.cmpf ogt, %546, %548 : vector<16x1xf32>
    %cst_347 = arith.constant 9.99999996E-13 : f32
    %550 = vector.broadcast %cst_347 : f32 to vector<16x1xf32>
    %551 = arith.maximumf %546, %550 : vector<16x1xf32>
    %552 = math.rsqrt %551 : vector<16x1xf32>
    %cst_348 = arith.constant 0.000000e+00 : f32
    %553 = vector.broadcast %cst_348 : f32 to vector<16x1xf32>
    %554 = arith.select %549, %552, %553 : vector<16x1xi1>, vector<16x1xf32>
    %cst_349 = arith.constant 0.000000e+00 : f32
    %555 = vector.broadcast %cst_349 : f32 to vector<1x16xf32>
    %556 = arith.cmpf ogt, %547, %555 : vector<1x16xf32>
    %cst_350 = arith.constant 9.99999996E-13 : f32
    %557 = vector.broadcast %cst_350 : f32 to vector<1x16xf32>
    %558 = arith.maximumf %547, %557 : vector<1x16xf32>
    %559 = math.rsqrt %558 : vector<1x16xf32>
    %cst_351 = arith.constant 0.000000e+00 : f32
    %560 = vector.broadcast %cst_351 : f32 to vector<1x16xf32>
    %561 = arith.select %556, %559, %560 : vector<1x16xi1>, vector<1x16xf32>
    %562 = vector.broadcast %554 : vector<16x1xf32> to vector<16x16xf32>
    %563 = arith.mulf %562, %544 : vector<16x16xf32>
    %564 = vector.broadcast %561 : vector<1x16xf32> to vector<16x16xf32>
    %565 = arith.mulf %563, %564 : vector<16x16xf32>
    %cst_352 = arith.constant 0.000000e+00 : f32
    %566 = vector.broadcast %cst_352 : f32 to vector<16x16xf32>
    %567 = arith.subf %566, %565 : vector<16x16xf32>
    %c0_353 = arith.constant 0 : index
    %c0_354 = arith.constant 0 : index
    %568 = vector.load %arg21[%c0_353, %c0_354] : memref<16x16xf32, #tpu.memory_space<vmem>>, vector<16x8xf32>
    tpu.vector_store %arg21[%c0_353, %c0_354], %496 {strides = array<i32>} : memref<16x16xf32, #tpu.memory_space<vmem>>, vector<16x8xf32>,
    %cst_355 = arith.constant dense<0.000000e+00> : vector<16x8xf32>
    %569 = tpu.matmul %567, %496, %cst_355 {dimension_numbers = #tpu.dot_dimension_numbers<[1], [0], [0], [1], [0, 0, 1, 1], [], []>} : vector<16x16xf32>, vector<16x8xf32>, vector<16x8xf32> -> vector<16x8xf32>
    %c0_356 = arith.constant 0 : index
    %c8_357 = arith.constant 8 : index
    %570 = vector.load %arg21[%c0_356, %c8_357] : memref<16x16xf32, #tpu.memory_space<vmem>>, vector<16x8xf32>
    tpu.vector_store %arg21[%c0_356, %c8_357], %569 {strides = array<i32>} : memref<16x16xf32, #tpu.memory_space<vmem>>, vector<16x8xf32>,
    %c0_358 = arith.constant 0 : index
    %c0_359 = arith.constant 0 : index
    %571 = vector.load %arg22[%c0_358, %c0_359] : memref<16x64xf32, #tpu.memory_space<vmem>>, vector<16x32xf32>
    tpu.vector_store %arg22[%c0_358, %c0_359], %231 {strides = array<i32>} : memref<16x64xf32, #tpu.memory_space<vmem>>, vector<16x32xf32>,
    %cst_360 = arith.constant dense<0.000000e+00> : vector<16x32xf32>
    %572 = tpu.matmul %567, %231, %cst_360 {dimension_numbers = #tpu.dot_dimension_numbers<[1], [0], [0], [1], [0, 0, 1, 1], [], []>} : vector<16x16xf32>, vector<16x32xf32>, vector<16x32xf32> -> vector<16x32xf32>
    %c0_361 = arith.constant 0 : index
    %c32_362 = arith.constant 32 : index
    %573 = vector.load %arg22[%c0_361, %c32_362] : memref<16x64xf32, #tpu.memory_space<vmem>>, vector<16x32xf32>
    tpu.vector_store %arg22[%c0_361, %c32_362], %572 {strides = array<i32>} : memref<16x64xf32, #tpu.memory_space<vmem>>, vector<16x32xf32>,
    %c0_363 = arith.constant 0 : index
    %c0_364 = arith.constant 0 : index
    %574 = vector.load %arg21[%c0_363, %c0_364] : memref<16x16xf32, #tpu.memory_space<vmem>>, vector<16x16xf32>
    %c0_365 = arith.constant 0 : index
    %c0_366 = arith.constant 0 : index
    %575 = vector.load %arg4[%c0_365, %c0_366] : memref<16x96xf32, #tpu.memory_space<vmem>>, vector<16x96xf32>
    %cst_367 = arith.constant dense<0.000000e+00> : vector<16x96xf32>
    %576 = tpu.matmul %574, %575, %cst_367 {dimension_numbers = #tpu.dot_dimension_numbers<[1], [0], [0], [1], [0, 0, 1, 1], [], []>} : vector<16x16xf32>, vector<16x96xf32>, vector<16x96xf32> -> vector<16x96xf32>
    %c0_368 = arith.constant 0 : index
    %c0_369 = arith.constant 0 : index
    %577 = vector.load %arg7[%c0_368, %c0_369] : memref<1x96xf32, #tpu.memory_space<vmem>>, vector<1x96xf32>
    %578 = vector.broadcast %577 : vector<1x96xf32> to vector<16x96xf32>
    %579 = arith.addf %576, %578 : vector<16x96xf32>
    %c0_370 = arith.constant 0 : index
    %c0_371 = arith.constant 0 : index
    %580 = vector.load %arg22[%c0_370, %c0_371] : memref<16x64xf32, #tpu.memory_space<vmem>>, vector<16x64xf32>
    %c0_372 = arith.constant 0 : index
    %c0_373 = arith.constant 0 : index
    %581 = vector.load %arg5[%c0_372, %c0_373] : memref<64x64xf32, #tpu.memory_space<vmem>>, vector<64x64xf32>
    %cst_374 = arith.constant dense<0.000000e+00> : vector<16x64xf32>
    %582 = tpu.matmul %580, %581, %cst_374 {dimension_numbers = #tpu.dot_dimension_numbers<[1], [0], [0], [1], [0, 0, 1, 1], [], []>} : vector<16x64xf32>, vector<64x64xf32>, vector<16x64xf32> -> vector<16x64xf32>
    %c0_375 = arith.constant 0 : index
    %c0_376 = arith.constant 0 : index
    %583 = vector.load %arg8[%c0_375, %c0_376] : memref<1x64xf32, #tpu.memory_space<vmem>>, vector<1x64xf32>
    %584 = vector.broadcast %583 : vector<1x64xf32> to vector<16x64xf32>
    %585 = arith.addf %582, %584 : vector<16x64xf32>
    %586 = vector.extract_strided_slice %579 {offsets = [0, 0], sizes = [16, 32], strides = [1, 1]} : vector<16x96xf32> to vector<16x32xf32>
    %587 = vector.extract_strided_slice %585 {offsets = [0, 0], sizes = [16, 32], strides = [1, 1]} : vector<16x64xf32> to vector<16x32xf32>
    %588 = arith.addf %586, %587 : vector<16x32xf32>
    %589 = arith.negf %588 : vector<16x32xf32>
    %590 = math.exp %589 : vector<16x32xf32>
    %cst_377 = arith.constant 1.000000e+00 : f32
    %591 = vector.broadcast %cst_377 : f32 to vector<16x32xf32>
    %592 = arith.addf %591, %590 : vector<16x32xf32>
    %593 = arith.divf %591, %592 : vector<16x32xf32>
    %594 = vector.extract_strided_slice %579 {offsets = [0, 32], sizes = [16, 32], strides = [1, 1]} : vector<16x96xf32> to vector<16x32xf32>
    %595 = vector.extract_strided_slice %585 {offsets = [0, 32], sizes = [16, 32], strides = [1, 1]} : vector<16x64xf32> to vector<16x32xf32>
    %596 = arith.addf %594, %595 : vector<16x32xf32>
    %597 = arith.negf %596 : vector<16x32xf32>
    %598 = math.exp %597 : vector<16x32xf32>
    %cst_378 = arith.constant 1.000000e+00 : f32
    %599 = vector.broadcast %cst_378 : f32 to vector<16x32xf32>
    %600 = arith.addf %599, %598 : vector<16x32xf32>
    %601 = arith.divf %599, %600 : vector<16x32xf32>
    %602 = arith.mulf %231, %601 : vector<16x32xf32>
    %c0_379 = arith.constant 0 : index
    %c0_380 = arith.constant 0 : index
    %603 = vector.load %arg22[%c0_379, %c0_380] : memref<16x64xf32, #tpu.memory_space<vmem>>, vector<16x32xf32>
    tpu.vector_store %arg22[%c0_379, %c0_380], %602 {strides = array<i32>} : memref<16x64xf32, #tpu.memory_space<vmem>>, vector<16x32xf32>,
    %cst_381 = arith.constant dense<0.000000e+00> : vector<16x32xf32>
    %604 = tpu.matmul %567, %602, %cst_381 {dimension_numbers = #tpu.dot_dimension_numbers<[1], [0], [0], [1], [0, 0, 1, 1], [], []>} : vector<16x16xf32>, vector<16x32xf32>, vector<16x32xf32> -> vector<16x32xf32>
    %c0_382 = arith.constant 0 : index
    %c32_383 = arith.constant 32 : index
    %605 = vector.load %arg22[%c0_382, %c32_383] : memref<16x64xf32, #tpu.memory_space<vmem>>, vector<16x32xf32>
    tpu.vector_store %arg22[%c0_382, %c32_383], %604 {strides = array<i32>} : memref<16x64xf32, #tpu.memory_space<vmem>>, vector<16x32xf32>,
    %c0_384 = arith.constant 0 : index
    %c0_385 = arith.constant 0 : index
    %606 = vector.load %arg22[%c0_384, %c0_385] : memref<16x64xf32, #tpu.memory_space<vmem>>, vector<16x64xf32>
    %c0_386 = arith.constant 0 : index
    %c0_387 = arith.constant 0 : index
    %607 = vector.load %arg6[%c0_386, %c0_387] : memref<64x32xf32, #tpu.memory_space<vmem>>, vector<64x32xf32>
    %cst_388 = arith.constant dense<0.000000e+00> : vector<16x32xf32>
    %608 = tpu.matmul %606, %607, %cst_388 {dimension_numbers = #tpu.dot_dimension_numbers<[1], [0], [0], [1], [0, 0, 1, 1], [], []>} : vector<16x64xf32>, vector<64x32xf32>, vector<16x32xf32> -> vector<16x32xf32>
    %c0_389 = arith.constant 0 : index
    %c0_390 = arith.constant 0 : index
    %609 = vector.load %arg9[%c0_389, %c0_390] : memref<1x32xf32, #tpu.memory_space<vmem>>, vector<1x32xf32>
    %610 = vector.broadcast %609 : vector<1x32xf32> to vector<16x32xf32>
    %611 = arith.addf %608, %610 : vector<16x32xf32>
    %612 = vector.extract_strided_slice %579 {offsets = [0, 64], sizes = [16, 32], strides = [1, 1]} : vector<16x96xf32> to vector<16x32xf32>
    %613 = arith.addf %612, %611 : vector<16x32xf32>
    %614 = math.tanh %613 : vector<16x32xf32>
    %615 = arith.mulf %593, %231 : vector<16x32xf32>
    %cst_391 = arith.constant 1.000000e+00 : f32
    %616 = vector.broadcast %cst_391 : f32 to vector<16x32xf32>
    %617 = arith.subf %616, %593 : vector<16x32xf32>
    %618 = arith.mulf %617, %614 : vector<16x32xf32>
    %619 = arith.addf %615, %618 : vector<16x32xf32>
    %cst_392 = arith.constant 0.000000e+00 : f32
    %620 = vector.broadcast %cst_392 : f32 to vector<16x32xf32>
    %621 = arith.maximumf %619, %620 : vector<16x32xf32>
    %c0_393 = arith.constant 0 : index
    %c0_394 = arith.constant 0 : index
    %622 = vector.load %arg10[%c0_393, %c0_394] : memref<32x8xf32, #tpu.memory_space<vmem>>, vector<32x8xf32>
    %cst_395 = arith.constant dense<0.000000e+00> : vector<16x8xf32>
    %623 = tpu.matmul %621, %622, %cst_395 {dimension_numbers = #tpu.dot_dimension_numbers<[1], [0], [0], [1], [0, 0, 1, 1], [], []>} : vector<16x32xf32>, vector<32x8xf32>, vector<16x8xf32> -> vector<16x8xf32>
    %c0_396 = arith.constant 0 : index
    %c0_397 = arith.constant 0 : index
    %624 = vector.load %arg11[%c0_396, %c0_397] : memref<1x8xf32, #tpu.memory_space<vmem>>, vector<1x8xf32>
    %625 = vector.broadcast %624 : vector<1x8xf32> to vector<16x8xf32>
    %626 = arith.addf %623, %625 : vector<16x8xf32>
    %c0_398 = arith.constant 0 : index
    %c0_399 = arith.constant 0 : index
    %627 = vector.load %arg23[%c0_398, %c0_399] : memref<16x16xf32, #tpu.memory_space<vmem>>, vector<16x8xf32>
    tpu.vector_store %arg23[%c0_398, %c0_399], %626 {strides = array<i32>} : memref<16x16xf32, #tpu.memory_space<vmem>>, vector<16x8xf32>,
    %cst_400 = arith.constant dense<0.000000e+00> : vector<16x8xf32>
    %628 = tpu.matmul %567, %626, %cst_400 {dimension_numbers = #tpu.dot_dimension_numbers<[1], [0], [0], [1], [0, 0, 1, 1], [], []>} : vector<16x16xf32>, vector<16x8xf32>, vector<16x8xf32> -> vector<16x8xf32>
    %c0_401 = arith.constant 0 : index
    %c8_402 = arith.constant 8 : index
    %629 = vector.load %arg23[%c0_401, %c8_402] : memref<16x16xf32, #tpu.memory_space<vmem>>, vector<16x8xf32>
    tpu.vector_store %arg23[%c0_401, %c8_402], %628 {strides = array<i32>} : memref<16x16xf32, #tpu.memory_space<vmem>>, vector<16x8xf32>,
    %c0_403 = arith.constant 0 : index
    %c0_404 = arith.constant 0 : index
    %630 = vector.load %arg24[%c0_403, %c0_404] : memref<16x64xf32, #tpu.memory_space<vmem>>, vector<16x32xf32>
    tpu.vector_store %arg24[%c0_403, %c0_404], %290 {strides = array<i32>} : memref<16x64xf32, #tpu.memory_space<vmem>>, vector<16x32xf32>,
    %cst_405 = arith.constant dense<0.000000e+00> : vector<16x32xf32>
    %631 = tpu.matmul %567, %290, %cst_405 {dimension_numbers = #tpu.dot_dimension_numbers<[1], [0], [0], [1], [0, 0, 1, 1], [], []>} : vector<16x16xf32>, vector<16x32xf32>, vector<16x32xf32> -> vector<16x32xf32>
    %c0_406 = arith.constant 0 : index
    %c32_407 = arith.constant 32 : index
    %632 = vector.load %arg24[%c0_406, %c32_407] : memref<16x64xf32, #tpu.memory_space<vmem>>, vector<16x32xf32>
    tpu.vector_store %arg24[%c0_406, %c32_407], %631 {strides = array<i32>} : memref<16x64xf32, #tpu.memory_space<vmem>>, vector<16x32xf32>,
    %c0_408 = arith.constant 0 : index
    %c0_409 = arith.constant 0 : index
    %633 = vector.load %arg23[%c0_408, %c0_409] : memref<16x16xf32, #tpu.memory_space<vmem>>, vector<16x16xf32>
    %c0_410 = arith.constant 0 : index
    %c0_411 = arith.constant 0 : index
    %634 = vector.load %arg12[%c0_410, %c0_411] : memref<16x96xf32, #tpu.memory_space<vmem>>, vector<16x96xf32>
    %cst_412 = arith.constant dense<0.000000e+00> : vector<16x96xf32>
    %635 = tpu.matmul %633, %634, %cst_412 {dimension_numbers = #tpu.dot_dimension_numbers<[1], [0], [0], [1], [0, 0, 1, 1], [], []>} : vector<16x16xf32>, vector<16x96xf32>, vector<16x96xf32> -> vector<16x96xf32>
    %c0_413 = arith.constant 0 : index
    %c0_414 = arith.constant 0 : index
    %636 = vector.load %arg15[%c0_413, %c0_414] : memref<1x96xf32, #tpu.memory_space<vmem>>, vector<1x96xf32>
    %637 = vector.broadcast %636 : vector<1x96xf32> to vector<16x96xf32>
    %638 = arith.addf %635, %637 : vector<16x96xf32>
    %c0_415 = arith.constant 0 : index
    %c0_416 = arith.constant 0 : index
    %639 = vector.load %arg24[%c0_415, %c0_416] : memref<16x64xf32, #tpu.memory_space<vmem>>, vector<16x64xf32>
    %c0_417 = arith.constant 0 : index
    %c0_418 = arith.constant 0 : index
    %640 = vector.load %arg13[%c0_417, %c0_418] : memref<64x64xf32, #tpu.memory_space<vmem>>, vector<64x64xf32>
    %cst_419 = arith.constant dense<0.000000e+00> : vector<16x64xf32>
    %641 = tpu.matmul %639, %640, %cst_419 {dimension_numbers = #tpu.dot_dimension_numbers<[1], [0], [0], [1], [0, 0, 1, 1], [], []>} : vector<16x64xf32>, vector<64x64xf32>, vector<16x64xf32> -> vector<16x64xf32>
    %c0_420 = arith.constant 0 : index
    %c0_421 = arith.constant 0 : index
    %642 = vector.load %arg16[%c0_420, %c0_421] : memref<1x64xf32, #tpu.memory_space<vmem>>, vector<1x64xf32>
    %643 = vector.broadcast %642 : vector<1x64xf32> to vector<16x64xf32>
    %644 = arith.addf %641, %643 : vector<16x64xf32>
    %645 = vector.extract_strided_slice %638 {offsets = [0, 0], sizes = [16, 32], strides = [1, 1]} : vector<16x96xf32> to vector<16x32xf32>
    %646 = vector.extract_strided_slice %644 {offsets = [0, 0], sizes = [16, 32], strides = [1, 1]} : vector<16x64xf32> to vector<16x32xf32>
    %647 = arith.addf %645, %646 : vector<16x32xf32>
    %648 = arith.negf %647 : vector<16x32xf32>
    %649 = math.exp %648 : vector<16x32xf32>
    %cst_422 = arith.constant 1.000000e+00 : f32
    %650 = vector.broadcast %cst_422 : f32 to vector<16x32xf32>
    %651 = arith.addf %650, %649 : vector<16x32xf32>
    %652 = arith.divf %650, %651 : vector<16x32xf32>
    %653 = vector.extract_strided_slice %638 {offsets = [0, 32], sizes = [16, 32], strides = [1, 1]} : vector<16x96xf32> to vector<16x32xf32>
    %654 = vector.extract_strided_slice %644 {offsets = [0, 32], sizes = [16, 32], strides = [1, 1]} : vector<16x64xf32> to vector<16x32xf32>
    %655 = arith.addf %653, %654 : vector<16x32xf32>
    %656 = arith.negf %655 : vector<16x32xf32>
    %657 = math.exp %656 : vector<16x32xf32>
    %cst_423 = arith.constant 1.000000e+00 : f32
    %658 = vector.broadcast %cst_423 : f32 to vector<16x32xf32>
    %659 = arith.addf %658, %657 : vector<16x32xf32>
    %660 = arith.divf %658, %659 : vector<16x32xf32>
    %661 = arith.mulf %290, %660 : vector<16x32xf32>
    %c0_424 = arith.constant 0 : index
    %c0_425 = arith.constant 0 : index
    %662 = vector.load %arg24[%c0_424, %c0_425] : memref<16x64xf32, #tpu.memory_space<vmem>>, vector<16x32xf32>
    tpu.vector_store %arg24[%c0_424, %c0_425], %661 {strides = array<i32>} : memref<16x64xf32, #tpu.memory_space<vmem>>, vector<16x32xf32>,
    %cst_426 = arith.constant dense<0.000000e+00> : vector<16x32xf32>
    %663 = tpu.matmul %567, %661, %cst_426 {dimension_numbers = #tpu.dot_dimension_numbers<[1], [0], [0], [1], [0, 0, 1, 1], [], []>} : vector<16x16xf32>, vector<16x32xf32>, vector<16x32xf32> -> vector<16x32xf32>
    %c0_427 = arith.constant 0 : index
    %c32_428 = arith.constant 32 : index
    %664 = vector.load %arg24[%c0_427, %c32_428] : memref<16x64xf32, #tpu.memory_space<vmem>>, vector<16x32xf32>
    tpu.vector_store %arg24[%c0_427, %c32_428], %663 {strides = array<i32>} : memref<16x64xf32, #tpu.memory_space<vmem>>, vector<16x32xf32>,
    %c0_429 = arith.constant 0 : index
    %c0_430 = arith.constant 0 : index
    %665 = vector.load %arg24[%c0_429, %c0_430] : memref<16x64xf32, #tpu.memory_space<vmem>>, vector<16x64xf32>
    %c0_431 = arith.constant 0 : index
    %c0_432 = arith.constant 0 : index
    %666 = vector.load %arg14[%c0_431, %c0_432] : memref<64x32xf32, #tpu.memory_space<vmem>>, vector<64x32xf32>
    %cst_433 = arith.constant dense<0.000000e+00> : vector<16x32xf32>
    %667 = tpu.matmul %665, %666, %cst_433 {dimension_numbers = #tpu.dot_dimension_numbers<[1], [0], [0], [1], [0, 0, 1, 1], [], []>} : vector<16x64xf32>, vector<64x32xf32>, vector<16x32xf32> -> vector<16x32xf32>
    %c0_434 = arith.constant 0 : index
    %c0_435 = arith.constant 0 : index
    %668 = vector.load %arg17[%c0_434, %c0_435] : memref<1x32xf32, #tpu.memory_space<vmem>>, vector<1x32xf32>
    %669 = vector.broadcast %668 : vector<1x32xf32> to vector<16x32xf32>
    %670 = arith.addf %667, %669 : vector<16x32xf32>
    %671 = vector.extract_strided_slice %638 {offsets = [0, 64], sizes = [16, 32], strides = [1, 1]} : vector<16x96xf32> to vector<16x32xf32>
    %672 = arith.addf %671, %670 : vector<16x32xf32>
    %673 = math.tanh %672 : vector<16x32xf32>
    %674 = arith.mulf %652, %290 : vector<16x32xf32>
    %cst_436 = arith.constant 1.000000e+00 : f32
    %675 = vector.broadcast %cst_436 : f32 to vector<16x32xf32>
    %676 = arith.subf %675, %652 : vector<16x32xf32>
    %677 = arith.mulf %676, %673 : vector<16x32xf32>
    %678 = arith.addf %674, %677 : vector<16x32xf32>
    %cst_437 = arith.constant 0.000000e+00 : f32
    %679 = vector.broadcast %cst_437 : f32 to vector<16x32xf32>
    %680 = arith.maximumf %678, %679 : vector<16x32xf32>
    %c0_438 = arith.constant 0 : index
    %c0_439 = arith.constant 0 : index
    %681 = vector.load %arg18[%c0_438, %c0_439] : memref<32x8xf32, #tpu.memory_space<vmem>>, vector<32x8xf32>
    %cst_440 = arith.constant dense<0.000000e+00> : vector<16x8xf32>
    %682 = tpu.matmul %680, %681, %cst_440 {dimension_numbers = #tpu.dot_dimension_numbers<[1], [0], [0], [1], [0, 0, 1, 1], [], []>} : vector<16x32xf32>, vector<32x8xf32>, vector<16x8xf32> -> vector<16x8xf32>
    %c0_441 = arith.constant 0 : index
    %c0_442 = arith.constant 0 : index
    %683 = vector.load %arg19[%c0_441, %c0_442] : memref<1x8xf32, #tpu.memory_space<vmem>>, vector<1x8xf32>
    %684 = vector.broadcast %683 : vector<1x8xf32> to vector<16x8xf32>
    %685 = arith.addf %682, %684 : vector<16x8xf32>
    %c1_i32_443 = arith.constant 1 : i32
    %686 = arith.addi %c1_i32_443, %c1_i32_329 : i32
    %687 = arith.index_cast %686 : i32 to index
    %c0_444 = arith.constant 0 : index
    %c0_445 = arith.constant 0 : index
    %688 = vector.load %arg20[%687, %c0_444, %c0_445] : memref<3x16x8xf32, #tpu.memory_space<vmem>>, vector<1x16x8xf32>
    %689 = vector.shape_cast %688 : vector<1x16x8xf32> to vector<16x8xf32>
    %690 = vector.shape_cast %685 : vector<16x8xf32> to vector<1x16x8xf32>
    tpu.vector_store %arg20[%687, %c0_444, %c0_445], %690 {strides = array<i32>} : memref<3x16x8xf32, #tpu.memory_space<vmem>>, vector<1x16x8xf32>,
    %c2_i32_446 = arith.constant 2 : i32
    return
  }
}

</mosaic_0001>

<bundles_post_ra>
// kernel: tpu_custom_call.1
= control target key start
LH: loop header
LB: loop body
LE: loop exit
PB: predicated region body
PF: predicated region fallthrough
CT: control target
= control target key end

     0   :  { %vm71_vm0 = vcmask 130048   ;;  %v3709_v4 = vmov 1.0   ;;  %vm5289_vm1 = vcmask 64512   ;;  %vm5291_vm14 = vcmask 261120   ;;  %s3711_s22 = smov 32   ;;  %s3713_s21 = smov 64   ;;  %s5263_s1 = inlined_call_operand.vmem [shape: f32[2,16,16], index: 1, kind: input, shape index: {}]   ;;  %s5264_s0 = inlined_call_operand.vmem [shape: f32[2,16,8], index: 0, kind: input, shape index: {}]   ;;  %s5265_s2 = inlined_call_operand.vmem [shape: f32[16,32], index: 2, kind: input, shape index: {}]   ;;  %s5266_s8 = inlined_call_operand.vmem [shape: f32[1,64], index: 8, kind: input, shape index: {}]   ;;  %s5267_s5 = inlined_call_operand.vmem [shape: f32[64,64], index: 5, kind: input, shape index: {}]   ;;  %s5268_s4 = inlined_call_operand.vmem [shape: f32[16,96], index: 4, kind: input, shape index: {}]   ;;  %s5269_s3 = inlined_call_operand.vmem [shape: f32[16,32], index: 3, kind: input, shape index: {}]   ;;  %s5270_s7 = inlined_call_operand.vmem [shape: f32[1,96], index: 7, kind: input, shape index: {}]   ;;  %s5271_s6 = inlined_call_operand.vmem [shape: f32[64,32], index: 6, kind: input, shape index: {}]   ;;  %s5272_s9 = inlined_call_operand.vmem [shape: f32[1,32], index: 9, kind: input, shape index: {}]   ;;  %s5273_s10 = inlined_call_operand.vmem [shape: f32[32,8], index: 10, kind: input, shape index: {}]   ;;  %s5274_s11 = inlined_call_operand.vmem [shape: f32[1,8], index: 11, kind: input, shape index: {}]   ;;  %s5275_s13 = inlined_call_operand.vmem [shape: f32[64,64], index: 13, kind: input, shape index: {}]   ;;  %s5276_s16 = inlined_call_operand.vmem [shape: f32[1,64], index: 16, kind: input, shape index: {}]   ;;  %s5277_s15 = inlined_call_operand.vmem [shape: f32[1,96], index: 15, kind: input, shape index: {}]   ;;  %s5278_s12 = inlined_call_operand.vmem [shape: f32[16,96], index: 12, kind: input, shape index: {}]   ;;  %s5279_s14 = inlined_call_operand.vmem [shape: f32[64,32], index: 14, kind: input, shape index: {}]   ;;  %s5280_s17 = inlined_call_operand.vmem [shape: f32[1,32], index: 17, kind: input, shape index: {}]   ;;  %s5281_s18 = inlined_call_operand.vmem [shape: f32[32,8], index: 18, kind: input, shape index: {}]   ;;  %s5282_s19 = inlined_call_operand.vmem [shape: f32[1,8], index: 19, kind: input, shape index: {}]   ;;  %s5283_s20 = inlined_call_operand.vmem [shape: f32[3,16,8], index: 20, kind: output, shape index: {}]  }
   0x1   :  { %5292 = sst [smem:[#allocation6_spill]] %s5263_s1  ;;  %v3927_v57 = vld [vmem:[%s5268_s4 + $0x8] sm:$0xff]  ;;  %v3941_v59 = vld [vmem:[%s5268_s4] sm:$0xff]  ;;  %vm232_vm15 = vcmask 523520   ;;  %s3712_s1 = smov 96  }
   0x2   :  { %5293 = sst [smem:[#allocation7_spill]] %s5264_s0  ;;  %s3710_s0 = smov 8   ;;  %263 = vmatpush.msra.mxu3 %v3927_v57  ;;  %v3948_v60 = vld [vmem:[%s5269_s3 + $0x8] sm:$0xff]  ;;  %v3953_v61 = vld [vmem:[%s5269_s3] sm:$0xff] }
   0x3   :  { %5294 = sst [smem:[#allocation8_spill]] %s5265_s2  ;;  %547 = vst.msk [vmem:[#allocation5 + $0x8] sm:$0xff] %vm5291_vm14, %v3948_v60 }
   0x4   :  { %5295 = sst [smem:[#allocation9_spill]] %s5266_s8  ;;  %264 = vmatpush.msra.mxu3 %v3941_v59  ;;  %546 = vst.msk [vmem:[#allocation5] sm:$0xff] %vm5291_vm14, %v3953_v61 }
   0x5   :  { %5296 = sst [smem:[#allocation10_spill]] %s5267_s5 }
   0x6   :  { %s5297_s23 = sld [smem:[#allocation6_spill]] }
   0x7   :  { %s5298_s26 = sld [smem:[#allocation7_spill]] }
   0x8   :  { %s5299_s5 = sld [smem:[#allocation8_spill]] }
   0x9   :  { %s5300_s25 = sld [smem:[#allocation10_spill]] }
   0xc   :  { %v3825_v0 = vld [vmem:[%s5297_s23 + $0x8] sm:$0xff]  ;;  %v3830_v1 = vld [vmem:[%s5297_s23] sm:$0xff] }
   0xd   :  { %3369 = vmatpush.xpose.msk.msra.mxu0 %vm71_vm0, %v3825_v0  ;;  %v72_v2 = vsel %vm71_vm0, %v3830_v1, 0.0  ;;  %v75_v3 = vsel %vm71_vm0, %v3825_v0, 0.0  ;;  %v154_v8 = vld [vmem:[%s5298_s26 + $0x8] sm:$0xff]  ;;  %v153_v12 = vld [vmem:[%s5298_s26] sm:$0xff] }
   0xe   :  { %73 = vadd.xlane.f32.xlu0 %v72_v2  ;;  %v3848_v9 = vld [vmem:[%s5299_s5 + $0x8] sm:$0xff]  ;;  %178 = vmatpush.msra.mxu1 %v154_v8  ;;  %v3857_v13 = vld [vmem:[%s5299_s5] sm:$0xff]  ;;  %157 = vst.msk [vmem:[#allocation2 + $0x8] sm:$0xff] %vm5289_vm1, %v154_v8  ;;  %s5301_s5 = sld [smem:[#allocation9_spill]] }
   0xf   :  { %215 = vmatpush.msra.mxu2 %v3848_v9  ;;  %156 = vst.msk [vmem:[#allocation2] sm:$0xff] %vm5289_vm1, %v153_v12  ;;  %v3887_v50 = vld [vmem:[%s5300_s25 + $0x38] sm:$0xff]  ;;  %v3892_v51 = vld [vmem:[%s5300_s25 + $0x30] sm:$0xff]  ;;  %v3898_v52 = vld [vmem:[%s5300_s25 + $0x28] sm:$0xff] }
  0x10   :  { %179 = vmatpush.msra.mxu1 %v153_v12  ;;  %200 = vst.msk [vmem:[#allocation3 + $0x8] sm:$0xff] %vm5291_vm14, %v3848_v9  ;;  %v3905_v53 = vld [vmem:[%s5300_s25 + $0x20] sm:$0xff]  ;;  %v3911_v54 = vld [vmem:[%s5300_s25 + $0x18] sm:$0xff]  ;;  %v3917_v55 = vld [vmem:[%s5300_s25 + $0x10] sm:$0xff]  ;;  %3522 = vmatpush.msrb.mxu3 %v3887_v50 }
  0x11   :  { %3370 = vmatpush.xpose.msk.msra.mxu0 %vm71_vm0, %v3830_v1  ;;  %216 = vmatpush.msra.mxu2 %v3857_v13  ;;  %199 = vst.msk [vmem:[#allocation3] sm:$0xff] %vm5291_vm14, %v3857_v13  ;;  %v3922_v56 = vld [vmem:[%s5300_s25 + $0x8] sm:$0xff]  ;;  %v3934_v58 = vld [vmem:[%s5300_s25] sm:$0xff] }
  0x12   :  { %301 = vmatpush.msrb.mxu1 %v3887_v50  ;;  %3523 = vmatpush.msrb.mxu3 %v3892_v51  ;;  %v3551_v8 = vld [vmem:[%s5270_s7] ss:$0 sm:$0xff] }
  0x14   :  { %3371 = vmatmul.msk.f32.vlgmr.msra.gmra.mxu0 %vm71_vm0, %v3709_v4  ;;  %302 = vmatpush.msrb.mxu1 %v3892_v51 }
  0x15   :  { %3524 = vmatpush.msrb.mxu3 %v3898_v52 }
  0x16   :  { %76 = vadd.xlane.f32.xlu0 %v75_v3  ;;  %303 = vmatpush.msrb.mxu1 %v3898_v52 }
  0x17   :  { %3525 = vmatpush.msrb.mxu3 %v3905_v53 }
  0x18   :  { %304 = vmatpush.msrb.mxu1 %v3905_v53 }
  0x19   :  { %3526 = vmatpush.msrb.mxu3 %v3911_v54 }
  0x1a   :  { %305 = vmatpush.msrb.mxu1 %v3911_v54 }
  0x1b   :  { %3527 = vmatpush.msrb.mxu3 %v3917_v55 }
  0x1c   :  { %306 = vmatpush.msrb.mxu1 %v3917_v55 }
  0x1d   :  { %3528 = vmatpush.msrb.mxu3 %v3922_v56 }
  0x1e   :  { %307 = vmatpush.msrb.mxu1 %v3922_v56 }
  0x1f   :  { %3529 = vmatpush.msrb.mxu3 %v3934_v58 }
  0x20   :  { %308 = vmatpush.msrb.mxu1 %v3934_v58 }
  0x81   :  { %v74_v5 = vpop.xlane.xlu0 %73 }
  0x82   :  { %v109_v6 = vmax.f32 %v74_v5, 1e-12  ;;  %vm107_vm8 = vcmp.gt.f32.partialorder %v74_v5, 0.0 }
  0x84   :  { %3581 = vrsqrt.f32 %v109_v6  ;;  %vm117_vm2 = vweird.f32 %v109_v6 }
  0x89   :  { %v77_v7 = vpop.xlane.xlu0 %76 }
  0x8a   :  { %v3582_v10 = vpop.eup %3581  ;;  %v110_v11 = vmax.f32 %v77_v7, 1e-12  ;;  %vm108_vm13 = vcmp.gt.f32.partialorder %v77_v7, 0.0  ;;  %v3550_v7 = vld [vmem:[%s5301_s5] ss:$0 sm:$0xff] }
  0x8b   :  { %v112_v14 = vmul.f32 %v3582_v10, %v109_v6  ;;  %vm118_vm3 = vweird.f32 %v3582_v10 }
  0x8c   :  { %3583 = vrsqrt.f32 %v110_v11  ;;  %vm119_vm4 = vmor %vm117_vm2, %vm118_vm3  ;;  %vm127_vm5 = vweird.f32 %v110_v11  ;;  %vm195_vm2 = vcmask 130112   ;;  %vm286_vm3 = vcmask 523264  }
  0x8d   :  { %v113_v15 = vmul.f32 %v3582_v10, %v112_v14 }
  0x8f   :  { %v114_v20 = vmul.f32 0.5, %v113_v15 }
  0x91   :  { %v104_v16 = vpop.f32.mrf.mxu0  ;;  %v115_v22 = vsub.f32 1.5, %v114_v20 }
  0x92   :  { %v3584_v17 = vpop.eup %3583  ;;  %v134_v18 = vmax.f32 %v104_v16, 1e-12  ;;  %vm133_vm12 = vcmp.gt.f32.partialorder %v104_v16, 0.0 }
  0x93   :  { %v122_v19 = vmul.f32 %v3584_v17, %v110_v11  ;;  %v116_v26 = vmul.f32 %v3582_v10, %v115_v22  ;;  %vm128_vm6 = vweird.f32 %v3584_v17 }
  0x94   :  { %3585 = vrsqrt.f32 %v134_v18  ;;  %vm129_vm9 = vmor %vm127_vm5, %vm128_vm6  ;;  %vm141_vm10 = vweird.f32 %v134_v18 }
  0x95   :  { %v123_v21 = vmul.f32 %v3584_v17, %v122_v19  ;;  %v120_v30 = vsel %vm119_vm4, %v3582_v10, %v116_v26 }
  0x96   :  { %v131_v34 = vsel %vm107_vm8, %v120_v30, 0.0 }
  0x97   :  { %v124_v24 = vmul.f32 0.5, %v123_v21  ;;  %v146_v37 = vmul.f32 %v131_v34, %v3830_v1 }
  0x99   :  { %v125_v28 = vsub.f32 1.5, %v124_v24 }
  0x9a   :  { %v3586_v23 = vpop.eup %3585 }
  0x9b   :  { %v136_v25 = vmul.f32 %v3586_v23, %v134_v18  ;;  %vm142_vm7 = vweird.f32 %v3586_v23  ;;  %v126_v32 = vmul.f32 %v3584_v17, %v125_v28 }
  0x9c   :  { %vm143_vm11 = vmor %vm141_vm10, %vm142_vm7 }
  0x9d   :  { %v137_v27 = vmul.f32 %v3586_v23, %v136_v25  ;;  %v130_v38 = vsel %vm129_vm9, %v3584_v17, %v126_v32 }
  0x9e   :  { %v132_v41 = vsel %vm108_vm13, %v130_v38, 0.0 }
  0x9f   :  { %v138_v29 = vmul.f32 0.5, %v137_v27  ;;  %v147_v43 = vmul.f32 %v132_v41, %v3825_v0 }
  0xa1   :  { %v139_v31 = vsub.f32 1.5, %v138_v29 }
  0xa3   :  { %v140_v33 = vmul.f32 %v3586_v23, %v139_v31 }
  0xa5   :  { %v144_v35 = vsel %vm143_vm11, %v3586_v23, %v140_v33 }
  0xa6   :  { %v145_v36 = vsel %vm133_vm12, %v144_v35, 0.0 }
  0xa7   :  { %v148_v39 = vperm.slane %v145_v36, 0 }
  0xa9   :  { %v149_v40 = vmul.f32 %v148_v39, %v146_v37  ;;  %v150_v44 = vmul.f32 %v148_v39, %v147_v43 }
  0xab   :  { %v3863_v42 = vsub.f32 0.0, %v149_v40  ;;  %v3870_v45 = vsub.f32 0.0, %v150_v44 }
  0xad   :  { %3372 = vmatmul.msk.f32.vlgmr.msra.gmra.mxu1 %vm71_vm0, %v3863_v42  ;;  %3374 = vmatmul.msk.f32.vlgmr.msra.gmra.mxu2 %vm71_vm0, %v3863_v42 }
  0xae   :  { %562 = vmatpush.msra.mxu1 %v3948_v60 }
  0xb0   :  { %563 = vmatpush.msra.mxu1 %v3953_v61 }
  0xb5   :  { %3373 = vmatmul.msk.f32.gmra.mxu1 %vm71_vm0, %v3870_v45  ;;  %3375 = vmatmul.msk.f32.gmra.mxu2 %vm71_vm0, %v3870_v45 }
 0x12a   :  { %v181_v46 = vpop.f32.mrf.mxu1 }
 0x12b   :  { %189 = vrot.lane.b32.xlu1 %v181_v46, %s3710_s0 }
 0x130   :  { %v218_v47 = vpop.f32.mrf.mxu2 }
 0x132   :  { %v184_v48 = vpop.f32.mrf.mxu1 }
 0x133   :  { %191 = vrot.lane.b32.xlu1 %v184_v48, %s3710_s0 }
 0x138   :  { %v221_v49 = vpop.f32.mrf.mxu2 }
 0x139   :  { %228 = vrot.lane.b32.xlu2 %v221_v49, %s3711_s22 }
 0x141   :  { %226 = vrot.lane.b32.xlu2 %v218_v47, %s3711_s22 }
 0x193   :  { %v229_v62 = vpop.permute.xlu2 %228 }
 0x194   :  { %234 = vst.msk [vmem:[#allocation3 + $0x8] sm:$0xff] %vm232_vm15, %v229_v62 }
 0x19b   :  { %v227_v63 = vpop.permute.xlu2 %226  ;;  %v273_v6 = vld [vmem:[#allocation3 + $0x8] sm:$0xff] }
 0x19c   :  { %233 = vst.msk [vmem:[#allocation3] sm:$0xff] %vm232_vm15, %v227_v63 }
 0x19d   :  { %v190_v0 = vpop.permute.xlu1 %189 }
 0x19e   :  { %196 = vst.msk [vmem:[#allocation2] sm:$0xff] %vm195_vm2, %v190_v0 }
 0x1a3   :  { %v272_v1 = vld [vmem:[#allocation3] sm:$0xff] }
 0x1a4   :  { %3378 = vmatmul.msk.f32.vlgmr.msrb.gmra.mxu1 %vm286_vm3, %v272_v1  ;;  %v4011_v1 = vld [vmem:[%s5271_s6 + $0x38] sm:$0xff] }
 0x1a5   :  { %v192_v2 = vpop.permute.xlu1 %191  ;;  %v235_v3 = vld [vmem:[#allocation2] sm:$0xff]  ;;  %3530 = vmatpush.msrb.mxu2 %v4011_v1 }
 0x1a6   :  { %197 = vst.msk [vmem:[#allocation2 + $0x8] sm:$0xff] %vm195_vm2, %v192_v2  ;;  %3376 = vmatmul.msk.f32.vlgmr.msra.gmra.mxu3 %vm71_vm0, %v235_v3  ;;  %v4016_v2 = vld [vmem:[%s5271_s6 + $0x30] sm:$0xff]  ;;  %v4023_v3 = vld [vmem:[%s5271_s6 + $0x28] sm:$0xff] }
 0x1a7   :  { %3531 = vmatpush.msrb.mxu2 %v4016_v2 }
 0x1a9   :  { %3532 = vmatpush.msrb.mxu2 %v4023_v3 }
 0x1ac   :  { %3390 = vmatmul.msk.f32.vlgmr.msra.gmra.mxu1 %vm71_vm0, %v3863_v42 }
 0x1ad   :  { %v236_v5 = vld [vmem:[#allocation2 + $0x8] sm:$0xff] }
 0x1ae   :  { %3377 = vmatmul.msk.f32.gmra.mxu3 %vm71_vm0, %v236_v5  ;;  %v4030_v5 = vld [vmem:[%s5271_s6 + $0x20] sm:$0xff] }
 0x1af   :  { %3533 = vmatpush.msrb.mxu2 %v4030_v5 }
 0x1b4   :  { %3391 = vmatmul.msk.f32.gmra.mxu1 %vm71_vm0, %v3870_v45 }
 0x1b6   :  { %3379 = vmatmul.msk.f32.vlgmr.msrb.gmra.mxu3 %vm286_vm3, %v273_v6 }
 0x221   :  { %v310_v10 = vpop.f32.mrf.mxu1 }
 0x222   :  { %v311_v12 = vadd.f32 %v3550_v7, %v310_v10  ;;  %v4046_v10 = vld [vmem:[%s5271_s6 + $0x10] sm:$0xff] }
 0x229   :  { %v266_v11 = vpop.f32.mrf.mxu3 }
 0x22a   :  { %v3986_v14 = vadd.f32 %v3551_v8, %v266_v11  ;;  %v4053_v11 = vld [vmem:[%s5271_s6 + $0x8] sm:$0xff] }
 0x22c   :  { %v316_v15 = vadd.f32 %v311_v12, %v3986_v14  ;;  %v4060_v12 = vld [vmem:[%s5271_s6] sm:$0xff] }
 0x22e   :  { %v3380_v16 = vmul.f32 -1.442695, %v316_v15 }
 0x230   :  { %3587 = vpow2.f32 %v3380_v16 }
 0x231   :  { %v269_v17 = vpop.f32.mrf.mxu3 }
 0x232   :  { %v3989_v21 = vadd.f32 %v3551_v8, %v269_v17  ;;  %v4041_v8 = vld [vmem:[%s5271_s6 + $0x18] sm:$0xff] }
 0x233   :  { %3534 = vmatpush.msrb.mxu2 %v4041_v8 }
 0x235   :  { %3535 = vmatpush.msrb.mxu2 %v4046_v10 }
 0x236   :  { %v3588_v18 = vpop.eup %3587 }
 0x237   :  { %v324_v19 = vadd.f32 1.0, %v3588_v18  ;;  %3536 = vmatpush.msrb.mxu2 %v4053_v11 }
 0x239   :  { %3589 = vrcp.f32 %v324_v19  ;;  %v313_v20 = vpop.f32.mrf.mxu3  ;;  %v337_v28 = vand.u32 2147483648, %v324_v19  ;;  %v335_v30 = vand.u32 2147483647, %v324_v19  ;;  %vm331_vm5 = vweird.f32 %v324_v19  ;;  %3537 = vmatpush.msrb.mxu2 %v4060_v12 }
 0x23a   :  { %v314_v22 = vadd.f32 %v3550_v7, %v313_v20 }
 0x23b   :  { %v338_v34 = vor.u32 1.1754944e-38, %v337_v28  ;;  %vm336_vm7 = vcmp.eq.f32.partialorder %v335_v30, 8.507059e+37  ;;  %v565_v28 = vpop.f32.mrf.mxu1 }
 0x23c   :  { %v317_v23 = vadd.f32 %v314_v22, %v3989_v21 }
 0x23e   :  { %v3381_v24 = vmul.f32 -1.442695, %v317_v23 }
 0x23f   :  { %v3590_v25 = vpop.eup %3589 }
 0x240   :  { %3591 = vpow2.f32 %v3381_v24  ;;  %v327_v26 = vmul.f32 %v3590_v25, %v324_v19  ;;  %vm332_vm4 = vweird.f32 %v3590_v25  ;;  %v3552_v19 = vld [vmem:[%s5272_s9] ss:$0 sm:$0xff] }
 0x241   :  { %vm333_vm6 = vmor %vm331_vm5, %vm332_vm4 }
 0x242   :  { %v328_v27 = vsub.f32 1.0, %v327_v26 }
 0x244   :  { %v329_v29 = vmul.f32 %v3590_v25, %v328_v27 }
 0x246   :  { %v3592_v31 = vpop.eup %3591  ;;  %v330_v32 = vadd.f32 %v3590_v25, %v329_v29  ;;  %v4081_v29 = vld [vmem:[%s5273_s10 + $0x18] sm:$0xff] }
 0x247   :  { %v325_v33 = vadd.f32 1.0, %v3592_v31  ;;  %500 = vmatpush.msra.mxu3 %v4081_v29 }
 0x248   :  { %v334_v35 = vsel %vm333_vm6, %v3590_v25, %v330_v32 }
 0x249   :  { %3593 = vrcp.f32 %v325_v33  ;;  %v3992_v36 = vsel %vm336_vm7, %v338_v34, %v334_v35  ;;  %v352_v40 = vand.u32 2147483648, %v325_v33  ;;  %v350_v43 = vand.u32 2147483647, %v325_v33  ;;  %v4107_v34 = vld [vmem:[%s5275_s13 + $0x38] sm:$0xff] }
 0x24a   :  { %358 = vrot.lane.b32.xlu1 %v3992_v36, %s3712_s1  ;;  %vm346_vm9 = vweird.f32 %v325_v33  ;;  %v458_v35 = vsub.f32 1.0, %v3992_v36 }
 0x24b   :  { %v353_v46 = vor.u32 1.1754944e-38, %v352_v40  ;;  %vm351_vm11 = vcmp.eq.f32.partialorder %v350_v43, 8.507059e+37 }
 0x24f   :  { %v3594_v37 = vpop.eup %3593 }
 0x250   :  { %v342_v38 = vmul.f32 %v3594_v37, %v325_v33  ;;  %vm347_vm8 = vweird.f32 %v3594_v37  ;;  %v4095_v33 = vld [vmem:[%s5273_s10 + $0x8] sm:$0xff] }
 0x251   :  { %vm348_vm10 = vmor %vm346_vm9, %vm347_vm8 }
 0x252   :  { %v343_v39 = vsub.f32 1.0, %v342_v38  ;;  %v456_v38 = vmul.f32 %v3992_v36, %v3857_v13  ;;  %v4135_v36 = vld [vmem:[%s5275_s13 + $0x20] sm:$0xff] }
 0x254   :  { %v344_v41 = vmul.f32 %v3594_v37, %v343_v39 }
 0x256   :  { %v345_v44 = vadd.f32 %v3594_v37, %v344_v41 }
 0x258   :  { %v349_v47 = vsel %vm348_vm10, %v3594_v37, %v345_v44  ;;  %v4123_v44 = vld [vmem:[%s5275_s13 + $0x30] sm:$0xff] }
 0x259   :  { %v3996_v48 = vsel %vm351_vm11, %v353_v46, %v349_v47  ;;  %v4141_v46 = vld [vmem:[%s5275_s13 + $0x18] sm:$0xff]  ;;  %v4146_v47 = vld [vmem:[%s5275_s13 + $0x10] sm:$0xff] }
 0x25a   :  { %360 = vrot.lane.b32.xlu0 %v3996_v48, %s3712_s1 }
 0x2bc   :  { %v359_v49 = vpop.permute.xlu1 %358 }
 0x2bd   :  { %v364_v62 = vmul.f32 %v359_v49, %v3857_v13  ;;  %v4129_v13 = vld [vmem:[%s5275_s13 + $0x28] sm:$0xff] }
 0x2be   :  { %v4152_v49 = vld [vmem:[%s5275_s13 + $0x8] sm:$0xff] }
 0x2bf   :  { %366 = vst.msk [vmem:[#allocation3] sm:$0xff] %vm5291_vm14, %v364_v62 }
 0x2cc   :  { %v361_v63 = vpop.permute.xlu0 %360 }
 0x2cd   :  { %v365_v0 = vmul.f32 %v361_v63, %v3848_v9  ;;  %v459_v63 = vsub.f32 1.0, %v3996_v48 }
 0x2cf   :  { %367 = vst.msk [vmem:[#allocation3 + $0x8] sm:$0xff] %vm5291_vm14, %v365_v0  ;;  %382 = vmatpush.msrb.mxu0 %v365_v0 }
 0x2d1   :  { %383 = vmatpush.msrb.mxu0 %v364_v62  ;;  %v4158_v62 = vld [vmem:[%s5275_s13] sm:$0xff] }
 0x2d2   :  { %3382 = vmatmul.msk.f32.vlgmr.msrb.gmra.mxu0 %vm71_vm0, %v3863_v42 }
 0x2d3   :  { %429 = vmatpush.msra.mxu0 %v4011_v1 }
 0x2d5   :  { %430 = vmatpush.msra.mxu0 %v4016_v2 }
 0x2d7   :  { %431 = vmatpush.msra.mxu0 %v4023_v3 }
 0x2d9   :  { %432 = vmatpush.msra.mxu0 %v4030_v5 }
 0x2da   :  { %3383 = vmatmul.msk.f32.gmra.mxu0 %vm71_vm0, %v3870_v45 }
 0x2db   :  { %433 = vmatpush.msra.mxu0 %v4041_v8 }
 0x2dd   :  { %434 = vmatpush.msra.mxu0 %v4046_v10 }
 0x2df   :  { %435 = vmatpush.msra.mxu0 %v4053_v11 }
 0x2e1   :  { %436 = vmatpush.msra.mxu0 %v4060_v12 }
 0x34f   :  { %v385_v6 = vpop.f32.mrf.mxu0 }
 0x350   :  { %393 = vrot.lane.b32.xlu2 %v385_v6, %s3711_s22  ;;  %v457_v6 = vmul.f32 %v3996_v48, %v3848_v9 }
 0x357   :  { %v388_v7 = vpop.f32.mrf.mxu0 }
 0x358   :  { %395 = vrot.lane.b32.xlu1 %v388_v7, %s3711_s22 }
 0x3aa   :  { %v394_v15 = vpop.permute.xlu2 %393 }
 0x3ab   :  { %399 = vst.msk [vmem:[#allocation3] sm:$0xff] %vm232_vm15, %v394_v15 }
 0x3b2   :  { %v401_v16 = vld [vmem:[#allocation3] sm:$0xff] }
 0x3b3   :  { %3384 = vmatmul.msk.f32.vlgmr.msra.gmra.mxu0 %vm286_vm3, %v401_v16 }
 0x3ca   :  { %v396_v17 = vpop.permute.xlu1 %395 }
 0x3cb   :  { %400 = vst.msk [vmem:[#allocation3 + $0x8] sm:$0xff] %vm232_vm15, %v396_v17 }
 0x3d2   :  { %v402_v18 = vld [vmem:[#allocation3 + $0x8] sm:$0xff] }
 0x3d3   :  { %3385 = vmatmul.msk.f32.vlgmr.msrb.gmra.mxu2 %vm286_vm3, %v402_v18  ;;  %v3553_v18 = vld [vmem:[%s5274_s11] ss:$0 sm:$0xff] }
 0x430   :  { %v438_v20 = vpop.f32.mrf.mxu0 }
 0x431   :  { %v439_v22 = vadd.f32 %v3552_v19, %v438_v20 }
 0x433   :  { %446 = vrot.lane.b32.xlu2 %v439_v22, %s3713_s21 }
 0x456   :  { %v441_v23 = vpop.f32.mrf.mxu2 }
 0x457   :  { %v442_v24 = vadd.f32 %v3552_v19, %v441_v23  ;;  %v568_v23 = vpop.f32.mrf.mxu1 }
 0x459   :  { %448 = vrot.lane.b32.xlu1 %v442_v24, %s3713_s21 }
 0x48d   :  { %v447_v25 = vpop.permute.xlu2 %446 }
 0x48e   :  { %v452_v26 = vadd.f32 %v447_v25, %v3986_v14  ;;  %v4088_v14 = vld [vmem:[%s5273_s10 + $0x10] sm:$0xff]  ;;  %v4187_v25 = vld [vmem:[%s5278_s12 + $0x8] sm:$0xff] }
 0x48f   :  { %501 = vmatpush.msra.mxu3 %v4088_v14  ;;  %609 = vmatpush.msra.mxu2 %v4187_v25 }
 0x490   :  { %3595 = vtanh.f32 %v452_v26  ;;  %v4192_v26 = vld [vmem:[%s5278_s12] sm:$0xff] }
 0x491   :  { %502 = vmatpush.msra.mxu3 %v4095_v33  ;;  %610 = vmatpush.msra.mxu2 %v4192_v26 }
 0x496   :  { %v3596_v27 = vpop.eup %3595 }
 0x497   :  { %462 = vrot.lane.b32.xlu2 %v3596_v27, %s3713_s21  ;;  %v4198_v27 = vld [vmem:[%s5297_s23 + $0x18] sm:$0xff] }
 0x498   :  { %3404 = vmatpush.xpose.msk.msrb.mxu2 %vm71_vm0, %v4198_v27 }
 0x49f   :  { %573 = vrot.lane.b32.xlu2 %v565_v28, %s3711_s22  ;;  %v4206_v28 = vld [vmem:[%s5297_s23 + $0x10] sm:$0xff] }
 0x4a0   :  { %3405 = vmatpush.xpose.msk.msrb.mxu2 %vm71_vm0, %v4206_v28 }
 0x4cb   :  { %v449_v30 = vpop.permute.xlu1 %448 }
 0x4cc   :  { %v453_v31 = vadd.f32 %v449_v30, %v3989_v21  ;;  %v4101_v21 = vld [vmem:[%s5273_s10] sm:$0xff] }
 0x4cd   :  { %503 = vmatpush.msra.mxu3 %v4101_v21 }
 0x4ce   :  { %3597 = vtanh.f32 %v453_v31 }
 0x4cf   :  { %646 = vmatpush.msrb.mxu3 %v4107_v34 }
 0x4d1   :  { %647 = vmatpush.msrb.mxu3 %v4123_v44 }
 0x4d3   :  { %648 = vmatpush.msrb.mxu3 %v4129_v13 }
 0x4d4   :  { %v3598_v32 = vpop.eup %3597 }
 0x4d5   :  { %464 = vrot.lane.b32.xlu0 %v3598_v32, %s3713_s21  ;;  %649 = vmatpush.msrb.mxu3 %v4135_v36 }
 0x4d7   :  { %650 = vmatpush.msrb.mxu3 %v4141_v46 }
 0x4d9   :  { %651 = vmatpush.msrb.mxu3 %v4146_v47 }
 0x4db   :  { %652 = vmatpush.msrb.mxu3 %v4152_v49 }
 0x4dd   :  { %653 = vmatpush.msrb.mxu3 %v4158_v62 }
 0x4f1   :  { %v463_v37 = vpop.permute.xlu2 %462 }
 0x4f2   :  { %v468_v39 = vmul.f32 %v463_v37, %v458_v35 }
 0x4f4   :  { %v4113_v40 = vadd.f32 %v468_v39, %v456_v38  ;;  %v820_v39 = vsel %vm71_vm0, %v4206_v28, 0.0 }
 0x4f5   :  { %821 = vadd.xlane.f32.xlu2 %v820_v39 }
 0x4f6   :  { %942 = vst.msk [vmem:[#allocation3] sm:$0xff] %vm5291_vm14, %v4113_v40  ;;  %v472_v41 = vmax.f32 %v4113_v40, 0.0 }
 0x4f8   :  { %3386 = vmatmul.msk.f32.vlgmr.msra.gmra.mxu3 %vm5291_vm14, %v472_v41 }
 0x4f9   :  { %v574_v43 = vpop.permute.xlu2 %573 }
 0x4fa   :  { %579 = vst.msk [vmem:[#allocation5] sm:$0xff] %vm232_vm15, %v574_v43 }
 0x501   :  { %v618_v17 = vld [vmem:[#allocation5] sm:$0xff] }
 0x547   :  { %v465_v0 = vpop.permute.xlu0 %464 }
 0x548   :  { %v469_v7 = vmul.f32 %v465_v0, %v459_v63 }
 0x54a   :  { %v4165_v15 = vadd.f32 %v469_v7, %v457_v6 }
 0x54c   :  { %943 = vst.msk [vmem:[#allocation3 + $0x8] sm:$0xff] %vm5291_vm14, %v4165_v15  ;;  %v473_v16 = vmax.f32 %v4165_v15, 0.0 }
 0x54e   :  { %3387 = vmatmul.msk.f32.gmra.mxu3 %vm5291_vm14, %v473_v16 }
 0x556   :  { %3394 = vmatmul.msk.f32.vlgmr.msrb.gmra.mxu3 %vm286_vm3, %v618_v17 }
 0x57b   :  { %v505_v19 = vpop.f32.mrf.mxu3 }
 0x57c   :  { %v506_v20 = vadd.f32 %v3553_v18, %v505_v19 }
 0x57e   :  { %511 = vst.msk [vmem:[#allocation4] sm:$0xff] %vm5289_vm1, %v506_v20 }
 0x5d1   :  { %v508_v9 = vpop.f32.mrf.mxu3 }
 0x5d2   :  { %v509_v48 = vadd.f32 %v3553_v18, %v508_v9 }
 0x5d4   :  { %512 = vst.msk [vmem:[#allocation4 + $0x8] sm:$0xff] %vm5289_vm1, %v509_v48  ;;  %527 = vmatpush.msrb.mxu0 %v509_v48 }
 0x5d6   :  { %528 = vmatpush.msrb.mxu0 %v506_v20 }
 0x5d7   :  { %3388 = vmatmul.msk.f32.vlgmr.msrb.gmra.mxu0 %vm71_vm0, %v3863_v42 }
 0x5df   :  { %3389 = vmatmul.msk.f32.gmra.mxu0 %vm71_vm0, %v3870_v45 }
 0x654   :  { %v530_v22 = vpop.f32.mrf.mxu0 }
 0x655   :  { %538 = vrot.lane.b32.xlu1 %v530_v22, %s3710_s0 }
 0x65c   :  { %v533_v24 = vpop.f32.mrf.mxu0 }
 0x65d   :  { %575 = vrot.lane.b32.xlu1 %v568_v23, %s3711_s22  ;;  %540 = vrot.lane.b32.xlu0 %v533_v24, %s3710_s0 }
 0x6c7   :  { %v539_v30 = vpop.permute.xlu1 %538 }
 0x6c8   :  { %544 = vst.msk [vmem:[#allocation4] sm:$0xff] %vm195_vm2, %v539_v30 }
 0x6cf   :  { %v576_v31 = vpop.permute.xlu1 %575  ;;  %v541_v32 = vpop.permute.xlu0 %540  ;;  %v581_v35 = vld [vmem:[#allocation4] sm:$0xff] }
 0x6d0   :  { %580 = vst.msk [vmem:[#allocation5 + $0x8] sm:$0xff] %vm232_vm15, %v576_v31  ;;  %3392 = vmatmul.msk.f32.vlgmr.msra.gmra.mxu2 %vm71_vm0, %v581_v35 }
 0x6d1   :  { %545 = vst.msk [vmem:[#allocation4 + $0x8] sm:$0xff] %vm195_vm2, %v541_v32  ;;  %958 = vmatpush.msra.mxu2 %v4165_v15 }
 0x6d3   :  { %959 = vmatpush.msra.mxu2 %v4113_v40 }
 0x6d7   :  { %v619_v37 = vld [vmem:[#allocation5 + $0x8] sm:$0xff] }
 0x6d8   :  { %v582_v38 = vld [vmem:[#allocation4 + $0x8] sm:$0xff]  ;;  %3395 = vmatmul.msk.f32.gmra.mxu3 %vm286_vm3, %v619_v37 }
 0x6d9   :  { %3393 = vmatmul.msk.f32.gmra.mxu2 %vm71_vm0, %v582_v38 }
 0x6e1   :  { %3406 = vmatmul.msk.f32.vlgmr.msrb.gmra.mxu2 %vm71_vm0, %v3709_v4 }
 0x6e2   :  { %1170 = vmatpush.msrb.mxu2 %v4011_v1  ;;  %v823_v1 = vsel %vm71_vm0, %v4198_v27, 0.0 }
 0x6e3   :  { %824 = vadd.xlane.f32.xlu0 %v823_v1 }
 0x6e4   :  { %1171 = vmatpush.msrb.mxu2 %v4016_v2  ;;  %v3554_v2 = vld [vmem:[%s5276_s16] ss:$0 sm:$0xff] }
 0x6e6   :  { %1172 = vmatpush.msrb.mxu2 %v4023_v3  ;;  %v3555_v3 = vld [vmem:[%s5277_s15] ss:$0 sm:$0xff] }
 0x6e8   :  { %1173 = vmatpush.msrb.mxu2 %v4030_v5  ;;  %v655_v5 = vpop.f32.mrf.mxu3 }
 0x6ea   :  { %1174 = vmatpush.msrb.mxu2 %v4041_v8 }
 0x6ec   :  { %1175 = vmatpush.msrb.mxu2 %v4046_v10  ;;  %v656_v10 = vadd.f32 %v3554_v2, %v655_v5 }
 0x6ee   :  { %1176 = vmatpush.msrb.mxu2 %v4053_v11 }
 0x6f0   :  { %1177 = vmatpush.msrb.mxu2 %v4060_v12 }
 0x753   :  { %v612_v8 = vpop.f32.mrf.mxu2 }
 0x754   :  { %v4238_v11 = vadd.f32 %v3555_v3, %v612_v8 }
 0x756   :  { %v661_v12 = vadd.f32 %v656_v10, %v4238_v11 }
 0x758   :  { %v3396_v41 = vmul.f32 -1.442695, %v661_v12 }
 0x75a   :  { %3599 = vpow2.f32 %v3396_v41 }
 0x75b   :  { %v658_v43 = vpop.f32.mrf.mxu3 }
 0x75c   :  { %v615_v63 = vpop.f32.mrf.mxu2  ;;  %v659_v0 = vadd.f32 %v3554_v2, %v658_v43 }
 0x75d   :  { %v4241_v6 = vadd.f32 %v3555_v3, %v615_v63 }
 0x75f   :  { %v662_v7 = vadd.f32 %v659_v0, %v4241_v6 }
 0x760   :  { %v3600_v17 = vpop.eup %3599 }
 0x761   :  { %v3397_v16 = vmul.f32 -1.442695, %v662_v7  ;;  %v669_v18 = vadd.f32 1.0, %v3600_v17  ;;  %v822_v7 = vpop.xlane.xlu2 %821 }
 0x762   :  { %v854_v17 = vmax.f32 %v822_v7, 1e-12 }
 0x763   :  { %3601 = vpow2.f32 %v3397_v16  ;;  %v682_v5 = vand.u32 2147483648, %v669_v18  ;;  %vm676_vm7 = vweird.f32 %v669_v18  ;;  %v680_v8 = vand.u32 2147483647, %v669_v18 }
 0x764   :  { %3603 = vrcp.f32 %v669_v18  ;;  %v849_v43 = vpop.f32.mrf.mxu2 }
 0x765   :  { %v683_v12 = vor.u32 1.1754944e-38, %v682_v5  ;;  %vm681_vm9 = vcmp.eq.f32.partialorder %v680_v8, 8.507059e+37  ;;  %v879_v63 = vmax.f32 %v849_v43, 1e-12 }
 0x767   :  { %vm886_vm10 = vweird.f32 %v879_v63 }
 0x769   :  { %v3602_v19 = vpop.eup %3601 }
 0x76a   :  { %v670_v20 = vadd.f32 1.0, %v3602_v19  ;;  %v3604_v9 = vpop.eup %3603 }
 0x76b   :  { %v672_v48 = vmul.f32 %v3604_v9, %v669_v18  ;;  %vm677_vm6 = vweird.f32 %v3604_v9  ;;  %v3408_v18 = vld [vmem:[%s5298_s26 + $0x18] sm:$0xff] }
 0x76c   :  { %3605 = vrcp.f32 %v670_v20  ;;  %v697_v31 = vand.u32 2147483648, %v670_v20  ;;  %v695_v35 = vand.u32 2147483647, %v670_v20  ;;  %vm691_vm13 = vweird.f32 %v670_v20  ;;  %vm678_vm8 = vmor %vm676_vm7, %vm677_vm6  ;;  %923 = vmatpush.msra.mxu3 %v3408_v18  ;;  %902 = vst.msk [vmem:[#allocation2 + $0x8] sm:$0xff] %vm5289_vm1, %v3408_v18 }
 0x76d   :  { %v673_v30 = vsub.f32 1.0, %v672_v48  ;;  %3607 = vrsqrt.f32 %v879_v63  ;;  %vm852_vm7 = vcmp.gt.f32.partialorder %v822_v7, 0.0 }
 0x76e   :  { %v698_v39 = vor.u32 1.1754944e-38, %v697_v31  ;;  %vm696_vm5 = vcmp.eq.f32.partialorder %v695_v35, 8.507059e+37  ;;  %3609 = vrsqrt.f32 %v854_v17 }
 0x76f   :  { %v674_v38 = vmul.f32 %v3604_v9, %v673_v30 }
 0x771   :  { %v675_v3 = vadd.f32 %v3604_v9, %v674_v38 }
 0x772   :  { %v3606_v22 = vpop.eup %3605 }
 0x773   :  { %v687_v23 = vmul.f32 %v3606_v22, %v670_v20  ;;  %vm692_vm12 = vweird.f32 %v3606_v22  ;;  %v679_v10 = vsel %vm678_vm8, %v3604_v9, %v675_v3  ;;  %v3608_v0 = vpop.eup %3607  ;;  %v3407_v9 = vld [vmem:[%s5298_s26 + $0x10] sm:$0xff] }
 0x774   :  { %vm693_vm4 = vmor %vm691_vm13, %vm692_vm12  ;;  %v4248_v41 = vsel %vm681_vm9, %v683_v12, %v679_v10  ;;  %v881_v16 = vmul.f32 %v3608_v0, %v879_v63  ;;  %901 = vst.msk [vmem:[#allocation2] sm:$0xff] %vm5289_vm1, %v3407_v9  ;;  %924 = vmatpush.msra.mxu3 %v3407_v9  ;;  %vm887_vm11 = vweird.f32 %v3608_v0  ;;  %vm878_vm13 = vcmp.gt.f32.partialorder %v849_v43, 0.0 }
 0x775   :  { %v688_v24 = vsub.f32 1.0, %v687_v23  ;;  %v825_v23 = vpop.xlane.xlu0 %824  ;;  %vm888_vm12 = vmor %vm886_vm10, %vm887_vm11 }
 0x776   :  { %v882_v19 = vmul.f32 %v3608_v0, %v881_v16  ;;  %v855_v31 = vmax.f32 %v825_v23, 1e-12  ;;  %vm853_vm11 = vcmp.gt.f32.partialorder %v825_v23, 0.0 }
 0x777   :  { %v689_v32 = vmul.f32 %v3606_v22, %v688_v24 }
 0x778   :  { %v883_v20 = vmul.f32 0.5, %v882_v19  ;;  %3611 = vrsqrt.f32 %v855_v31  ;;  %vm872_vm8 = vweird.f32 %v855_v31 }
 0x779   :  { %v690_v37 = vadd.f32 %v3606_v22, %v689_v32 }
 0x77a   :  { %v884_v48 = vsub.f32 1.5, %v883_v20 }
 0x77b   :  { %v694_v1 = vsel %vm693_vm4, %v3606_v22, %v690_v37  ;;  %v3610_v22 = vpop.eup %3609  ;;  %vm862_vm4 = vweird.f32 %v854_v17 }
 0x77c   :  { %v4244_v2 = vsel %vm696_vm5, %v698_v39, %v694_v1  ;;  %v857_v24 = vmul.f32 %v3610_v22, %v854_v17  ;;  %v885_v30 = vmul.f32 %v3608_v0, %v884_v48  ;;  %vm863_vm5 = vweird.f32 %v3610_v22 }
 0x77d   :  { %705 = vrot.lane.b32.xlu1 %v4244_v2, %s3712_s1  ;;  %vm864_vm6 = vmor %vm862_vm4, %vm863_vm5 }
 0x77e   :  { %v858_v32 = vmul.f32 %v3610_v22, %v857_v24  ;;  %v889_v37 = vsel %vm888_vm12, %v3608_v0, %v885_v30  ;;  %v3612_v3 = vpop.eup %3611  ;;  %v4317_v30 = vld [vmem:[%s5279_s14 + $0x20] sm:$0xff] }
 0x77f   :  { %v890_v39 = vsel %vm878_vm13, %v889_v37, 0.0  ;;  %v867_v10 = vmul.f32 %v3612_v3, %v855_v31  ;;  %vm873_vm9 = vweird.f32 %v3612_v3  ;;  %v4336_v37 = vld [vmem:[%s5279_s14 + $0x8] sm:$0xff] }
 0x780   :  { %v859_v35 = vmul.f32 0.5, %v858_v32  ;;  %v893_v8 = vperm.slane %v890_v39, 0  ;;  %vm874_vm10 = vmor %vm872_vm8, %vm873_vm9  ;;  %v4325_v32 = vld [vmem:[%s5279_s14 + $0x18] sm:$0xff] }
 0x781   :  { %v868_v16 = vmul.f32 %v3612_v3, %v867_v10 }
 0x782   :  { %v860_v38 = vsub.f32 1.5, %v859_v35  ;;  %v4330_v35 = vld [vmem:[%s5279_s14 + $0x10] sm:$0xff] }
 0x783   :  { %v869_v43 = vmul.f32 0.5, %v868_v16 }
 0x784   :  { %v861_v1 = vmul.f32 %v3610_v22, %v860_v38  ;;  %v4342_v38 = vld [vmem:[%s5279_s14] sm:$0xff] }
 0x785   :  { %703 = vrot.lane.b32.xlu1 %v4248_v41, %s3712_s1  ;;  %v870_v0 = vsub.f32 1.5, %v869_v43 }
 0x786   :  { %v865_v5 = vsel %vm864_vm6, %v3610_v22, %v861_v1 }
 0x787   :  { %v876_v12 = vsel %vm852_vm7, %v865_v5, 0.0  ;;  %v871_v20 = vmul.f32 %v3612_v3, %v870_v0 }
 0x788   :  { %v891_v63 = vmul.f32 %v4206_v28, %v876_v12 }
 0x789   :  { %v875_v28 = vsel %vm874_vm10, %v3612_v3, %v871_v20 }
 0x78a   :  { %v894_v19 = vmul.f32 %v893_v8, %v891_v63  ;;  %v877_v7 = vsel %vm853_vm11, %v875_v28, 0.0 }
 0x78b   :  { %v892_v18 = vmul.f32 %v4198_v27, %v877_v7 }
 0x78c   :  { %v4261_v17 = vsub.f32 0.0, %v894_v19 }
 0x78d   :  { %v895_v9 = vmul.f32 %v893_v8, %v892_v18 }
 0x78e   :  { %3409 = vmatmul.msk.f32.vlgmr.msra.gmra.mxu3 %vm71_vm0, %v4261_v17  ;;  %3411 = vmatmul.msk.f32.vlgmr.msra.gmra.mxu2 %vm71_vm0, %v4261_v17 }
 0x78f   :  { %1350 = vmatpush.msra.mxu2 %v4187_v25  ;;  %v4270_v48 = vsub.f32 0.0, %v895_v9 }
 0x791   :  { %1351 = vmatpush.msra.mxu2 %v4192_v26 }
 0x796   :  { %3410 = vmatmul.msk.f32.gmra.mxu3 %vm71_vm0, %v4270_v48  ;;  %3412 = vmatmul.msk.f32.gmra.mxu2 %vm71_vm0, %v4270_v48 }
 0x7ef   :  { %v706_v22 = vpop.permute.xlu1 %705 }
 0x7f0   :  { %v710_v23 = vmul.f32 %v706_v22, %v3948_v60 }
 0x7f2   :  { %712 = vst.msk [vmem:[#allocation5 + $0x8] sm:$0xff] %vm5291_vm14, %v710_v23  ;;  %727 = vmatpush.msra.mxu0 %v710_v23 }
 0x7f7   :  { %v704_v25 = vpop.permute.xlu1 %703 }
 0x7f8   :  { %v709_v26 = vmul.f32 %v704_v25, %v3953_v61 }
 0x7fa   :  { %711 = vst.msk [vmem:[#allocation5] sm:$0xff] %vm5291_vm14, %v709_v26  ;;  %728 = vmatpush.msra.mxu0 %v709_v26 }
 0x7fb   :  { %3398 = vmatmul.msk.f32.vlgmr.msra.gmra.mxu0 %vm71_vm0, %v3863_v42 }
 0x7fc   :  { %1005 = vmatpush.msrb.mxu0 %v3927_v57 }
 0x7fe   :  { %1006 = vmatpush.msrb.mxu0 %v3941_v59 }
 0x800   :  { %1241 = vmatpush.msra.mxu0 %v4081_v29  ;;  %v4302_v29 = vld [vmem:[%s5279_s14 + $0x30] sm:$0xff] }
 0x802   :  { %1242 = vmatpush.msra.mxu0 %v4088_v14 }
 0x803   :  { %3399 = vmatmul.msk.f32.gmra.mxu0 %vm71_vm0, %v3870_v45  ;;  %v4297_v45 = vld [vmem:[%s5279_s14 + $0x38] sm:$0xff] }
 0x804   :  { %1243 = vmatpush.msra.mxu0 %v4095_v33  ;;  %774 = vmatpush.msrb.mxu1 %v4297_v45 }
 0x806   :  { %1244 = vmatpush.msra.mxu0 %v4101_v21  ;;  %775 = vmatpush.msrb.mxu1 %v4302_v29  ;;  %v4312_v21 = vld [vmem:[%s5279_s14 + $0x28] sm:$0xff] }
 0x808   :  { %776 = vmatpush.msrb.mxu1 %v4312_v21 }
 0x80a   :  { %777 = vmatpush.msrb.mxu1 %v4317_v30 }
 0x80c   :  { %778 = vmatpush.msrb.mxu1 %v4325_v32 }
 0x80e   :  { %779 = vmatpush.msrb.mxu1 %v4330_v35 }
 0x810   :  { %780 = vmatpush.msrb.mxu1 %v4336_v37 }
 0x811   :  { %v926_v27 = vpop.f32.mrf.mxu3  ;;  %v961_v24 = vpop.f32.mrf.mxu2 }
 0x812   :  { %969 = vrot.lane.b32.xlu2 %v961_v24, %s3711_s22  ;;  %781 = vmatpush.msrb.mxu1 %v4342_v38 }
 0x814   :  { %1042 = vmatpush.msra.mxu1 %v3887_v50 }
 0x816   :  { %1043 = vmatpush.msra.mxu1 %v3892_v51 }
 0x818   :  { %1044 = vmatpush.msra.mxu1 %v3898_v52 }
 0x819   :  { %v929_v42 = vpop.f32.mrf.mxu3  ;;  %v964_v14 = vpop.f32.mrf.mxu2 }
 0x81a   :  { %936 = vrot.lane.b32.xlu0 %v929_v42, %s3710_s0  ;;  %1045 = vmatpush.msra.mxu1 %v3905_v53 }
 0x81c   :  { %1046 = vmatpush.msra.mxu1 %v3911_v54 }
 0x81e   :  { %1047 = vmatpush.msra.mxu1 %v3917_v55 }
 0x820   :  { %1048 = vmatpush.msra.mxu1 %v3922_v56 }
 0x822   :  { %1049 = vmatpush.msra.mxu1 %v3934_v58  ;;  %v4375_v58 = vld [vmem:[%s5280_s17] ss:$0 sm:$0xff] }
 0x86c   :  { %v970_v33 = vpop.permute.xlu2 %969 }
 0x86d   :  { %975 = vst.msk [vmem:[#allocation3] sm:$0xff] %vm232_vm15, %v970_v33 }
 0x874   :  { %v1014_v54 = vld [vmem:[#allocation3] sm:$0xff] }
 0x878   :  { %v730_v57 = vpop.f32.mrf.mxu0 }
 0x879   :  { %738 = vrot.lane.b32.xlu1 %v730_v57, %s3711_s22 }
 0x880   :  { %v733_v59 = vpop.f32.mrf.mxu0 }
 0x881   :  { %740 = vrot.lane.b32.xlu1 %v733_v59, %s3711_s22 }
 0x889   :  { %934 = vrot.lane.b32.xlu1 %v926_v27, %s3710_s0 }
 0x88c   :  { %v937_v31 = vpop.permute.xlu0 %936 }
 0x88d   :  { %941 = vst.msk [vmem:[#allocation2 + $0x8] sm:$0xff] %vm195_vm2, %v937_v31 }
 0x891   :  { %971 = vrot.lane.b32.xlu1 %v964_v14, %s3711_s22 }
 0x894   :  { %v978_v55 = vld [vmem:[#allocation2 + $0x8] sm:$0xff] }
 0x8eb   :  { %v739_v39 = vpop.permute.xlu1 %738 }
 0x8ec   :  { %744 = vst.msk [vmem:[#allocation5] sm:$0xff] %vm232_vm15, %v739_v39 }
 0x8f3   :  { %v741_v1 = vpop.permute.xlu1 %740  ;;  %v746_v3 = vld [vmem:[#allocation5] sm:$0xff] }
 0x8f4   :  { %745 = vst.msk [vmem:[#allocation5 + $0x8] sm:$0xff] %vm232_vm15, %v741_v1  ;;  %3400 = vmatmul.msk.f32.vlgmr.msrb.gmra.mxu1 %vm286_vm3, %v746_v3 }
 0x8fb   :  { %v935_v50 = vpop.permute.xlu1 %934  ;;  %v747_v51 = vld [vmem:[#allocation5 + $0x8] sm:$0xff] }
 0x8fc   :  { %940 = vst.msk [vmem:[#allocation2] sm:$0xff] %vm195_vm2, %v935_v50  ;;  %3401 = vmatmul.msk.f32.gmra.mxu1 %vm286_vm3, %v747_v51 }
 0x903   :  { %v972_v52 = vpop.permute.xlu1 %971  ;;  %v977_v53 = vld [vmem:[#allocation2] sm:$0xff] }
 0x904   :  { %976 = vst.msk [vmem:[#allocation3 + $0x8] sm:$0xff] %vm232_vm15, %v972_v52  ;;  %3413 = vmatmul.msk.f32.vlgmr.msrb.gmra.mxu0 %vm71_vm0, %v977_v53  ;;  %3415 = vmatmul.msk.f32.vlgmr.msra.gmra.mxu1 %vm286_vm3, %v1014_v54 }
 0x905   :  { %1387 = vmatpush.msrb.mxu0 %v4107_v34 }
 0x907   :  { %1388 = vmatpush.msrb.mxu0 %v4123_v44 }
 0x909   :  { %1389 = vmatpush.msrb.mxu0 %v4129_v13 }
 0x90b   :  { %v1015_v56 = vld [vmem:[#allocation3 + $0x8] sm:$0xff]  ;;  %1390 = vmatpush.msrb.mxu0 %v4135_v36  ;;  %v3557_v36 = vld [vmem:[%s5270_s7] ss:$0 sm:$0xff] }
 0x90c   :  { %3414 = vmatmul.msk.f32.gmra.mxu0 %vm71_vm0, %v978_v55  ;;  %3416 = vmatmul.msk.f32.gmra.mxu1 %vm286_vm3, %v1015_v56 }
 0x90d   :  { %1391 = vmatpush.msrb.mxu0 %v4141_v46  ;;  %v3558_v46 = vld [vmem:[%s5301_s5] ss:$0 sm:$0xff] }
 0x90f   :  { %1392 = vmatpush.msrb.mxu0 %v4146_v47 }
 0x911   :  { %1393 = vmatpush.msrb.mxu0 %v4152_v49 }
 0x913   :  { %1394 = vmatpush.msrb.mxu0 %v4158_v62 }
 0x971   :  { %v783_v34 = vpop.f32.mrf.mxu1 }
 0x972   :  { %v4378_v44 = vadd.f32 %v4375_v58, %v783_v34 }
 0x979   :  { %v4380_v13 = vpop.f32.mrf.mxu1 }
 0x981   :  { %v1008_v47 = vpop.f32.mrf.mxu0  ;;  %v1051_v49 = vpop.f32.mrf.mxu1 }
 0x982   :  { %v4388_v62 = vadd.f32 %v3557_v36, %v1008_v47  ;;  %v1052_v5 = vadd.f32 %v3558_v46, %v1051_v49 }
 0x984   :  { %v1057_v8 = vadd.f32 %v1052_v5, %v4388_v62 }
 0x986   :  { %v3417_v10 = vmul.f32 -1.442695, %v1057_v8 }
 0x988   :  { %3613 = vpow2.f32 %v3417_v10  ;;  %v3559_v10 = vld [vmem:[%s5272_s9] ss:$0 sm:$0xff] }
 0x989   :  { %v1011_v12 = vpop.f32.mrf.mxu0  ;;  %v1054_v63 = vpop.f32.mrf.mxu1 }
 0x98a   :  { %v4391_v16 = vadd.f32 %v3557_v36, %v1011_v12  ;;  %v1055_v19 = vadd.f32 %v3558_v46, %v1054_v63 }
 0x98c   :  { %v1058_v43 = vadd.f32 %v1055_v19, %v4391_v16 }
 0x98e   :  { %v3614_v0 = vpop.eup %3613  ;;  %v3418_v20 = vmul.f32 -1.442695, %v1058_v43 }
 0x98f   :  { %v1065_v28 = vadd.f32 1.0, %v3614_v0  ;;  %v787_v0 = vadd.f32 %v4375_v58, %v4380_v13 }
 0x990   :  { %3615 = vpow2.f32 %v3418_v20 }
 0x991   :  { %3617 = vrcp.f32 %v1065_v28  ;;  %v1078_v3 = vand.u32 2147483648, %v1065_v28  ;;  %vm1072_vm7 = vweird.f32 %v1065_v28  ;;  %v1076_v50 = vand.u32 2147483647, %v1065_v28 }
 0x993   :  { %v1079_v52 = vor.u32 1.1754944e-38, %v1078_v3  ;;  %vm1077_vm9 = vcmp.eq.f32.partialorder %v1076_v50, 8.507059e+37  ;;  %v803_v50 = vsub.f32 1.0, %v4248_v41 }
 0x996   :  { %v3616_v7 = vpop.eup %3615 }
 0x997   :  { %v1066_v18 = vadd.f32 1.0, %v3616_v7  ;;  %v3618_v9 = vpop.eup %3617 }
 0x998   :  { %v1068_v22 = vmul.f32 %v3618_v9, %v1065_v28  ;;  %vm1073_vm6 = vweird.f32 %v3618_v9 }
 0x999   :  { %3619 = vrcp.f32 %v1066_v18  ;;  %v1093_v24 = vand.u32 2147483648, %v1066_v18  ;;  %v1091_v57 = vand.u32 2147483647, %v1066_v18  ;;  %vm1087_vm13 = vweird.f32 %v1066_v18  ;;  %vm1074_vm8 = vmor %vm1072_vm7, %vm1073_vm6 }
 0x99a   :  { %v1069_v27 = vsub.f32 1.0, %v1068_v22 }
 0x99b   :  { %v1094_v33 = vor.u32 1.1754944e-38, %v1093_v24  ;;  %vm1092_vm5 = vcmp.eq.f32.partialorder %v1091_v57, 8.507059e+37 }
 0x99c   :  { %v1070_v14 = vmul.f32 %v3618_v9, %v1069_v27 }
 0x99e   :  { %v1071_v1 = vadd.f32 %v3618_v9, %v1070_v14 }
 0x99f   :  { %v3620_v23 = vpop.eup %3619 }
 0x9a0   :  { %v1083_v25 = vmul.f32 %v3620_v23, %v1066_v18  ;;  %vm1088_vm12 = vweird.f32 %v3620_v23  ;;  %v1075_v51 = vsel %vm1074_vm8, %v3618_v9, %v1071_v1 }
 0x9a1   :  { %vm1089_vm4 = vmor %vm1087_vm13, %vm1088_vm12  ;;  %v1080_v53 = vsel %vm1077_vm9, %v1079_v52, %v1075_v51  ;;  %v801_v52 = vmul.f32 %v4248_v41, %v3953_v61 }
 0x9a2   :  { %v1084_v26 = vsub.f32 1.0, %v1083_v25  ;;  %v1199_v13 = vsub.f32 1.0, %v1080_v53 }
 0x9a4   :  { %v1085_v42 = vmul.f32 %v3620_v23, %v1084_v26 }
 0x9a6   :  { %v1086_v59 = vadd.f32 %v3620_v23, %v1085_v42 }
 0x9a8   :  { %v1090_v31 = vsel %vm1089_vm4, %v3620_v23, %v1086_v59 }
 0x9a9   :  { %v4394_v39 = vsel %vm1092_vm5, %v1094_v33, %v1090_v31  ;;  %v804_v31 = vsub.f32 1.0, %v4244_v2 }
 0x9aa   :  { %1101 = vrot.lane.b32.xlu1 %v4394_v39, %s3712_s1  ;;  %v1198_v57 = vmul.f32 %v4394_v39, %v4165_v15 }
 0x9b2   :  { %1099 = vrot.lane.b32.xlu1 %v1080_v53, %s3712_s1 }
 0xa1c   :  { %v1102_v54 = vpop.permute.xlu1 %1101 }
 0xa1d   :  { %v1106_v55 = vmul.f32 %v1102_v54, %v4165_v15  ;;  %v802_v15 = vmul.f32 %v4244_v2, %v3948_v60  ;;  %v3560_v60 = vld [vmem:[%s5274_s11] ss:$0 sm:$0xff] }
 0xa1f   :  { %1108 = vst.msk [vmem:[#allocation3 + $0x8] sm:$0xff] %vm5291_vm14, %v1106_v55  ;;  %1123 = vmatpush.msrb.mxu3 %v1106_v55 }
 0xa24   :  { %v1100_v56 = vpop.permute.xlu1 %1099 }
 0xa25   :  { %v1105_v34 = vmul.f32 %v1100_v56, %v4113_v40 }
 0xa27   :  { %1107 = vst.msk [vmem:[#allocation3] sm:$0xff] %vm5291_vm14, %v1105_v34  ;;  %1124 = vmatpush.msrb.mxu3 %v1105_v34 }
 0xa28   :  { %3419 = vmatmul.msk.f32.vlgmr.msrb.gmra.mxu3 %vm71_vm0, %v4261_v17 }
 0xa30   :  { %3420 = vmatmul.msk.f32.gmra.mxu3 %vm71_vm0, %v4270_v48 }
 0xaab   :  { %v1126_v36 = vpop.f32.mrf.mxu3 }
 0xaac   :  { %1134 = vrot.lane.b32.xlu2 %v1126_v36, %s3711_s22 }
 0xab3   :  { %v1129_v46 = vpop.f32.mrf.mxu3 }
 0xab4   :  { %1136 = vrot.lane.b32.xlu0 %v1129_v46, %s3711_s22 }
 0xb06   :  { %v1135_v47 = vpop.permute.xlu2 %1134 }
 0xb07   :  { %1140 = vst.msk [vmem:[#allocation3] sm:$0xff] %vm232_vm15, %v1135_v47  ;;  %v3561_v47 = vld [vmem:[%s5276_s16] ss:$0 sm:$0xff] }
 0xb0e   :  { %v1142_v49 = vld [vmem:[#allocation3] sm:$0xff] }
 0xb0f   :  { %3421 = vmatmul.msk.f32.vlgmr.msrb.gmra.mxu2 %vm286_vm3, %v1142_v49  ;;  %v3562_v49 = vld [vmem:[%s5277_s15] ss:$0 sm:$0xff] }
 0xb26   :  { %v1137_v5 = vpop.permute.xlu0 %1136 }
 0xb27   :  { %1141 = vst.msk [vmem:[#allocation3 + $0x8] sm:$0xff] %vm232_vm15, %v1137_v5 }
 0xb2e   :  { %v1143_v8 = vld [vmem:[#allocation3 + $0x8] sm:$0xff] }
 0xb2f   :  { %3422 = vmatmul.msk.f32.gmra.mxu2 %vm286_vm3, %v1143_v8 }
 0xb92   :  { %v1179_v12 = vpop.f32.mrf.mxu2 }
 0xb93   :  { %v1180_v63 = vadd.f32 %v3559_v10, %v1179_v12 }
 0xb95   :  { %1187 = vrot.lane.b32.xlu1 %v1180_v63, %s3713_s21 }
 0xbb2   :  { %v1182_v19 = vpop.f32.mrf.mxu2 }
 0xbb3   :  { %v1183_v43 = vadd.f32 %v3559_v10, %v1182_v19 }
 0xbb5   :  { %1189 = vrot.lane.b32.xlu2 %v1183_v43, %s3713_s21 }
 0xbbd   :  { %793 = vrot.lane.b32.xlu2 %v787_v0, %s3713_s21 }
 0xc07   :  { %v1188_v20 = vpop.permute.xlu1 %1187 }
 0xc08   :  { %v1193_v28 = vadd.f32 %v1188_v20, %v4388_v62 }
 0xc0a   :  { %3621 = vtanh.f32 %v1193_v28 }
 0xc0f   :  { %v1190_v7 = vpop.permute.xlu2 %1189 }
 0xc10   :  { %v3622_v18 = vpop.eup %3621  ;;  %v1194_v9 = vadd.f32 %v1190_v7, %v4391_v16  ;;  %v1197_v16 = vmul.f32 %v1080_v53, %v4113_v40 }
 0xc11   :  { %1203 = vrot.lane.b32.xlu0 %v3622_v18, %s3713_s21 }
 0xc12   :  { %3623 = vtanh.f32 %v1194_v9 }
 0xc17   :  { %v794_v22 = vpop.permute.xlu2 %793 }
 0xc18   :  { %v3624_v23 = vpop.eup %3623  ;;  %v798_v25 = vadd.f32 %v794_v22, %v4241_v6 }
 0xc19   :  { %1205 = vrot.lane.b32.xlu1 %v3624_v23, %s3713_s21  ;;  %791 = vrot.lane.b32.xlu0 %v4378_v44, %s3713_s21  ;;  %v1200_v44 = vsub.f32 1.0, %v4394_v39 }
 0xc1a   :  { %3625 = vtanh.f32 %v798_v25 }
 0xc20   :  { %v3626_v58 = vpop.eup %3625 }
 0xc21   :  { %809 = vrot.lane.b32.xlu1 %v3626_v58, %s3713_s21 }
 0xc83   :  { %v1204_v62 = vpop.permute.xlu0 %1203 }
 0xc84   :  { %v1209_v26 = vmul.f32 %v1204_v62, %v1199_v13 }
 0xc86   :  { %v4430_v27 = vadd.f32 %v1209_v26, %v1197_v16 }
 0xc88   :  { %1832 = vst.msk [vmem:[#allocation3] sm:$0xff] %vm5291_vm14, %v4430_v27  ;;  %v1213_v6 = vmax.f32 %v4430_v27, 0.0 }
 0xc8a   :  { %3423 = vmatmul.msk.f32.vlgmr.msra.gmra.mxu0 %vm5291_vm14, %v1213_v6 }
 0xc8b   :  { %v1206_v24 = vpop.permute.xlu1 %1205  ;;  %v792_v42 = vpop.permute.xlu0 %791 }
 0xc8c   :  { %v1210_v59 = vmul.f32 %v1206_v24, %v1200_v44  ;;  %v797_v40 = vadd.f32 %v792_v42, %v4238_v11 }
 0xc8e   :  { %v4440_v14 = vadd.f32 %v1210_v59, %v1198_v57  ;;  %3627 = vtanh.f32 %v797_v40 }
 0xc90   :  { %1833 = vst.msk [vmem:[#allocation3 + $0x8] sm:$0xff] %vm5291_vm14, %v4440_v14  ;;  %v1214_v33 = vmax.f32 %v4440_v14, 0.0 }
 0xc92   :  { %3424 = vmatmul.msk.f32.gmra.mxu0 %vm5291_vm14, %v1214_v33 }
 0xc93   :  { %v810_v1 = vpop.permute.xlu1 %809 }
 0xc94   :  { %v3628_v3 = vpop.eup %3627  ;;  %v814_v39 = vmul.f32 %v810_v1, %v804_v31 }
 0xc95   :  { %807 = vrot.lane.b32.xlu2 %v3628_v3, %s3713_s21 }
 0xc96   :  { %v4450_v11 = vadd.f32 %v814_v39, %v802_v15 }
 0xc98   :  { %1288 = vst.msk [vmem:[#allocation5 + $0x8] sm:$0xff] %vm5291_vm14, %v4450_v11  ;;  %1303 = vmatpush.msra.mxu3 %v4450_v11 }
 0xcef   :  { %v808_v51 = vpop.permute.xlu2 %807 }
 0xcf0   :  { %v813_v53 = vmul.f32 %v808_v51, %v803_v50 }
 0xcf2   :  { %v4458_v54 = vadd.f32 %v813_v53, %v801_v52 }
 0xcf4   :  { %1287 = vst.msk [vmem:[#allocation5] sm:$0xff] %vm5291_vm14, %v4458_v54  ;;  %1304 = vmatpush.msra.mxu3 %v4458_v54 }
 0xcf5   :  { %3427 = vmatmul.msk.f32.vlgmr.msra.gmra.mxu3 %vm71_vm0, %v4261_v17 }
 0xcf6   :  { %1515 = vmatpush.msrb.mxu3 %v4297_v45 }
 0xcf8   :  { %1516 = vmatpush.msrb.mxu3 %v4302_v29 }
 0xcfa   :  { %1517 = vmatpush.msrb.mxu3 %v4312_v21 }
 0xcfc   :  { %1518 = vmatpush.msrb.mxu3 %v4317_v30 }
 0xcfd   :  { %3428 = vmatmul.msk.f32.gmra.mxu3 %vm71_vm0, %v4270_v48 }
 0xcfe   :  { %1519 = vmatpush.msrb.mxu3 %v4325_v32 }
 0xd00   :  { %1520 = vmatpush.msrb.mxu3 %v4330_v35 }
 0xd02   :  { %1521 = vmatpush.msrb.mxu3 %v4336_v37 }
 0xd04   :  { %1522 = vmatpush.msrb.mxu3 %v4342_v38 }
 0xd07   :  { %v1246_v61 = vpop.f32.mrf.mxu0 }
 0xd08   :  { %v1247_v2 = vadd.f32 %v3560_v60, %v1246_v61 }
 0xd0a   :  { %1252 = vst.msk [vmem:[#allocation4] sm:$0xff] %vm5289_vm1, %v1247_v2 }
 0xd0f   :  { %v1249_v41 = vpop.f32.mrf.mxu0 }
 0xd10   :  { %v1250_v45 = vadd.f32 %v3560_v60, %v1249_v41 }
 0xd12   :  { %1253 = vst.msk [vmem:[#allocation4 + $0x8] sm:$0xff] %vm5289_vm1, %v1250_v45  ;;  %1268 = vmatpush.msrb.mxu1 %v1250_v45 }
 0xd14   :  { %1269 = vmatpush.msrb.mxu1 %v1247_v2 }
 0xd15   :  { %3425 = vmatmul.msk.f32.vlgmr.msrb.gmra.mxu1 %vm71_vm0, %v4261_v17 }
 0xd1d   :  { %3426 = vmatmul.msk.f32.gmra.mxu1 %vm71_vm0, %v4270_v48 }
 0xd78   :  { %v1306_v29 = vpop.f32.mrf.mxu3 }
 0xd79   :  { %1314 = vrot.lane.b32.xlu1 %v1306_v29, %s3711_s22 }
 0xd80   :  { %v1309_v30 = vpop.f32.mrf.mxu3 }
 0xd92   :  { %v1271_v21 = vpop.f32.mrf.mxu1 }
 0xd93   :  { %1279 = vrot.lane.b32.xlu0 %v1271_v21, %s3710_s0 }
 0xd9a   :  { %v1274_v32 = vpop.f32.mrf.mxu1 }
 0xd9b   :  { %1281 = vrot.lane.b32.xlu2 %v1274_v32, %s3710_s0  ;;  %1316 = vrot.lane.b32.xlu0 %v1309_v30, %s3711_s22 }
 0xdeb   :  { %v1315_v35 = vpop.permute.xlu1 %1314 }
 0xdec   :  { %1320 = vst.msk [vmem:[#allocation5] sm:$0xff] %vm232_vm15, %v1315_v35 }
 0xdf3   :  { %v1359_v37 = vld [vmem:[#allocation5] sm:$0xff] }
 0xdf4   :  { %3431 = vmatmul.msk.f32.vlgmr.msrb.gmra.mxu0 %vm286_vm3, %v1359_v37 }
 0xdf5   :  { %v1282_v38 = vpop.permute.xlu2 %1281 }
 0xdf6   :  { %1286 = vst.msk [vmem:[#allocation4 + $0x8] sm:$0xff] %vm195_vm2, %v1282_v38 }
 0xdfd   :  { %v1323_v36 = vld [vmem:[#allocation4 + $0x8] sm:$0xff] }
 0xe05   :  { %v1280_v55 = vpop.permute.xlu0 %1279 }
 0xe06   :  { %1285 = vst.msk [vmem:[#allocation4] sm:$0xff] %vm195_vm2, %v1280_v55 }
 0xe0d   :  { %v1317_v56 = vpop.permute.xlu0 %1316  ;;  %v1322_v34 = vld [vmem:[#allocation4] sm:$0xff] }
 0xe0e   :  { %1321 = vst.msk [vmem:[#allocation5 + $0x8] sm:$0xff] %vm232_vm15, %v1317_v56  ;;  %3429 = vmatmul.msk.f32.vlgmr.msra.gmra.mxu2 %vm71_vm0, %v1322_v34  ;;  %v1563_v34 = vld [vmem:[%s5281_s18 + $0x18] sm:$0xff] }
 0xe0f   :  { %1586 = vmatpush.msrb.mxu2 %v1563_v34 }
 0xe15   :  { %v1360_v46 = vld [vmem:[#allocation5 + $0x8] sm:$0xff] }
 0xe16   :  { %3430 = vmatmul.msk.f32.gmra.mxu2 %vm71_vm0, %v1323_v36  ;;  %3432 = vmatmul.msk.f32.gmra.mxu0 %vm286_vm3, %v1360_v46 }
 0xe71   :  { %v1396_v5 = vpop.f32.mrf.mxu0 }
 0xe72   :  { %v1397_v10 = vadd.f32 %v3561_v47, %v1396_v5  ;;  %v1561_v5 = vld [vmem:[%s5281_s18 + $0x8] sm:$0xff] }
 0xe91   :  { %v1353_v8 = vpop.f32.mrf.mxu2 }
 0xe92   :  { %v4502_v12 = vadd.f32 %v3562_v49, %v1353_v8  ;;  %v1560_v8 = vld [vmem:[%s5281_s18] sm:$0xff] }
 0xe93   :  { %v1399_v43 = vpop.f32.mrf.mxu0 }
 0xe94   :  { %v1402_v63 = vadd.f32 %v1397_v10, %v4502_v12  ;;  %v1400_v20 = vadd.f32 %v3561_v47, %v1399_v43 }
 0xe96   :  { %v3433_v19 = vmul.f32 -1.442695, %v1402_v63 }
 0xe98   :  { %3629 = vpow2.f32 %v3433_v19 }
 0xe99   :  { %v1356_v0 = vpop.f32.mrf.mxu2 }
 0xe9a   :  { %v4505_v28 = vadd.f32 %v3562_v49, %v1356_v0  ;;  %v1562_v49 = vld [vmem:[%s5281_s18 + $0x10] sm:$0xff] }
 0xe9b   :  { %1587 = vmatpush.msrb.mxu2 %v1562_v49 }
 0xe9c   :  { %v1403_v7 = vadd.f32 %v1400_v20, %v4505_v28 }
 0xe9d   :  { %1588 = vmatpush.msrb.mxu2 %v1561_v5 }
 0xe9e   :  { %v3630_v18 = vpop.eup %3629  ;;  %v3434_v9 = vmul.f32 -1.442695, %v1403_v7 }
 0xe9f   :  { %v1410_v22 = vadd.f32 1.0, %v3630_v18  ;;  %1589 = vmatpush.msrb.mxu2 %v1560_v8 }
 0xea0   :  { %3631 = vpow2.f32 %v3434_v9 }
 0xea1   :  { %3633 = vrcp.f32 %v1410_v22  ;;  %v1423_v16 = vand.u32 2147483648, %v1410_v22  ;;  %v1421_v6 = vand.u32 2147483647, %v1410_v22  ;;  %vm1417_vm11 = vweird.f32 %v1410_v22 }
 0xea3   :  { %v1424_v42 = vor.u32 1.1754944e-38, %v1423_v16  ;;  %vm1422_vm13 = vcmp.eq.f32.partialorder %v1421_v6, 8.507059e+37 }
 0xea6   :  { %v3632_v23 = vpop.eup %3631 }
 0xea7   :  { %v3634_v25 = vpop.eup %3633  ;;  %v1411_v58 = vadd.f32 1.0, %v3632_v23  ;;  %v3715_v23 = vmov 1  }
 0xea8   :  { %v1413_v13 = vmul.f32 %v3634_v25, %v1410_v22  ;;  %vm1418_vm10 = vweird.f32 %v3634_v25  ;;  %v3714_v22 = vmov 0   ;;  %3548 = vset.pattern.permute.xlu1 %v3715_v23 }
 0xea9   :  { %3635 = vrcp.f32 %v1411_v58  ;;  %vm1419_vm12 = vmor %vm1417_vm11, %vm1418_vm10  ;;  %v1438_v31 = vand.u32 2147483648, %v1411_v58  ;;  %v1436_v3 = vand.u32 2147483647, %v1411_v58  ;;  %vm1432_vm5 = vweird.f32 %v1411_v58  ;;  %3547 = vset.pattern.permute.xlu2 %v3714_v22  ;;  %3546 = vset.pattern.permute.xlu0 %v3714_v22 }
 0xeaa   :  { %v1414_v62 = vsub.f32 1.0, %v1413_v13 }
 0xeab   :  { %v1439_v39 = vor.u32 1.1754944e-38, %v1438_v31  ;;  %vm1437_vm7 = vcmp.eq.f32.partialorder %v1436_v3, 8.507059e+37 }
 0xeac   :  { %v1415_v26 = vmul.f32 %v3634_v25, %v1414_v62  ;;  %v1599_v62 = vlaneseq }
 0xeae   :  { %v1416_v44 = vadd.f32 %v3634_v25, %v1415_v26  ;;  %v1600_v26 = vshrl.u32 %v1599_v62, 7  ;;  %v4578_v6 = vand.u32 127, %v1599_v62 }
 0xeaf   :  { %v3636_v24 = vpop.eup %3635 }
 0xeb0   :  { %v1420_v57 = vsel %vm1419_vm12, %v3634_v25, %v1416_v44  ;;  %v1428_v59 = vmul.f32 %v3636_v24, %v1411_v58  ;;  %vm1433_vm4 = vweird.f32 %v3636_v24  ;;  %vm1609_vm8 = vcmp.eq.s32.totalorder %v4578_v6, %v1600_v26 }
 0xeb1   :  { %v4508_v40 = vsel %vm1422_vm13, %v1424_v42, %v1420_v57  ;;  %vm1434_vm6 = vmor %vm1432_vm5, %vm1433_vm4  ;;  %v3716_v42 = vmov 0.0   ;;  %vm5290_vm9 = vcmp.lt.s32.totalorder %v4578_v6, 16 }
 0xeb2   :  { %1444 = vrot.lane.b32.xlu2 %v4508_v40, %s3712_s1  ;;  %v1429_v33 = vsub.f32 1.0, %v1428_v59  ;;  %v1544_v10 = vsub.f32 1.0, %v4508_v40  ;;  %v1542_v63 = vmul.f32 %v4508_v40, %v4458_v54  ;;  %v4588_v57 = vsel %vm1609_vm8, 1.0, %v3716_v42 }
 0xeb4   :  { %v1430_v1 = vmul.f32 %v3636_v24, %v1429_v33 }
 0xeb6   :  { %v1431_v15 = vadd.f32 %v3636_v24, %v1430_v1 }
 0xeb8   :  { %v1435_v50 = vsel %vm1434_vm6, %v3636_v24, %v1431_v15 }
 0xeb9   :  { %v4512_v51 = vsel %vm1437_vm7, %v1439_v39, %v1435_v50 }
 0xeba   :  { %1446 = vrot.lane.b32.xlu1 %v4512_v51, %s3712_s1  ;;  %v1545_v20 = vsub.f32 1.0, %v4512_v51  ;;  %v1543_v7 = vmul.f32 %v4512_v51, %v4450_v11 }
 0xf0c   :  { %v1445_v52 = vpop.permute.xlu2 %1444 }
 0xf0d   :  { %v1450_v53 = vmul.f32 %v1445_v52, %v4458_v54 }
 0xf0f   :  { %1452 = vst.msk [vmem:[#allocation5] sm:$0xff] %vm5291_vm14, %v1450_v53 }
 0xf2c   :  { %v1447_v60 = vpop.permute.xlu1 %1446 }
 0xf2d   :  { %v1451_v61 = vmul.f32 %v1447_v60, %v4450_v11  ;;  %v3564_v11 = vld [vmem:[%s5282_s19] ss:$0 sm:$0xff] }
 0xf2f   :  { %1453 = vst.msk [vmem:[#allocation5 + $0x8] sm:$0xff] %vm5291_vm14, %v1451_v61  ;;  %1468 = vmatpush.msra.mxu1 %v1451_v61 }
 0xf31   :  { %1469 = vmatpush.msra.mxu1 %v1450_v53 }
 0xf32   :  { %3435 = vmatmul.msk.f32.vlgmr.msra.gmra.mxu1 %vm71_vm0, %v4261_v17  ;;  %v3563_v17 = vld [vmem:[%s5280_s17] ss:$0 sm:$0xff] }
 0xf3a   :  { %3436 = vmatmul.msk.f32.gmra.mxu1 %vm71_vm0, %v4270_v48 }
 0xfaf   :  { %v1471_v2 = vpop.f32.mrf.mxu1 }
 0xfb0   :  { %1479 = vrot.lane.b32.xlu0 %v1471_v2, %s3711_s22 }
 0xfb7   :  { %v1474_v41 = vpop.f32.mrf.mxu1 }
 0xfb8   :  { %1481 = vrot.lane.b32.xlu1 %v1474_v41, %s3711_s22 }
0x1022   :  { %v1480_v45 = vpop.permute.xlu0 %1479 }
0x1023   :  { %1485 = vst.msk [vmem:[#allocation5] sm:$0xff] %vm232_vm15, %v1480_v45 }
0x102a   :  { %v1482_v29 = vpop.permute.xlu1 %1481  ;;  %v1487_v21 = vld [vmem:[#allocation5] sm:$0xff] }
0x102b   :  { %1486 = vst.msk [vmem:[#allocation5 + $0x8] sm:$0xff] %vm232_vm15, %v1482_v29  ;;  %3437 = vmatmul.msk.f32.vlgmr.msrb.gmra.mxu3 %vm286_vm3, %v1487_v21 }
0x1032   :  { %v1488_v30 = vld [vmem:[#allocation5 + $0x8] sm:$0xff] }
0x1033   :  { %3438 = vmatmul.msk.f32.gmra.mxu3 %vm286_vm3, %v1488_v30 }
0x10ae   :  { %v1524_v48 = vpop.f32.mrf.mxu3 }
0x10af   :  { %v1525_v32 = vadd.f32 %v3563_v17, %v1524_v48 }
0x10b1   :  { %1532 = vrot.lane.b32.xlu2 %v1525_v32, %s3713_s21 }
0x10b6   :  { %v1527_v35 = vpop.f32.mrf.mxu3 }
0x10b7   :  { %v1528_v37 = vadd.f32 %v3563_v17, %v1527_v35 }
0x10b9   :  { %1534 = vrot.lane.b32.xlu0 %v1528_v37, %s3713_s21 }
0x110b   :  { %v1533_v38 = vpop.permute.xlu2 %1532 }
0x110c   :  { %v1538_v55 = vadd.f32 %v1533_v38, %v4502_v12 }
0x110e   :  { %3637 = vtanh.f32 %v1538_v55 }
0x1114   :  { %v3638_v56 = vpop.eup %3637 }
0x1115   :  { %1548 = vrot.lane.b32.xlu1 %v3638_v56, %s3713_s21 }
0x112b   :  { %v1535_v36 = vpop.permute.xlu0 %1534 }
0x112c   :  { %v1539_v46 = vadd.f32 %v1535_v36, %v4505_v28 }
0x112e   :  { %3639 = vtanh.f32 %v1539_v46 }
0x1134   :  { %v3640_v47 = vpop.eup %3639 }
0x1135   :  { %1550 = vrot.lane.b32.xlu2 %v3640_v47, %s3713_s21 }
0x1187   :  { %v1549_v12 = vpop.permute.xlu1 %1548 }
0x1188   :  { %v1554_v19 = vmul.f32 %v1549_v12, %v1544_v10 }
0x118a   :  { %v4554_v43 = vadd.f32 %v1554_v19, %v1542_v63 }
0x118c   :  { %2177 = vst.msk [vmem:[#allocation5] sm:$0xff] %vm5291_vm14, %v4554_v43  ;;  %v1558_v0 = vmax.f32 %v4554_v43, 0.0 }
0x118e   :  { %3439 = vmatmul.msk.f32.vlgmr.msrb.gmra.mxu2 %vm5291_vm14, %v1558_v0 }
0x118f   :  { %v1551_v28 = vpop.permute.xlu2 %1550 }
0x1190   :  { %v1555_v18 = vmul.f32 %v1551_v28, %v1545_v20 }
0x1192   :  { %v4563_v9 = vadd.f32 %v1555_v18, %v1543_v7 }
0x1194   :  { %2178 = vst.msk [vmem:[#allocation5 + $0x8] sm:$0xff] %vm5291_vm14, %v4563_v9  ;;  %v1559_v54 = vmax.f32 %v4563_v9, 0.0 }
0x1196   :  { %3440 = vmatmul.msk.f32.gmra.mxu2 %vm5291_vm14, %v1559_v54 }
0x1211   :  { %v1591_v25 = vpop.f32.mrf.mxu2 }
0x1212   :  { %v1592_v58 = vadd.f32 %v3564_v11, %v1591_v25 }
0x1214   :  { %1597 = vst.msk [vmem:[%s5283_s20] sm:$0xff] %vm5289_vm1, %v1592_v58  ;;  %v1643_v13 = vmul.f32 100.0, %v1592_v58 }
0x1215   :  { %1791 = vst.msk [vmem:[#allocation2] sm:$0xff] %vm5289_vm1, %v1592_v58 }
0x1216   :  { %1649 = vperm.xlu2 %3547, %v1643_v13  }
0x1219   :  { %v1594_v16 = vpop.f32.mrf.mxu2 }
0x121a   :  { %v1595_v44 = vadd.f32 %v3564_v11, %v1594_v16 }
0x121c   :  { %1598 = vst.msk [vmem:[%s5283_s20 + $0x8] sm:$0xff] %vm5289_vm1, %v1595_v44  ;;  %3442 = vmatpush.xpose.msk.msra.mxu0 %vm5289_vm1, %v1595_v44  ;;  %1813 = vmatpush.msra.mxu3 %v1595_v44  ;;  %v1644_v24 = vmul.f32 100.0, %v1595_v44 }
0x121d   :  { %1792 = vst.msk [vmem:[#allocation2 + $0x8] sm:$0xff] %vm5289_vm1, %v1595_v44 }
0x121e   :  { %1665 = vperm.xlu1 %3548, %v1644_v24   ;;  %1654 = vperm.xlu0 %3546, %v1644_v24  }
0x121f   :  { %1814 = vmatpush.msra.mxu3 %v1592_v58 }
0x1220   :  { %3443 = vmatpush.xpose.msk.msra.mxu0 %vm5289_vm1, %v1592_v58 }
0x1223   :  { %3444 = vmatmul.msk.f32.vlgmr.msra.gmra.mxu0 %vm5289_vm1, %v4588_v57 }
0x1224   :  { %1848 = vmatpush.msrb.mxu0 %v4440_v14 }
0x1226   :  { %1849 = vmatpush.msrb.mxu0 %v4430_v27  ;;  %1661 = vperm.xlu1 %3548, %v1643_v13  }
0x1270   :  { %v1650_v31 = vpop.permute.xlu2 %1649 }
0x1290   :  { %v1666_v59 = vpop.permute.xlu1 %1665  ;;  %v1655_v15 = vpop.permute.xlu0 %1654 }
0x1298   :  { %v1662_v39 = vpop.permute.xlu1 %1661 }
0x12a0   :  { %v1638_v40 = vpop.f32.mrf.mxu0 }
0x12a1   :  { %v1641_v33 = vmul.f32 100.0, %v1638_v40 }
0x12a3   :  { %v1657_v1 = vperm.slane %v1641_v33, 0  ;;  %v1668_v3 = vperm.slane %v1641_v33, 1 }
0x12a5   :  { %v1658_v50 = vsub.f32 %v1650_v31, %v1657_v1  ;;  %v1659_v51 = vsub.f32 %v1655_v15, %v1657_v1  ;;  %v1669_v52 = vsub.f32 %v1662_v39, %v1668_v3  ;;  %v1670_v53 = vsub.f32 %v1666_v59, %v1668_v3 }
0x12a7   :  { %v1671_v60 = vmul.f32 %v1658_v50, %v1658_v50  ;;  %v1672_v61 = vmul.f32 %v1659_v51, %v1659_v51  ;;  %v1673_v2 = vmul.f32 %v1669_v52, %v1669_v52  ;;  %v1674_v41 = vmul.f32 %v1670_v53, %v1670_v53 }
0x12a9   :  { %v1675_v45 = vadd.f32 %v1673_v2, %v1671_v60  ;;  %v1676_v29 = vadd.f32 %v1674_v41, %v1672_v61 }
0x12ab   :  { %3641 = vrsqrt.f32 %v1676_v29  ;;  %vm1696_vm10 = vcmp.eq.f32.partialorder %v1676_v29, inf  ;;  %v1699_v47 = vand.u32 2147483648, %v1676_v29  ;;  %vm1698_vm11 = vcmp.eq.f32.partialorder %v1676_v29, 0.0 }
0x12ac   :  { %3643 = vrsqrt.f32 %v1675_v45  ;;  %vm1684_vm12 = vcmp.eq.f32.partialorder %v1675_v45, inf  ;;  %v1687_v8 = vand.u32 2147483648, %v1675_v45  ;;  %vm1686_vm13 = vcmp.eq.f32.partialorder %v1675_v45, 0.0 }
0x12b1   :  { %v3642_v21 = vpop.eup %3641 }
0x12b2   :  { %v3644_v30 = vpop.eup %3643  ;;  %v1690_v17 = vmul.f32 %v3642_v21, %v1676_v29 }
0x12b3   :  { %v1678_v48 = vmul.f32 %v3644_v30, %v1675_v45 }
0x12b4   :  { %v1691_v32 = vmul.f32 %v3642_v21, %v1690_v17 }
0x12b5   :  { %v1679_v35 = vmul.f32 %v3644_v30, %v1678_v48 }
0x12b6   :  { %v1692_v37 = vmul.f32 0.5, %v1691_v32 }
0x12b7   :  { %v1680_v38 = vmul.f32 0.5, %v1679_v35 }
0x12b8   :  { %v1693_v55 = vsub.f32 1.5, %v1692_v37 }
0x12b9   :  { %v1681_v56 = vsub.f32 1.5, %v1680_v38  ;;  %v4620_v38 = vld [vmem:[%s5300_s25 + $0x38] sm:$0xff] }
0x12ba   :  { %v1694_v34 = vmul.f32 %v3642_v21, %v1693_v55  ;;  %v4625_v55 = vld [vmem:[%s5300_s25 + $0x30] sm:$0xff]  ;;  %1932 = vmatpush.msra.mxu2 %v4620_v38 }
0x12bb   :  { %v1682_v36 = vmul.f32 %v3644_v30, %v1681_v56  ;;  %v4631_v56 = vld [vmem:[%s5300_s25 + $0x28] sm:$0xff] }
0x12bc   :  { %v1695_v46 = vmul.f32 %v1694_v34, %v1676_v29  ;;  %1933 = vmatpush.msra.mxu2 %v4625_v55  ;;  %v4637_v34 = vld [vmem:[%s5300_s25 + $0x20] sm:$0xff] }
0x12bd   :  { %v1683_v49 = vmul.f32 %v1682_v36, %v1675_v45 }
0x12be   :  { %v1697_v5 = vsel %vm1696_vm10, %v1676_v29, %v1695_v46  ;;  %1934 = vmatpush.msra.mxu2 %v4631_v56 }
0x12bf   :  { %v1700_v10 = vsel %vm1698_vm11, %v1699_v47, %v1697_v5  ;;  %v1685_v12 = vsel %vm1684_vm12, %v1675_v45, %v1683_v49  ;;  %v4648_v5 = vld [vmem:[%s5300_s25 + $0x18] sm:$0xff] }
0x12c0   :  { %vm1702_vm4 = vcmp.lt.f32.partialorder %v1700_v10, 40.0  ;;  %vm1706_vm5 = vcmp.gt.f32.partialorder %v1700_v10, 0.0  ;;  %v1710_v63 = vmul.f32 0.02, %v1700_v10  ;;  %v1688_v19 = vsel %vm1686_vm13, %v1687_v8, %v1685_v12  ;;  %1935 = vmatpush.msra.mxu2 %v4637_v34  ;;  %v4653_v8 = vld [vmem:[%s5300_s25 + $0x10] sm:$0xff]  ;;  %v4659_v10 = vld [vmem:[%s5300_s25 + $0x8] sm:$0xff] }
0x12c1   :  { %vm1704_vm6 = vmand %vm5290_vm9, %vm1702_vm4  ;;  %vm1701_vm7 = vcmp.lt.f32.partialorder %v1688_v19, 40.0  ;;  %vm1705_vm8 = vcmp.gt.f32.partialorder %v1688_v19, 0.0  ;;  %v1709_v0 = vmul.f32 0.02, %v1688_v19  ;;  %v4665_v12 = vld [vmem:[%s5300_s25] sm:$0xff] }
0x12c2   :  { %vm1708_vm1 = vmand %vm1704_vm6, %vm1706_vm5  ;;  %1936 = vmatpush.msra.mxu2 %v4648_v5  ;;  %v4677_v19 = vld [vmem:[%s5268_s4] sm:$0xff] }
0x12c3   :  { %v1712_v20 = vsel %vm1708_vm1, %v1710_v63, 0.0  ;;  %vm1703_vm10 = vmand %vm5290_vm9, %vm1701_vm7  ;;  %v4672_v63 = vld [vmem:[%s5268_s4 + $0x8] sm:$0xff] }
0x12c4   :  { %3445 = vmatpush.xpose.msk.msrb.mxu1 %vm71_vm0, %v1712_v20  ;;  %v1716_v28 = vsel %vm71_vm0, %v1712_v20, 0.0  ;;  %vm1707_vm11 = vmand %vm1703_vm10, %vm1705_vm8  ;;  %1937 = vmatpush.msra.mxu2 %v4653_v8 }
0x12c5   :  { %1717 = vadd.xlane.f32.xlu0 %v1716_v28  ;;  %v1711_v7 = vsel %vm1707_vm11, %v1709_v0, 0.0 }
0x12c6   :  { %v1713_v18 = vsel %vm71_vm0, %v1711_v7, 0.0  ;;  %1938 = vmatpush.msra.mxu2 %v4659_v10 }
0x12c7   :  { %1714 = vadd.xlane.f32.xlu2 %v1713_v18 }
0x12c8   :  { %3446 = vmatpush.xpose.msk.msrb.mxu1 %vm71_vm0, %v1711_v7  ;;  %1939 = vmatpush.msra.mxu2 %v4665_v12 }
0x12cb   :  { %3447 = vmatmul.msk.f32.vlgmr.msrb.gmra.mxu1 %vm71_vm0, %v3709_v4 }
0x12cc   :  { %1895 = vmatpush.msra.mxu1 %v4672_v63 }
0x12ce   :  { %1896 = vmatpush.msra.mxu1 %v4677_v19 }
0x1338   :  { %v1718_v54 = vpop.xlane.xlu0 %1717 }
0x1339   :  { %v1748_v25 = vmax.f32 %v1718_v54, 1e-12  ;;  %vm1746_vm14 = vcmp.gt.f32.partialorder %v1718_v54, 0.0 }
0x133a   :  { %v1715_v22 = vpop.xlane.xlu2 %1714 }
0x133b   :  { %v1747_v11 = vmax.f32 %v1715_v22, 1e-12  ;;  %vm1745_vm5 = vcmp.gt.f32.partialorder %v1715_v22, 0.0  ;;  %vm1765_vm10 = vweird.f32 %v1748_v25 }
0x133d   :  { %3645 = vrsqrt.f32 %v1747_v11  ;;  %vm1755_vm12 = vweird.f32 %v1747_v11 }
0x133e   :  { %3647 = vrsqrt.f32 %v1748_v25 }
0x1343   :  { %v3646_v58 = vpop.eup %3645 }
0x1344   :  { %v1750_v13 = vmul.f32 %v3646_v58, %v1747_v11  ;;  %v3648_v62 = vpop.eup %3647  ;;  %vm1756_vm1 = vweird.f32 %v3646_v58 }
0x1345   :  { %v1760_v24 = vmul.f32 %v3648_v62, %v1748_v25  ;;  %vm1757_vm13 = vmor %vm1755_vm12, %vm1756_vm1  ;;  %vm1766_vm6 = vweird.f32 %v3648_v62  ;;  %v3565_v25 = vld [vmem:[%s5301_s5] ss:$0 sm:$0xff] }
0x1346   :  { %v1751_v16 = vmul.f32 %v3646_v58, %v1750_v13  ;;  %vm1767_vm9 = vmor %vm1765_vm10, %vm1766_vm6 }
0x1347   :  { %v1761_v59 = vmul.f32 %v3648_v62, %v1760_v24 }
0x1348   :  { %v1742_v26 = vpop.f32.mrf.mxu1  ;;  %v1752_v42 = vmul.f32 0.5, %v1751_v16 }
0x1349   :  { %v1772_v44 = vmax.f32 %v1742_v26, 1e-12  ;;  %v1762_v31 = vmul.f32 0.5, %v1761_v59  ;;  %vm1771_vm11 = vcmp.gt.f32.partialorder %v1742_v26, 0.0 }
0x134a   :  { %v1753_v40 = vsub.f32 1.5, %v1752_v42 }
0x134b   :  { %3649 = vrsqrt.f32 %v1772_v44  ;;  %v1763_v39 = vsub.f32 1.5, %v1762_v31  ;;  %vm1779_vm7 = vweird.f32 %v1772_v44 }
0x134c   :  { %v1754_v3 = vmul.f32 %v3646_v58, %v1753_v40 }
0x134d   :  { %v1764_v53 = vmul.f32 %v3648_v62, %v1763_v39 }
0x134e   :  { %v1758_v51 = vsel %vm1757_vm13, %v3646_v58, %v1754_v3  ;;  %v3566_v58 = vld [vmem:[%s5270_s7] ss:$0 sm:$0xff] }
0x134f   :  { %v1769_v61 = vsel %vm1745_vm5, %v1758_v51, 0.0  ;;  %v1768_v45 = vsel %vm1767_vm9, %v3648_v62, %v1764_v53 }
0x1350   :  { %v1784_v29 = vmul.f32 %v1769_v61, %v1711_v7  ;;  %v1770_v17 = vsel %vm1746_vm14, %v1768_v45, 0.0 }
0x1351   :  { %v3650_v33 = vpop.eup %3649  ;;  %v1785_v32 = vmul.f32 %v1770_v17, %v1712_v20 }
0x1352   :  { %v1774_v1 = vmul.f32 %v3650_v33, %v1772_v44  ;;  %vm1780_vm4 = vweird.f32 %v3650_v33 }
0x1353   :  { %vm1781_vm8 = vmor %vm1779_vm7, %vm1780_vm4  ;;  %vm5302_vm7 = vcmask 261120  }
0x1354   :  { %v1775_v15 = vmul.f32 %v3650_v33, %v1774_v1  ;;  %vm5304_vm10 = vmmov %vm5302_vm7 }
0x1356   :  { %v1776_v50 = vmul.f32 0.5, %v1775_v15 }
0x1358   :  { %v1777_v52 = vsub.f32 1.5, %v1776_v50 }
0x135a   :  { %v1778_v60 = vmul.f32 %v3650_v33, %v1777_v52 }
0x135c   :  { %v1782_v2 = vsel %vm1781_vm8, %v3650_v33, %v1778_v60  ;;  %vm5303_vm8 = vmmov %vm5302_vm7 }
0x135d   :  { %v1783_v41 = vsel %vm1771_vm11, %v1782_v2, 0.0  ;;  %vm5305_vm11 = vmmov %vm5302_vm7 }
0x135e   :  { %v1786_v21 = vperm.slane %v1783_v41, 0 }
0x1360   :  { %v1787_v30 = vmul.f32 %v1786_v21, %v1784_v29  ;;  %v1788_v35 = vmul.f32 %v1786_v21, %v1785_v32 }
0x1362   :  { %v4605_v48 = vsub.f32 0.0, %v1787_v30  ;;  %v4611_v37 = vsub.f32 0.0, %v1788_v35 }
0x1364   :  { %3448 = vmatmul.msk.f32.vlgmr.msra.gmra.mxu3 %vm71_vm0, %v4605_v48  ;;  %3450 = vmatmul.msk.f32.vlgmr.msrb.gmra.mxu0 %vm71_vm0, %v4605_v48 }
0x136c   :  { %3449 = vmatmul.msk.f32.gmra.mxu3 %vm71_vm0, %v4611_v37  ;;  %3451 = vmatmul.msk.f32.gmra.mxu0 %vm71_vm0, %v4611_v37 }
0x13e1   :  { %v1851_v36 = vpop.f32.mrf.mxu0 }
0x13e2   :  { %1859 = vrot.lane.b32.xlu1 %v1851_v36, %s3711_s22 }
0x13e7   :  { %v1816_v46 = vpop.f32.mrf.mxu3 }
0x13e9   :  { %v1854_v47 = vpop.f32.mrf.mxu0 }
0x13ea   :  { %1824 = vrot.lane.b32.xlu1 %v1816_v46, %s3710_s0 }
0x13ef   :  { %v1819_v49 = vpop.f32.mrf.mxu3 }
0x13f2   :  { %1861 = vrot.lane.b32.xlu1 %v1854_v47, %s3711_s22 }
0x13fa   :  { %1826 = vrot.lane.b32.xlu1 %v1819_v49, %s3710_s0 }
0x1454   :  { %v1860_v0 = vpop.permute.xlu1 %1859 }
0x1455   :  { %1865 = vst.msk [vmem:[#allocation3] sm:$0xff] %vm232_vm15, %v1860_v0 }
0x145c   :  { %v1825_v20 = vpop.permute.xlu1 %1824  ;;  %v1904_v28 = vld [vmem:[#allocation3] sm:$0xff] }
0x145d   :  { %1830 = vst.msk [vmem:[#allocation2] sm:$0xff] %vm195_vm2, %v1825_v20  ;;  %3454 = vmatmul.msk.f32.vlgmr.msra.gmra.mxu2 %vm286_vm3, %v1904_v28 }
0x1464   :  { %v1862_v7 = vpop.permute.xlu1 %1861  ;;  %v1867_v18 = vld [vmem:[#allocation2] sm:$0xff] }
0x1465   :  { %1866 = vst.msk [vmem:[#allocation3 + $0x8] sm:$0xff] %vm232_vm15, %v1862_v7  ;;  %3452 = vmatmul.msk.f32.vlgmr.msra.gmra.mxu1 %vm71_vm0, %v1867_v18 }
0x146c   :  { %v1827_v54 = vpop.permute.xlu1 %1826  ;;  %v1905_v22 = vld [vmem:[#allocation3 + $0x8] sm:$0xff] }
0x146d   :  { %1831 = vst.msk [vmem:[#allocation2 + $0x8] sm:$0xff] %vm195_vm2, %v1827_v54  ;;  %3455 = vmatmul.msk.f32.gmra.mxu2 %vm286_vm3, %v1905_v22  ;;  %v4726_v22 = vld [vmem:[%s5271_s6 + $0x38] sm:$0xff] }
0x146e   :  { %2060 = vmatpush.msra.mxu0 %v4726_v22 }
0x1474   :  { %v1868_v11 = vld [vmem:[#allocation2 + $0x8] sm:$0xff] }
0x1475   :  { %3453 = vmatmul.msk.f32.gmra.mxu1 %vm71_vm0, %v1868_v11  ;;  %v4731_v11 = vld [vmem:[%s5271_s6 + $0x30] sm:$0xff] }
0x1476   :  { %2061 = vmatpush.msra.mxu0 %v4731_v11 }
0x14e0   :  { %v1941_v13 = vpop.f32.mrf.mxu2 }
0x14e1   :  { %v1942_v16 = vadd.f32 %v3565_v25, %v1941_v13 }
0x14e2   :  { %v1898_v62 = vpop.f32.mrf.mxu1 }
0x14e3   :  { %v4695_v26 = vadd.f32 %v3566_v58, %v1898_v62 }
0x14e5   :  { %v1947_v44 = vadd.f32 %v1942_v16, %v4695_v26  ;;  %v4752_v16 = vld [vmem:[%s5271_s6 + $0x18] sm:$0xff] }
0x14e7   :  { %v3456_v24 = vmul.f32 -1.442695, %v1947_v44  ;;  %v4757_v44 = vld [vmem:[%s5271_s6 + $0x10] sm:$0xff] }
0x14e9   :  { %3651 = vpow2.f32 %v3456_v24  ;;  %v4763_v24 = vld [vmem:[%s5271_s6 + $0x8] sm:$0xff] }
0x14ef   :  { %v3652_v42 = vpop.eup %3651 }
0x14f0   :  { %v1955_v59 = vadd.f32 1.0, %v3652_v42  ;;  %v1944_v40 = vpop.f32.mrf.mxu2  ;;  %v4769_v42 = vld [vmem:[%s5271_s6] sm:$0xff] }
0x14f1   :  { %v1945_v31 = vadd.f32 %v3565_v25, %v1944_v40  ;;  %v4737_v25 = vld [vmem:[%s5271_s6 + $0x28] sm:$0xff] }
0x14f2   :  { %3653 = vrcp.f32 %v1955_v59  ;;  %v1901_v33 = vpop.f32.mrf.mxu1  ;;  %v1968_v52 = vand.u32 2147483648, %v1955_v59  ;;  %v1966_v60 = vand.u32 2147483647, %v1955_v59  ;;  %vm1962_vm9 = vweird.f32 %v1955_v59  ;;  %2062 = vmatpush.msra.mxu0 %v4737_v25 }
0x14f3   :  { %v4698_v1 = vadd.f32 %v3566_v58, %v1901_v33  ;;  %v4743_v58 = vld [vmem:[%s5271_s6 + $0x20] sm:$0xff] }
0x14f4   :  { %v1969_v45 = vor.u32 1.1754944e-38, %v1968_v52  ;;  %vm1967_vm12 = vcmp.eq.f32.partialorder %v1966_v60, 8.507059e+37  ;;  %2063 = vmatpush.msra.mxu0 %v4743_v58 }
0x14f5   :  { %v1948_v3 = vadd.f32 %v1945_v31, %v4698_v1 }
0x14f6   :  { %2064 = vmatpush.msra.mxu0 %v4752_v16 }
0x14f7   :  { %v3457_v15 = vmul.f32 -1.442695, %v1948_v3  ;;  %v3567_v3 = vld [vmem:[%s5272_s9] ss:$0 sm:$0xff] }
0x14f8   :  { %v3654_v39 = vpop.eup %3653  ;;  %2065 = vmatpush.msra.mxu0 %v4757_v44 }
0x14f9   :  { %3655 = vpow2.f32 %v3457_v15  ;;  %v1958_v50 = vmul.f32 %v3654_v39, %v1955_v59  ;;  %vm1963_vm14 = vweird.f32 %v3654_v39 }
0x14fa   :  { %vm1964_vm1 = vmor %vm1962_vm9, %vm1963_vm14  ;;  %2066 = vmatpush.msra.mxu0 %v4763_v24 }
0x14fb   :  { %v1959_v51 = vsub.f32 1.0, %v1958_v50  ;;  %vm5306_vm14 = vmmov %vm5302_vm7 }
0x14fc   :  { %2067 = vmatpush.msra.mxu0 %v4769_v42  ;;  %vm5307_vm9 = vmmov %vm5302_vm7 }
0x14fd   :  { %v1960_v53 = vmul.f32 %v3654_v39, %v1959_v51 }
0x14ff   :  { %v3656_v61 = vpop.eup %3655  ;;  %v1961_v2 = vadd.f32 %v3654_v39, %v1960_v53 }
0x1500   :  { %v1956_v41 = vadd.f32 1.0, %v3656_v61 }
0x1501   :  { %v1965_v29 = vsel %vm1964_vm1, %v3654_v39, %v1961_v2  ;;  %vm5308_vm1 = vcmask 64512  }
0x1502   :  { %3657 = vrcp.f32 %v1956_v41  ;;  %v4701_v21 = vsel %vm1967_vm12, %v1969_v45, %v1965_v29  ;;  %v1983_v35 = vand.u32 2147483648, %v1956_v41  ;;  %v1981_v46 = vand.u32 2147483647, %v1956_v41  ;;  %v4794_v29 = vld [vmem:[%s5273_s10 + $0x18] sm:$0xff]  ;;  %vm5309_vm12 = vmmov %vm5308_vm1 }
0x1503   :  { %1989 = vrot.lane.b32.xlu2 %v4701_v21, %s3712_s1  ;;  %vm1977_vm4 = vweird.f32 %v1956_v41  ;;  %2131 = vmatpush.msrb.mxu1 %v4794_v29 }
0x1504   :  { %v1984_v49 = vor.u32 1.1754944e-38, %v1983_v35  ;;  %vm1982_vm6 = vcmp.eq.f32.partialorder %v1981_v46, 8.507059e+37  ;;  %v4829_v35 = vld [vmem:[%s5275_s13 + $0x28] sm:$0xff]  ;;  %v4842_v46 = vld [vmem:[%s5275_s13 + $0x18] sm:$0xff] }
0x1508   :  { %v3658_v30 = vpop.eup %3657 }
0x1509   :  { %v1973_v17 = vmul.f32 %v3658_v30, %v1956_v41  ;;  %vm1978_vm13 = vweird.f32 %v3658_v30 }
0x150a   :  { %vm1979_vm5 = vmor %vm1977_vm4, %vm1978_vm13 }
0x150b   :  { %v1974_v32 = vsub.f32 1.0, %v1973_v17  ;;  %v4817_v17 = vld [vmem:[%s5275_s13 + $0x38] sm:$0xff] }
0x150d   :  { %v1975_v36 = vmul.f32 %v3658_v30, %v1974_v32  ;;  %v4824_v32 = vld [vmem:[%s5275_s13 + $0x30] sm:$0xff] }
0x150f   :  { %v1976_v47 = vadd.f32 %v3658_v30, %v1975_v36  ;;  %v4835_v36 = vld [vmem:[%s5275_s13 + $0x20] sm:$0xff] }
0x1511   :  { %v1980_v0 = vsel %vm1979_vm5, %v3658_v30, %v1976_v47  ;;  %v4811_v30 = vld [vmem:[%s5273_s10] sm:$0xff]  ;;  %v4847_v47 = vld [vmem:[%s5275_s13 + $0x10] sm:$0xff] }
0x1512   :  { %v4705_v20 = vsel %vm1982_vm6, %v1984_v49, %v1980_v0  ;;  %v4853_v49 = vld [vmem:[%s5275_s13 + $0x8] sm:$0xff]  ;;  %v4859_v0 = vld [vmem:[%s5275_s13] sm:$0xff] }
0x1513   :  { %1991 = vrot.lane.b32.xlu1 %v4705_v20, %s3712_s1 }
0x155d   :  { %v1990_v28 = vpop.permute.xlu2 %1989 }
0x155e   :  { %v1995_v7 = vmul.f32 %v1990_v28, %v4430_v27  ;;  %v2089_v28 = vsub.f32 1.0, %v4701_v21 }
0x1560   :  { %1997 = vst.msk [vmem:[#allocation3] sm:$0xff] %vm5302_vm7, %v1995_v7 }
0x1585   :  { %v1992_v18 = vpop.permute.xlu1 %1991 }
0x1586   :  { %v1996_v54 = vmul.f32 %v1992_v18, %v4440_v14  ;;  %v2087_v18 = vmul.f32 %v4701_v21, %v4430_v27 }
0x1588   :  { %1998 = vst.msk [vmem:[#allocation3 + $0x8] sm:$0xff] %vm5303_vm8, %v1996_v54  ;;  %2013 = vmatpush.msrb.mxu3 %v1996_v54 }
0x158a   :  { %2014 = vmatpush.msrb.mxu3 %v1995_v7 }
0x158b   :  { %3458 = vmatmul.msk.f32.vlgmr.msrb.gmra.mxu3 %vm71_vm0, %v4605_v48 }
0x158c   :  { %2193 = vmatpush.msra.mxu3 %v4563_v9 }
0x158e   :  { %2194 = vmatpush.msra.mxu3 %v4554_v43 }
0x1593   :  { %3459 = vmatmul.msk.f32.gmra.mxu3 %vm71_vm0, %v4611_v37 }
0x159b   :  { %3466 = vmatmul.msk.f32.vlgmr.msra.gmra.mxu3 %vm71_vm0, %v4605_v48 }
0x15a3   :  { %3467 = vmatmul.msk.f32.gmra.mxu3 %vm71_vm0, %v4611_v37 }
0x160e   :  { %v2016_v13 = vpop.f32.mrf.mxu3 }
0x160f   :  { %2024 = vrot.lane.b32.xlu0 %v2016_v13, %s3711_s22 }
0x1616   :  { %v2019_v62 = vpop.f32.mrf.mxu3 }
0x1617   :  { %2026 = vrot.lane.b32.xlu1 %v2019_v62, %s3711_s22  ;;  %v2090_v62 = vsub.f32 1.0, %v4705_v20 }
0x161e   :  { %v2196_v45 = vpop.f32.mrf.mxu3 }
0x1681   :  { %v2025_v59 = vpop.permute.xlu0 %2024 }
0x1682   :  { %2030 = vst.msk [vmem:[#allocation3] sm:$0xff] %vm232_vm15, %v2025_v59 }
0x1689   :  { %v2027_v40 = vpop.permute.xlu1 %2026  ;;  %v2032_v33 = vld [vmem:[#allocation3] sm:$0xff] }
0x168a   :  { %2031 = vst.msk [vmem:[#allocation3 + $0x8] sm:$0xff] %vm232_vm15, %v2027_v40  ;;  %3460 = vmatmul.msk.f32.vlgmr.msra.gmra.mxu0 %vm286_vm3, %v2032_v33 }
0x168b   :  { %2707 = vst.msk [vmem:[#allocation3] sm:$0xff] %vm5304_vm10, %v4430_v27 }
0x1691   :  { %v2033_v31 = vld [vmem:[#allocation3 + $0x8] sm:$0xff] }
0x1692   :  { %3461 = vmatmul.msk.f32.gmra.mxu0 %vm286_vm3, %v2033_v31  ;;  %2708 = vst.msk [vmem:[#allocation3 + $0x8] sm:$0xff] %vm5305_vm11, %v4440_v14  ;;  %v2088_v31 = vmul.f32 %v4705_v20, %v4440_v14 }
0x1707   :  { %v2069_v15 = vpop.f32.mrf.mxu0 }
0x1708   :  { %v2070_v39 = vadd.f32 %v3567_v3, %v2069_v15 }
0x170a   :  { %2077 = vrot.lane.b32.xlu1 %v2070_v39, %s3713_s21 }
0x170f   :  { %v2072_v50 = vpop.f32.mrf.mxu0 }
0x1710   :  { %v2073_v51 = vadd.f32 %v3567_v3, %v2072_v50  ;;  %v3568_v50 = vld [vmem:[%s5274_s11] ss:$0 sm:$0xff] }
0x1712   :  { %2079 = vrot.lane.b32.xlu0 %v2073_v51, %s3713_s21 }
0x177c   :  { %v2078_v52 = vpop.permute.xlu1 %2077 }
0x177d   :  { %v2083_v53 = vadd.f32 %v2078_v52, %v4695_v26  ;;  %v4800_v26 = vld [vmem:[%s5273_s10 + $0x10] sm:$0xff] }
0x177e   :  { %2132 = vmatpush.msrb.mxu1 %v4800_v26 }
0x177f   :  { %3659 = vtanh.f32 %v2083_v53 }
0x1784   :  { %v2080_v60 = vpop.permute.xlu0 %2079 }
0x1785   :  { %v3660_v61 = vpop.eup %3659  ;;  %v2084_v2 = vadd.f32 %v2080_v60, %v4698_v1  ;;  %v4806_v1 = vld [vmem:[%s5273_s10 + $0x8] sm:$0xff] }
0x1786   :  { %2093 = vrot.lane.b32.xlu1 %v3660_v61, %s3713_s21  ;;  %2133 = vmatpush.msrb.mxu1 %v4806_v1  ;;  %v2199_v61 = vpop.f32.mrf.mxu3 }
0x1787   :  { %3661 = vtanh.f32 %v2084_v2 }
0x1788   :  { %2134 = vmatpush.msrb.mxu1 %v4811_v30 }
0x178a   :  { %2277 = vmatpush.msra.mxu1 %v4817_v17 }
0x178c   :  { %2278 = vmatpush.msra.mxu1 %v4824_v32 }
0x178d   :  { %v3662_v41 = vpop.eup %3661 }
0x178e   :  { %2204 = vrot.lane.b32.xlu1 %v2196_v45, %s3711_s22  ;;  %2095 = vrot.lane.b32.xlu2 %v3662_v41, %s3713_s21  ;;  %v4888_v41 = vld [vmem:[%s5278_s12 + $0x8] sm:$0xff]  ;;  %v4893_v45 = vld [vmem:[%s5278_s12] sm:$0xff] }
0x178f   :  { %2279 = vmatpush.msra.mxu1 %v4829_v35  ;;  %2240 = vmatpush.msrb.mxu0 %v4888_v41 }
0x1791   :  { %2280 = vmatpush.msra.mxu1 %v4835_v36  ;;  %2241 = vmatpush.msrb.mxu0 %v4893_v45 }
0x1793   :  { %2281 = vmatpush.msra.mxu1 %v4842_v46 }
0x1795   :  { %2282 = vmatpush.msra.mxu1 %v4847_v47 }
0x1797   :  { %2283 = vmatpush.msra.mxu1 %v4853_v49 }
0x1799   :  { %2284 = vmatpush.msra.mxu1 %v4859_v0 }
0x17e8   :  { %v2096_v13 = vpop.permute.xlu2 %2095 }
0x17e9   :  { %v2100_v40 = vmul.f32 %v2096_v13, %v2090_v62 }
0x17eb   :  { %v2102_v15 = vadd.f32 %v2100_v40, %v2088_v31  ;;  %v3570_v40 = vld [vmem:[%s5277_s15] ss:$0 sm:$0xff] }
0x17ed   :  { %v2104_v39 = vmax.f32 %v2102_v15, 0.0 }
0x17f8   :  { %v2094_v7 = vpop.permute.xlu1 %2093 }
0x17f9   :  { %v2099_v54 = vmul.f32 %v2094_v7, %v2089_v28 }
0x17fb   :  { %v2101_v59 = vadd.f32 %v2099_v54, %v2087_v18 }
0x17fd   :  { %v2103_v33 = vmax.f32 %v2101_v59, 0.0  ;;  %v3569_v59 = vld [vmem:[%s5276_s16] ss:$0 sm:$0xff] }
0x17ff   :  { %3462 = vmatmul.msk.f32.vlgmr.msrb.gmra.mxu1 %vm5306_vm14, %v2103_v33  ;;  %vm5310_vm14 = vmmov %vm5307_vm9 }
0x1800   :  { %v2205_v3 = vpop.permute.xlu1 %2204 }
0x1801   :  { %2210 = vst.msk [vmem:[#allocation5] sm:$0xff] %vm232_vm15, %v2205_v3 }
0x1807   :  { %3463 = vmatmul.msk.f32.gmra.mxu1 %vm5307_vm9, %v2104_v39 }
0x1808   :  { %v2249_v21 = vld [vmem:[#allocation5] sm:$0xff] }
0x180f   :  { %3470 = vmatmul.msk.f32.vlgmr.msra.gmra.mxu1 %vm286_vm3, %v2249_v21 }
0x187c   :  { %v2136_v51 = vpop.f32.mrf.mxu1 }
0x187d   :  { %v2137_v52 = vadd.f32 %v3568_v50, %v2136_v51 }
0x187f   :  { %2142 = vst.msk [vmem:[#allocation4] sm:$0xff] %vm5308_vm1, %v2137_v52  ;;  %vm5311_vm1 = vmmov %vm5307_vm9 }
0x1884   :  { %v2139_v20 = vpop.f32.mrf.mxu1 }
0x1885   :  { %v2140_v53 = vadd.f32 %v3568_v50, %v2139_v20 }
0x1887   :  { %2143 = vst.msk [vmem:[#allocation4 + $0x8] sm:$0xff] %vm5309_vm12, %v2140_v53  ;;  %2158 = vmatpush.msrb.mxu2 %v2140_v53  ;;  %vm5312_vm12 = vmmov %vm5311_vm1 }
0x1889   :  { %2159 = vmatpush.msrb.mxu2 %v2137_v52 }
0x188a   :  { %3464 = vmatmul.msk.f32.vlgmr.msrb.gmra.mxu2 %vm71_vm0, %v4605_v48 }
0x188c   :  { %v2286_v33 = vpop.f32.mrf.mxu1 }
0x188d   :  { %v2287_v3 = vadd.f32 %v3569_v59, %v2286_v33 }
0x1892   :  { %3465 = vmatmul.msk.f32.gmra.mxu2 %vm71_vm0, %v4611_v37 }
0x190d   :  { %v2161_v60 = vpop.f32.mrf.mxu2 }
0x190e   :  { %2169 = vrot.lane.b32.xlu0 %v2161_v60, %s3710_s0 }
0x1915   :  { %v2164_v2 = vpop.f32.mrf.mxu2 }
0x1916   :  { %2206 = vrot.lane.b32.xlu0 %v2199_v61, %s3711_s22  ;;  %2171 = vrot.lane.b32.xlu2 %v2164_v2, %s3710_s0 }
0x1970   :  { %v2172_v28 = vpop.permute.xlu2 %2171 }
0x1971   :  { %2176 = vst.msk [vmem:[#allocation4 + $0x8] sm:$0xff] %vm195_vm2, %v2172_v28 }
0x1978   :  { %v2213_v13 = vld [vmem:[#allocation4 + $0x8] sm:$0xff] }
0x1980   :  { %v2170_v7 = vpop.permute.xlu0 %2169 }
0x1981   :  { %2175 = vst.msk [vmem:[#allocation4] sm:$0xff] %vm195_vm2, %v2170_v7 }
0x1988   :  { %v2207_v18 = vpop.permute.xlu0 %2206  ;;  %v2212_v54 = vld [vmem:[#allocation4] sm:$0xff] }
0x1989   :  { %2211 = vst.msk [vmem:[#allocation5 + $0x8] sm:$0xff] %vm232_vm15, %v2207_v18  ;;  %3468 = vmatmul.msk.f32.vlgmr.msrb.gmra.mxu0 %vm71_vm0, %v2212_v54 }
0x1990   :  { %v2250_v62 = vld [vmem:[#allocation5 + $0x8] sm:$0xff] }
0x1991   :  { %3469 = vmatmul.msk.f32.gmra.mxu0 %vm71_vm0, %v2213_v13  ;;  %3471 = vmatmul.msk.f32.gmra.mxu1 %vm286_vm3, %v2250_v62 }
0x1a06   :  { %v2243_v31 = vpop.f32.mrf.mxu0 }
0x1a07   :  { %v4909_v15 = vadd.f32 %v3570_v40, %v2243_v31 }
0x1a09   :  { %v2292_v39 = vadd.f32 %v2287_v3, %v4909_v15 }
0x1a0b   :  { %v3472_v21 = vmul.f32 -1.442695, %v2292_v39 }
0x1a0d   :  { %3663 = vpow2.f32 %v3472_v21 }
0x1a0e   :  { %v2246_v50 = vpop.f32.mrf.mxu0  ;;  %v2289_v51 = vpop.f32.mrf.mxu1 }
0x1a0f   :  { %v4912_v52 = vadd.f32 %v3570_v40, %v2246_v50  ;;  %v2290_v20 = vadd.f32 %v3569_v59, %v2289_v51 }
0x1a11   :  { %v2293_v53 = vadd.f32 %v2290_v20, %v4912_v52 }
0x1a13   :  { %v3664_v60 = vpop.eup %3663  ;;  %v3473_v61 = vmul.f32 -1.442695, %v2293_v53 }
0x1a14   :  { %v2300_v2 = vadd.f32 1.0, %v3664_v60 }
0x1a15   :  { %3665 = vpow2.f32 %v3473_v61 }
0x1a16   :  { %3667 = vrcp.f32 %v2300_v2  ;;  %v2313_v62 = vand.u32 2147483648, %v2300_v2  ;;  %v2311_v31 = vand.u32 2147483647, %v2300_v2  ;;  %vm2307_vm4 = vweird.f32 %v2300_v2 }
0x1a18   :  { %v2314_v3 = vor.u32 1.1754944e-38, %v2313_v62  ;;  %vm2312_vm6 = vcmp.eq.f32.partialorder %v2311_v31, 8.507059e+37  ;;  %v4939_v31 = vld [vmem:[%s5279_s14 + $0x30] sm:$0xff] }
0x1a1b   :  { %v3666_v28 = vpop.eup %3665 }
0x1a1c   :  { %v3668_v7 = vpop.eup %3667  ;;  %v2301_v18 = vadd.f32 1.0, %v3666_v28 }
0x1a1d   :  { %v2303_v54 = vmul.f32 %v3668_v7, %v2300_v2  ;;  %vm2308_vm13 = vweird.f32 %v3668_v7 }
0x1a1e   :  { %3669 = vrcp.f32 %v2301_v18  ;;  %vm2309_vm5 = vmor %vm2307_vm4, %vm2308_vm13  ;;  %v2328_v20 = vand.u32 2147483648, %v2301_v18  ;;  %v2326_v60 = vand.u32 2147483647, %v2301_v18  ;;  %vm2322_vm8 = vweird.f32 %v2301_v18 }
0x1a1f   :  { %v2304_v13 = vsub.f32 1.0, %v2303_v54  ;;  %vm5313_vm13 = vmmov %vm5311_vm1 }
0x1a20   :  { %v2329_v2 = vor.u32 1.1754944e-38, %v2328_v20  ;;  %vm2327_vm11 = vcmp.eq.f32.partialorder %v2326_v60, 8.507059e+37  ;;  %vm5314_vm4 = vmmov %vm5311_vm1 }
0x1a21   :  { %v2305_v33 = vmul.f32 %v3668_v7, %v2304_v13 }
0x1a23   :  { %v2306_v40 = vadd.f32 %v3668_v7, %v2305_v33 }
0x1a24   :  { %v3670_v59 = vpop.eup %3669 }
0x1a25   :  { %v2310_v39 = vsel %vm2309_vm5, %v3668_v7, %v2306_v40  ;;  %v2318_v21 = vmul.f32 %v3670_v59, %v2301_v18  ;;  %vm2323_vm7 = vweird.f32 %v3670_v59  ;;  %v4934_v18 = vld [vmem:[%s5279_s14 + $0x38] sm:$0xff]  ;;  %v4945_v40 = vld [vmem:[%s5279_s14 + $0x28] sm:$0xff]  ;;  %vm5315_vm5 = vcmask 64512  }
0x1a26   :  { %v4915_v50 = vsel %vm2312_vm6, %v2314_v3, %v2310_v39  ;;  %vm2324_vm10 = vmor %vm2322_vm8, %vm2323_vm7  ;;  %2405 = vmatpush.msrb.mxu3 %v4934_v18  ;;  %v4960_v3 = vld [vmem:[%s5279_s14 + $0x18] sm:$0xff]  ;;  %v4965_v39 = vld [vmem:[%s5279_s14 + $0x10] sm:$0xff] }
0x1a27   :  { %2334 = vrot.lane.b32.xlu2 %v4915_v50, %s3712_s1  ;;  %v2319_v51 = vsub.f32 1.0, %v2318_v21  ;;  %v4971_v21 = vld [vmem:[%s5279_s14 + $0x8] sm:$0xff]  ;;  %vm5316_vm6 = vmmov %vm5315_vm5 }
0x1a28   :  { %2406 = vmatpush.msrb.mxu3 %v4939_v31  ;;  %vm5317_vm7 = vmmov %vm5315_vm5 }
0x1a29   :  { %v2320_v53 = vmul.f32 %v3670_v59, %v2319_v51  ;;  %v4977_v51 = vld [vmem:[%s5279_s14] sm:$0xff]  ;;  %vm5318_vm8 = vmmov %vm5315_vm5 }
0x1a2a   :  { %2407 = vmatpush.msrb.mxu3 %v4945_v40 }
0x1a2b   :  { %v2321_v61 = vadd.f32 %v3670_v59, %v2320_v53 }
0x1a2d   :  { %v2325_v28 = vsel %vm2324_vm10, %v3670_v59, %v2321_v61  ;;  %vm5319_vm10 = vmmov %vm5315_vm5 }
0x1a2e   :  { %v4919_v54 = vsel %vm2327_vm11, %v2329_v2, %v2325_v28  ;;  %vm5320_vm11 = vmmov %vm5315_vm5 }
0x1a2f   :  { %2336 = vrot.lane.b32.xlu1 %v4919_v54, %s3712_s1 }
0x1a81   :  { %v2335_v7 = vpop.permute.xlu2 %2334 }
0x1a82   :  { %v2340_v13 = vmul.f32 %v2335_v7, %v4554_v43  ;;  %v5005_v7 = vld [vmem:[%s5281_s18 + $0x18] sm:$0xff] }
0x1a83   :  { %2476 = vmatpush.msra.mxu0 %v5005_v7 }
0x1a84   :  { %2342 = vst.msk [vmem:[#allocation5] sm:$0xff] %vm5310_vm14, %v2340_v13  ;;  %vm5321_vm14 = vmmov %vm5315_vm5 }
0x1aa1   :  { %v2337_v62 = vpop.permute.xlu1 %2336 }
0x1aa2   :  { %v2341_v33 = vmul.f32 %v2337_v62, %v4563_v9 }
0x1aa4   :  { %2343 = vst.msk [vmem:[#allocation5 + $0x8] sm:$0xff] %vm5307_vm9, %v2341_v33  ;;  %2358 = vmatpush.msra.mxu2 %v2341_v33 }
0x1aa6   :  { %2359 = vmatpush.msra.mxu2 %v2340_v13 }
0x1aa7   :  { %3474 = vmatmul.msk.f32.vlgmr.msra.gmra.mxu2 %vm71_vm0, %v4605_v48  ;;  %v4951_v48 = vld [vmem:[%s5279_s14 + $0x20] sm:$0xff] }
0x1aa8   :  { %2408 = vmatpush.msrb.mxu3 %v4951_v48 }
0x1aaa   :  { %2409 = vmatpush.msrb.mxu3 %v4960_v3 }
0x1aac   :  { %2410 = vmatpush.msrb.mxu3 %v4965_v39 }
0x1aae   :  { %2411 = vmatpush.msrb.mxu3 %v4971_v21 }
0x1aaf   :  { %3475 = vmatmul.msk.f32.gmra.mxu2 %vm71_vm0, %v4611_v37 }
0x1ab0   :  { %2412 = vmatpush.msrb.mxu3 %v4977_v51 }
0x1ab2   :  { %2770 = vmatpush.msra.mxu3 %v4672_v63 }
0x1ab4   :  { %2771 = vmatpush.msra.mxu3 %v4677_v19  ;;  %v3571_v19 = vld [vmem:[%s5280_s17] ss:$0 sm:$0xff] }
0x1b2a   :  { %v2361_v37 = vpop.f32.mrf.mxu2 }
0x1b2b   :  { %2369 = vrot.lane.b32.xlu0 %v2361_v37, %s3711_s22  ;;  %v5019_v37 = vld [vmem:[%s5281_s18 + $0x8] sm:$0xff] }
0x1b32   :  { %v2364_v59 = vpop.f32.mrf.mxu2 }
0x1b33   :  { %2371 = vrot.lane.b32.xlu1 %v2364_v59, %s3711_s22  ;;  %v2434_v59 = vsub.f32 1.0, %v4915_v50 }
0x1b9d   :  { %v2370_v20 = vpop.permute.xlu0 %2369 }
0x1b9e   :  { %2375 = vst.msk [vmem:[#allocation5] sm:$0xff] %vm232_vm15, %v2370_v20 }
0x1ba5   :  { %v2372_v53 = vpop.permute.xlu1 %2371  ;;  %v2377_v60 = vld [vmem:[#allocation5] sm:$0xff] }
0x1ba6   :  { %2376 = vst.msk [vmem:[#allocation5 + $0x8] sm:$0xff] %vm232_vm15, %v2372_v53  ;;  %3476 = vmatmul.msk.f32.vlgmr.msrb.gmra.mxu3 %vm286_vm3, %v2377_v60 }
0x1ba7   :  { %3052 = vst.msk [vmem:[#allocation5] sm:$0xff] %vm5311_vm1, %v4554_v43  ;;  %3006 = vmatpush.msrb.mxu3 %v4794_v29 }
0x1ba9   :  { %3007 = vmatpush.msrb.mxu3 %v4800_v26 }
0x1bab   :  { %3008 = vmatpush.msrb.mxu3 %v4806_v1 }
0x1bad   :  { %v2378_v63 = vld [vmem:[#allocation5 + $0x8] sm:$0xff]  ;;  %3009 = vmatpush.msrb.mxu3 %v4811_v30 }
0x1bae   :  { %3477 = vmatmul.msk.f32.gmra.mxu3 %vm286_vm3, %v2378_v63  ;;  %3053 = vst.msk [vmem:[#allocation5 + $0x8] sm:$0xff] %vm5312_vm12, %v4563_v9 }
0x1c29   :  { %v2414_v61 = vpop.f32.mrf.mxu3 }
0x1c2a   :  { %v2415_v2 = vadd.f32 %v3571_v19, %v2414_v61 }
0x1c2c   :  { %2422 = vrot.lane.b32.xlu2 %v2415_v2, %s3713_s21 }
0x1c31   :  { %v2417_v29 = vpop.f32.mrf.mxu3 }
0x1c32   :  { %v2418_v26 = vadd.f32 %v3571_v19, %v2417_v29 }
0x1c34   :  { %2424 = vrot.lane.b32.xlu0 %v2418_v26, %s3713_s21 }
0x1c86   :  { %v2423_v1 = vpop.permute.xlu2 %2422 }
0x1c87   :  { %v2428_v30 = vadd.f32 %v2423_v1, %v4909_v15  ;;  %v5013_v15 = vld [vmem:[%s5281_s18 + $0x10] sm:$0xff] }
0x1c88   :  { %2477 = vmatpush.msra.mxu0 %v5013_v15 }
0x1c89   :  { %3671 = vtanh.f32 %v2428_v30 }
0x1c8a   :  { %2478 = vmatpush.msra.mxu0 %v5019_v37 }
0x1c8f   :  { %v3672_v28 = vpop.eup %3671 }
0x1c90   :  { %2438 = vrot.lane.b32.xlu1 %v3672_v28, %s3713_s21 }
0x1ca6   :  { %v2425_v13 = vpop.permute.xlu0 %2424 }
0x1ca7   :  { %v2429_v62 = vadd.f32 %v2425_v13, %v4912_v52  ;;  %v5024_v52 = vld [vmem:[%s5281_s18] sm:$0xff] }
0x1ca8   :  { %2479 = vmatpush.msra.mxu0 %v5024_v52 }
0x1ca9   :  { %3673 = vtanh.f32 %v2429_v62 }
0x1caa   :  { %2807 = vmatpush.msrb.mxu0 %v4620_v38  ;;  %v2432_v38 = vmul.f32 %v4915_v50, %v4554_v43  ;;  %v3572_v50 = vld [vmem:[%s5282_s19] ss:$0 sm:$0xff] }
0x1cac   :  { %2808 = vmatpush.msrb.mxu0 %v4625_v55 }
0x1cae   :  { %2809 = vmatpush.msrb.mxu0 %v4631_v56  ;;  %v2435_v56 = vsub.f32 1.0, %v4919_v54 }
0x1caf   :  { %v3674_v33 = vpop.eup %3673 }
0x1cb0   :  { %2440 = vrot.lane.b32.xlu2 %v3674_v33, %s3713_s21  ;;  %2810 = vmatpush.msrb.mxu0 %v4637_v34 }
0x1cb2   :  { %2811 = vmatpush.msrb.mxu0 %v4648_v5  ;;  %v2433_v5 = vmul.f32 %v4919_v54, %v4563_v9 }
0x1cb4   :  { %2812 = vmatpush.msrb.mxu0 %v4653_v8 }
0x1cb6   :  { %2813 = vmatpush.msrb.mxu0 %v4659_v10 }
0x1cb8   :  { %2814 = vmatpush.msrb.mxu0 %v4665_v12 }
0x1d02   :  { %v2439_v20 = vpop.permute.xlu1 %2438 }
0x1d03   :  { %v2444_v53 = vmul.f32 %v2439_v20, %v2434_v59 }
0x1d05   :  { %v2446_v55 = vadd.f32 %v2444_v53, %v2432_v38 }
0x1d07   :  { %v2448_v60 = vmax.f32 %v2446_v55, 0.0 }
0x1d09   :  { %3478 = vmatmul.msk.f32.vlgmr.msra.gmra.mxu0 %vm5313_vm13, %v2448_v60 }
0x1d0a   :  { %v2441_v34 = vpop.permute.xlu2 %2440 }
0x1d0b   :  { %v2445_v8 = vmul.f32 %v2441_v34, %v2435_v56 }
0x1d0d   :  { %v2447_v10 = vadd.f32 %v2445_v8, %v2433_v5 }
0x1d0f   :  { %v2449_v12 = vmax.f32 %v2447_v10, 0.0 }
0x1d11   :  { %3479 = vmatmul.msk.f32.gmra.mxu0 %vm5314_vm4, %v2449_v12 }
0x1d86   :  { %v2481_v63 = vpop.f32.mrf.mxu0 }
0x1d87   :  { %v2482_v19 = vadd.f32 %v3572_v50, %v2481_v63 }
0x1d89   :  { %3480 = vst.msk [vmem:[%s5283_s20 + $0x10] sm:$0xff] %vm5315_vm5, %v2482_v19  ;;  %v2518_v61 = vmul.f32 100.0, %v2482_v19 }
0x1d8a   :  { %2666 = vst.msk [vmem:[#allocation2] sm:$0xff] %vm5316_vm6, %v2482_v19  ;;  %vm5322_vm6 = vcmp.lt.s32.totalorder %v4578_v6, 16 }
0x1d8b   :  { %2524 = vperm.xlu2 %3547, %v2518_v61  }
0x1d8e   :  { %v2484_v54 = vpop.f32.mrf.mxu0 }
0x1d8f   :  { %v2485_v2 = vadd.f32 %v3572_v50, %v2484_v54 }
0x1d91   :  { %3481 = vst.msk [vmem:[%s5283_s20 + $0x18] sm:$0xff] %vm5317_vm7, %v2485_v2  ;;  %3482 = vmatpush.xpose.msk.msrb.mxu1 %vm5318_vm8, %v2485_v2  ;;  %v2519_v29 = vmul.f32 100.0, %v2485_v2 }
0x1d92   :  { %2667 = vst.msk [vmem:[#allocation2 + $0x8] sm:$0xff] %vm5319_vm10, %v2485_v2 }
0x1d93   :  { %2540 = vperm.xlu1 %3548, %v2519_v29   ;;  %2529 = vperm.xlu0 %3546, %v2519_v29  }
0x1d95   :  { %3483 = vmatpush.xpose.msk.msrb.mxu1 %vm5320_vm11, %v2482_v19 }
0x1d98   :  { %3484 = vmatmul.msk.f32.vlgmr.msrb.gmra.mxu1 %vm5321_vm14, %v4588_v57  ;;  %vm5323_vm14 = vmmov %vm5322_vm6 }
0x1d99   :  { %2688 = vmatpush.msra.mxu1 %v2485_v2 }
0x1d9b   :  { %2689 = vmatpush.msra.mxu1 %v2482_v19  ;;  %3549 = vset.pattern.permute.xlu0 %v3715_v23 }
0x1d9c   :  { %2536 = vperm.xlu0 %3549, %v2518_v61  }
0x1de5   :  { %v2525_v28 = vpop.permute.xlu2 %2524 }
0x1e05   :  { %v2530_v26 = vpop.permute.xlu0 %2529  ;;  %v2541_v33 = vpop.permute.xlu1 %2540 }
0x1e0e   :  { %v2537_v59 = vpop.permute.xlu0 %2536 }
0x1e15   :  { %v2513_v1 = vpop.f32.mrf.mxu1 }
0x1e16   :  { %v2516_v30 = vmul.f32 100.0, %v2513_v1 }
0x1e18   :  { %v2532_v13 = vperm.slane %v2516_v30, 0  ;;  %v2543_v62 = vperm.slane %v2516_v30, 1 }
0x1e1a   :  { %v2533_v20 = vsub.f32 %v2525_v28, %v2532_v13  ;;  %v2534_v38 = vsub.f32 %v2530_v26, %v2532_v13  ;;  %v2544_v53 = vsub.f32 %v2537_v59, %v2543_v62  ;;  %v2545_v55 = vsub.f32 %v2541_v33, %v2543_v62 }
0x1e1c   :  { %v2546_v60 = vmul.f32 %v2533_v20, %v2533_v20  ;;  %v2547_v56 = vmul.f32 %v2534_v38, %v2534_v38  ;;  %v2548_v34 = vmul.f32 %v2544_v53, %v2544_v53  ;;  %v2549_v57 = vmul.f32 %v2545_v55, %v2545_v55 }
0x1e1e   :  { %v2550_v5 = vadd.f32 %v2548_v34, %v2546_v60  ;;  %v2551_v8 = vadd.f32 %v2549_v57, %v2547_v56 }
0x1e20   :  { %3675 = vrsqrt.f32 %v2551_v8  ;;  %vm2571_vm9 = vcmp.eq.f32.partialorder %v2551_v8, inf  ;;  %v2574_v28 = vand.u32 2147483648, %v2551_v8  ;;  %vm2573_vm1 = vcmp.eq.f32.partialorder %v2551_v8, 0.0 }
0x1e21   :  { %3677 = vrsqrt.f32 %v2550_v5  ;;  %vm2559_vm12 = vcmp.eq.f32.partialorder %v2550_v5, inf  ;;  %v2562_v33 = vand.u32 2147483648, %v2550_v5  ;;  %vm2561_vm13 = vcmp.eq.f32.partialorder %v2550_v5, 0.0 }
0x1e26   :  { %v3676_v23 = vpop.eup %3675 }
0x1e27   :  { %v3678_v10 = vpop.eup %3677  ;;  %v2565_v12 = vmul.f32 %v3676_v23, %v2551_v8 }
0x1e28   :  { %v2553_v50 = vmul.f32 %v3678_v10, %v2550_v5 }
0x1e29   :  { %v2566_v63 = vmul.f32 %v3676_v23, %v2565_v12 }
0x1e2a   :  { %v2554_v19 = vmul.f32 %v3678_v10, %v2553_v50 }
0x1e2b   :  { %v2567_v61 = vmul.f32 0.5, %v2566_v63 }
0x1e2c   :  { %v2555_v54 = vmul.f32 0.5, %v2554_v19 }
0x1e2d   :  { %v2568_v2 = vsub.f32 1.5, %v2567_v61 }
0x1e2e   :  { %v2556_v29 = vsub.f32 1.5, %v2555_v54 }
0x1e2f   :  { %v2569_v26 = vmul.f32 %v3676_v23, %v2568_v2 }
0x1e30   :  { %v2557_v1 = vmul.f32 %v3678_v10, %v2556_v29 }
0x1e31   :  { %v2570_v30 = vmul.f32 %v2569_v26, %v2551_v8 }
0x1e32   :  { %v2558_v13 = vmul.f32 %v2557_v1, %v2550_v5 }
0x1e33   :  { %v2572_v62 = vsel %vm2571_vm9, %v2551_v8, %v2570_v30 }
0x1e34   :  { %v2575_v59 = vsel %vm2573_vm1, %v2574_v28, %v2572_v62  ;;  %v2560_v20 = vsel %vm2559_vm12, %v2550_v5, %v2558_v13 }
0x1e35   :  { %vm2577_vm4 = vcmp.lt.f32.partialorder %v2575_v59, 40.0  ;;  %vm2581_vm5 = vcmp.gt.f32.partialorder %v2575_v59, 0.0  ;;  %v2585_v38 = vmul.f32 0.02, %v2575_v59  ;;  %v2563_v53 = vsel %vm2561_vm13, %v2562_v33, %v2560_v20 }
0x1e36   :  { %vm2579_vm7 = vmand %vm5322_vm6, %vm2577_vm4  ;;  %vm2576_vm8 = vcmp.lt.f32.partialorder %v2563_v53, 40.0  ;;  %vm2580_vm10 = vcmp.gt.f32.partialorder %v2563_v53, 0.0  ;;  %v2584_v55 = vmul.f32 0.02, %v2563_v53 }
0x1e37   :  { %vm2583_vm11 = vmand %vm2579_vm7, %vm2581_vm5 }
0x1e38   :  { %v5064_v60 = vsel %vm2583_vm11, %v2585_v38, 0.0  ;;  %vm2578_vm9 = vmand %vm5323_vm14, %vm2576_vm8 }
0x1e39   :  { %3485 = vmatpush.xpose.msk.msrb.mxu2 %vm71_vm0, %v5064_v60  ;;  %v2591_v56 = vsel %vm71_vm0, %v5064_v60, 0.0  ;;  %vm2582_vm1 = vmand %vm2578_vm9, %vm2580_vm10 }
0x1e3a   :  { %2592 = vadd.xlane.f32.xlu2 %v2591_v56  ;;  %v2586_v34 = vsel %vm2582_vm1, %v2584_v55, 0.0 }
0x1e3b   :  { %v2588_v57 = vsel %vm71_vm0, %v2586_v34, 0.0 }
0x1e3c   :  { %2589 = vadd.xlane.f32.xlu1 %v2588_v57 }
0x1e3d   :  { %3486 = vmatpush.xpose.msk.msrb.mxu2 %vm71_vm0, %v2586_v34 }
0x1e40   :  { %3487 = vmatmul.msk.f32.vlgmr.msrb.gmra.mxu2 %vm71_vm0, %v3709_v4 }
0x1e41   :  { %2723 = vmatpush.msra.mxu2 %v4440_v14 }
0x1e43   :  { %2724 = vmatpush.msra.mxu2 %v4430_v27 }
0x1e45   :  { %2935 = vmatpush.msrb.mxu2 %v4726_v22 }
0x1e47   :  { %2936 = vmatpush.msrb.mxu2 %v4731_v11 }
0x1e49   :  { %2937 = vmatpush.msrb.mxu2 %v4737_v25 }
0x1e4b   :  { %2938 = vmatpush.msrb.mxu2 %v4743_v58 }
0x1e4d   :  { %2939 = vmatpush.msrb.mxu2 %v4752_v16 }
0x1e4f   :  { %2940 = vmatpush.msrb.mxu2 %v4757_v44 }
0x1e51   :  { %2941 = vmatpush.msrb.mxu2 %v4763_v24 }
0x1e53   :  { %2942 = vmatpush.msrb.mxu2 %v4769_v42 }
0x1ead   :  { %v2593_v5 = vpop.xlane.xlu2 %2592 }
0x1eae   :  { %v2623_v8 = vmax.f32 %v2593_v5, 1e-12  ;;  %vm2621_vm1 = vcmp.gt.f32.partialorder %v2593_v5, 0.0 }
0x1eaf   :  { %v2590_v6 = vpop.xlane.xlu1 %2589 }
0x1eb0   :  { %v2622_v4 = vmax.f32 %v2590_v6, 1e-12  ;;  %vm2620_vm6 = vcmp.gt.f32.partialorder %v2590_v6, 0.0  ;;  %vm2640_vm11 = vweird.f32 %v2623_v8 }
0x1eb2   :  { %3679 = vrsqrt.f32 %v2622_v4  ;;  %vm2630_vm13 = vweird.f32 %v2622_v4 }
0x1eb3   :  { %3681 = vrsqrt.f32 %v2623_v8 }
0x1eb8   :  { %v3680_v22 = vpop.eup %3679 }
0x1eb9   :  { %v2625_v11 = vmul.f32 %v3680_v22, %v2622_v4  ;;  %v3682_v23 = vpop.eup %3681  ;;  %vm2631_vm12 = vweird.f32 %v3680_v22 }
0x1eba   :  { %v2635_v12 = vmul.f32 %v3682_v23, %v2623_v8  ;;  %vm2632_vm4 = vmor %vm2630_vm13, %vm2631_vm12  ;;  %vm2641_vm7 = vweird.f32 %v3682_v23 }
0x1ebb   :  { %v2626_v25 = vmul.f32 %v3680_v22, %v2625_v11  ;;  %vm2642_vm9 = vmor %vm2640_vm11, %vm2641_vm7  ;;  %vm5324_vm11 = vcmask 261120  }
0x1ebc   :  { %v2636_v44 = vmul.f32 %v3682_v23, %v2635_v12 }
0x1ebd   :  { %v2627_v16 = vmul.f32 0.5, %v2626_v25 }
0x1ebe   :  { %v2637_v63 = vmul.f32 0.5, %v2636_v44 }
0x1ebf   :  { %v2628_v50 = vsub.f32 1.5, %v2627_v16 }
0x1ec0   :  { %v2638_v54 = vsub.f32 1.5, %v2637_v63 }
0x1ec1   :  { %v2629_v19 = vmul.f32 %v3680_v22, %v2628_v50 }
0x1ec2   :  { %v2639_v1 = vmul.f32 %v3682_v23, %v2638_v54 }
0x1ec3   :  { %v2617_v10 = vpop.f32.mrf.mxu2  ;;  %v2633_v29 = vsel %vm2632_vm4, %v3680_v22, %v2629_v19 }
0x1ec4   :  { %v2647_v58 = vmax.f32 %v2617_v10, 1e-12  ;;  %v2644_v28 = vsel %vm2620_vm6, %v2633_v29, 0.0  ;;  %vm2646_vm14 = vcmp.gt.f32.partialorder %v2617_v10, 0.0  ;;  %v2643_v33 = vsel %vm2642_vm9, %v3682_v23, %v2639_v1  ;;  %vm5326_vm9 = vmmov %vm5324_vm11 }
0x1ec5   :  { %v2659_v59 = vmul.f32 %v2644_v28, %v2586_v34  ;;  %v2645_v53 = vsel %vm2621_vm1, %v2643_v33, 0.0  ;;  %vm5327_vm1 = vmmov %vm5326_vm9 }
0x1ec6   :  { %3683 = vrsqrt.f32 %v2647_v58  ;;  %vm2654_vm8 = vweird.f32 %v2647_v58  ;;  %v2660_v56 = vmul.f32 %v2645_v53, %v5064_v60 }
0x1ecc   :  { %v3684_v24 = vpop.eup %3683 }
0x1ecd   :  { %v2649_v42 = vmul.f32 %v3684_v24, %v2647_v58  ;;  %vm2655_vm5 = vweird.f32 %v3684_v24 }
0x1ece   :  { %vm2656_vm10 = vmor %vm2654_vm8, %vm2655_vm5 }
0x1ecf   :  { %v2650_v61 = vmul.f32 %v3684_v24, %v2649_v42 }
0x1ed1   :  { %v2651_v2 = vmul.f32 0.5, %v2650_v61 }
0x1ed3   :  { %v2652_v26 = vsub.f32 1.5, %v2651_v2 }
0x1ed5   :  { %v2653_v30 = vmul.f32 %v3684_v24, %v2652_v26 }
0x1ed7   :  { %v2657_v13 = vsel %vm2656_vm10, %v3684_v24, %v2653_v30 }
0x1ed8   :  { %v2658_v62 = vsel %vm2646_vm14, %v2657_v13, 0.0  ;;  %vm5325_vm14 = vmmov %vm5324_vm11 }
0x1ed9   :  { %v2661_v20 = vperm.slane %v2658_v62, 0 }
0x1edb   :  { %v2662_v38 = vmul.f32 %v2661_v20, %v2659_v59  ;;  %v2663_v57 = vmul.f32 %v2661_v20, %v2660_v56 }
0x1edd   :  { %v5086_v55 = vsub.f32 0.0, %v2662_v38  ;;  %v5095_v34 = vsub.f32 0.0, %v2663_v57 }
0x1edf   :  { %3488 = vmatmul.msk.f32.vlgmr.msra.gmra.mxu1 %vm71_vm0, %v5086_v55  ;;  %3490 = vmatmul.msk.f32.vlgmr.msra.gmra.mxu2 %vm71_vm0, %v5086_v55 }
0x1ee0   :  { %3115 = vmatpush.msra.mxu2 %v4888_v41 }
0x1ee2   :  { %3116 = vmatpush.msra.mxu2 %v4893_v45 }
0x1ee7   :  { %3489 = vmatmul.msk.f32.gmra.mxu1 %vm71_vm0, %v5095_v34  ;;  %3491 = vmatmul.msk.f32.gmra.mxu2 %vm71_vm0, %v5095_v34 }
0x1f5c   :  { %v2691_v60 = vpop.f32.mrf.mxu1 }
0x1f5d   :  { %2699 = vrot.lane.b32.xlu0 %v2691_v60, %s3710_s0 }
0x1f62   :  { %v2726_v6 = vpop.f32.mrf.mxu2 }
0x1f64   :  { %v2694_v4 = vpop.f32.mrf.mxu1 }
0x1f65   :  { %2734 = vrot.lane.b32.xlu0 %v2726_v6, %s3711_s22 }
0x1f6a   :  { %v2729_v41 = vpop.f32.mrf.mxu2 }
0x1f6d   :  { %2701 = vrot.lane.b32.xlu0 %v2694_v4, %s3710_s0 }
0x1f75   :  { %2736 = vrot.lane.b32.xlu0 %v2729_v41, %s3711_s22 }
0x1fcf   :  { %v2700_v45 = vpop.permute.xlu0 %2699 }
0x1fd0   :  { %2705 = vst.msk [vmem:[#allocation2] sm:$0xff] %vm195_vm2, %v2700_v45 }
0x1fd7   :  { %v2735_v5 = vpop.permute.xlu0 %2734  ;;  %v2742_v8 = vld [vmem:[#allocation2] sm:$0xff] }
0x1fd8   :  { %2740 = vst.msk [vmem:[#allocation3] sm:$0xff] %vm232_vm15, %v2735_v5  ;;  %3492 = vmatmul.msk.f32.vlgmr.msra.gmra.mxu3 %vm71_vm0, %v2742_v8 }
0x1fd9   :  { %3152 = vmatpush.msra.mxu3 %v4817_v17 }
0x1fdb   :  { %3153 = vmatpush.msra.mxu3 %v4824_v32 }
0x1fdd   :  { %3154 = vmatpush.msra.mxu3 %v4829_v35  ;;  %v3573_v35 = vld [vmem:[%s5270_s7] ss:$0 sm:$0xff] }
0x1fdf   :  { %v2702_v22 = vpop.permute.xlu0 %2701  ;;  %v2779_v11 = vld [vmem:[#allocation3] sm:$0xff]  ;;  %3155 = vmatpush.msra.mxu3 %v4835_v36  ;;  %v3574_v36 = vld [vmem:[%s5301_s5] ss:$0 sm:$0xff] }
0x1fe0   :  { %2706 = vst.msk [vmem:[#allocation2 + $0x8] sm:$0xff] %vm195_vm2, %v2702_v22  ;;  %3494 = vmatmul.msk.f32.vlgmr.msrb.gmra.mxu0 %vm286_vm3, %v2779_v11 }
0x1fe1   :  { %3156 = vmatpush.msra.mxu3 %v4842_v46 }
0x1fe3   :  { %3157 = vmatpush.msra.mxu3 %v4847_v47 }
0x1fe5   :  { %3158 = vmatpush.msra.mxu3 %v4853_v49 }
0x1fe7   :  { %v2737_v23 = vpop.permute.xlu0 %2736  ;;  %v2743_v17 = vld [vmem:[#allocation2 + $0x8] sm:$0xff]  ;;  %3159 = vmatpush.msra.mxu3 %v4859_v0 }
0x1fe8   :  { %2741 = vst.msk [vmem:[#allocation3 + $0x8] sm:$0xff] %vm232_vm15, %v2737_v23  ;;  %3493 = vmatmul.msk.f32.gmra.mxu3 %vm71_vm0, %v2743_v17 }
0x1fef   :  { %v2780_v32 = vld [vmem:[#allocation3 + $0x8] sm:$0xff] }
0x1ff0   :  { %3495 = vmatmul.msk.f32.gmra.mxu0 %vm286_vm3, %v2780_v32 }
0x205b   :  { %v2773_v46 = vpop.f32.mrf.mxu3 }
0x205c   :  { %v5127_v49 = vadd.f32 %v3573_v35, %v2773_v46 }
0x205d   :  { %v2816_v47 = vpop.f32.mrf.mxu0 }
0x205e   :  { %v2817_v0 = vadd.f32 %v3574_v36, %v2816_v47 }
0x2060   :  { %v2822_v25 = vadd.f32 %v2817_v0, %v5127_v49 }
0x2062   :  { %v3496_v10 = vmul.f32 -1.442695, %v2822_v25 }
0x2064   :  { %3685 = vpow2.f32 %v3496_v10 }
0x206a   :  { %v3686_v58 = vpop.eup %3685 }
0x206b   :  { %v2830_v12 = vadd.f32 1.0, %v3686_v58  ;;  %v2776_v16 = vpop.f32.mrf.mxu3 }
0x206c   :  { %v5130_v50 = vadd.f32 %v3573_v35, %v2776_v16 }
0x206d   :  { %3687 = vrcp.f32 %v2830_v12  ;;  %v2819_v44 = vpop.f32.mrf.mxu0  ;;  %v2843_v2 = vand.u32 2147483648, %v2830_v12  ;;  %v2841_v26 = vand.u32 2147483647, %v2830_v12  ;;  %vm2837_vm13 = vweird.f32 %v2830_v12 }
0x206e   :  { %v2820_v24 = vadd.f32 %v3574_v36, %v2819_v44 }
0x206f   :  { %v2844_v13 = vor.u32 1.1754944e-38, %v2843_v2  ;;  %vm2842_vm5 = vcmp.eq.f32.partialorder %v2841_v26, 8.507059e+37 }
0x2070   :  { %v2823_v63 = vadd.f32 %v2820_v24, %v5130_v50 }
0x2072   :  { %v3497_v42 = vmul.f32 -1.442695, %v2823_v63 }
0x2073   :  { %v3688_v19 = vpop.eup %3687 }
0x2074   :  { %3689 = vpow2.f32 %v3497_v42  ;;  %v2833_v61 = vmul.f32 %v3688_v19, %v2830_v12  ;;  %vm2838_vm12 = vweird.f32 %v3688_v19  ;;  %v3576_v42 = vld [vmem:[%s5274_s11] ss:$0 sm:$0xff] }
0x2075   :  { %vm2839_vm4 = vmor %vm2837_vm13, %vm2838_vm12  ;;  %vm5328_vm12 = vcmask 64512  }
0x2076   :  { %v2834_v54 = vsub.f32 1.0, %v2833_v61  ;;  %vm5329_vm13 = vmmov %vm5328_vm12 }
0x2078   :  { %v2835_v29 = vmul.f32 %v3688_v19, %v2834_v54 }
0x207a   :  { %v3690_v1 = vpop.eup %3689  ;;  %v2836_v30 = vadd.f32 %v3688_v19, %v2835_v29 }
0x207b   :  { %v2831_v28 = vadd.f32 1.0, %v3690_v1 }
0x207c   :  { %v2840_v62 = vsel %vm2839_vm4, %v3688_v19, %v2836_v30 }
0x207d   :  { %3691 = vrcp.f32 %v2831_v28  ;;  %v5133_v33 = vsel %vm2842_vm5, %v2844_v13, %v2840_v62  ;;  %v2858_v53 = vand.u32 2147483648, %v2831_v28  ;;  %v2856_v57 = vand.u32 2147483647, %v2831_v28 }
0x207e   :  { %2864 = vrot.lane.b32.xlu2 %v5133_v33, %s3712_s1  ;;  %vm2852_vm7 = vweird.f32 %v2831_v28  ;;  %v2964_v46 = vsub.f32 1.0, %v5133_v33 }
0x207f   :  { %v2859_v6 = vor.u32 1.1754944e-38, %v2858_v53  ;;  %vm2857_vm10 = vcmp.eq.f32.partialorder %v2856_v57, 8.507059e+37 }
0x2083   :  { %v3692_v59 = vpop.eup %3691 }
0x2084   :  { %v2848_v20 = vmul.f32 %v3692_v59, %v2831_v28  ;;  %vm2853_vm6 = vweird.f32 %v3692_v59 }
0x2085   :  { %vm2854_vm8 = vmor %vm2852_vm7, %vm2853_vm6 }
0x2086   :  { %v2849_v38 = vsub.f32 1.0, %v2848_v20  ;;  %v3578_v20 = vld [vmem:[%s5277_s15] ss:$0 sm:$0xff] }
0x2088   :  { %v2850_v56 = vmul.f32 %v3692_v59, %v2849_v38 }
0x208a   :  { %v2851_v60 = vadd.f32 %v3692_v59, %v2850_v56 }
0x208c   :  { %v2855_v4 = vsel %vm2854_vm8, %v3692_v59, %v2851_v60  ;;  %v3577_v59 = vld [vmem:[%s5276_s16] ss:$0 sm:$0xff] }
0x208d   :  { %v5137_v41 = vsel %vm2857_vm10, %v2859_v6, %v2855_v4 }
0x208e   :  { %2866 = vrot.lane.b32.xlu1 %v5137_v41, %s3712_s1  ;;  %v2965_v12 = vsub.f32 1.0, %v5137_v41  ;;  %v2963_v44 = vmul.f32 %v5137_v41, %v4440_v14 }
0x20d8   :  { %v2865_v45 = vpop.permute.xlu2 %2864 }
0x20d9   :  { %v2870_v5 = vmul.f32 %v2865_v45, %v4430_v27 }
0x20db   :  { %2872 = vst.msk [vmem:[#allocation3] sm:$0xff] %vm5324_vm11, %v2870_v5 }
0x2100   :  { %v2867_v8 = vpop.permute.xlu1 %2866 }
0x2101   :  { %v2871_v22 = vmul.f32 %v2867_v8, %v4440_v14 }
0x2103   :  { %2873 = vst.msk [vmem:[#allocation3 + $0x8] sm:$0xff] %vm5325_vm14, %v2871_v22  ;;  %2888 = vmatpush.msrb.mxu1 %v2871_v22  ;;  %vm5330_vm14 = vmmov %vm5327_vm1 }
0x2105   :  { %2889 = vmatpush.msrb.mxu1 %v2870_v5 }
0x2106   :  { %3498 = vmatmul.msk.f32.vlgmr.msrb.gmra.mxu1 %vm71_vm0, %v5086_v55 }
0x2107   :  { %3068 = vmatpush.msra.mxu1 %v4563_v9 }
0x2109   :  { %3069 = vmatpush.msra.mxu1 %v4554_v43 }
0x210b   :  { %3280 = vmatpush.msrb.mxu1 %v4934_v18 }
0x210d   :  { %3281 = vmatpush.msrb.mxu1 %v4939_v31 }
0x210e   :  { %3499 = vmatmul.msk.f32.gmra.mxu1 %vm71_vm0, %v5095_v34 }
0x210f   :  { %3282 = vmatpush.msrb.mxu1 %v4945_v40 }
0x2111   :  { %3283 = vmatpush.msrb.mxu1 %v4951_v48 }
0x2113   :  { %3284 = vmatpush.msrb.mxu1 %v4960_v3 }
0x2115   :  { %3285 = vmatpush.msrb.mxu1 %v4965_v39 }
0x2116   :  { %3506 = vmatmul.msk.f32.vlgmr.msra.gmra.mxu1 %vm71_vm0, %v5086_v55 }
0x2117   :  { %3286 = vmatpush.msrb.mxu1 %v4971_v21  ;;  %v3575_v21 = vld [vmem:[%s5272_s9] ss:$0 sm:$0xff] }
0x2119   :  { %3287 = vmatpush.msrb.mxu1 %v4977_v51 }
0x211e   :  { %3507 = vmatmul.msk.f32.gmra.mxu1 %vm71_vm0, %v5095_v34 }
0x2183   :  { %v2891_v18 = vpop.f32.mrf.mxu1 }
0x2184   :  { %2899 = vrot.lane.b32.xlu0 %v2891_v18, %s3711_s22 }
0x218b   :  { %v2894_v31 = vpop.f32.mrf.mxu1 }
0x218c   :  { %2901 = vrot.lane.b32.xlu0 %v2894_v31, %s3711_s22 }
0x2193   :  { %v3071_v36 = vpop.f32.mrf.mxu1 }
0x219b   :  { %v3074_v29 = vpop.f32.mrf.mxu1 }
0x21f6   :  { %v2900_v40 = vpop.permute.xlu0 %2899 }
0x21f7   :  { %2905 = vst.msk [vmem:[#allocation3] sm:$0xff] %vm232_vm15, %v2900_v40 }
0x21fe   :  { %v2902_v48 = vpop.permute.xlu0 %2901  ;;  %v2907_v3 = vld [vmem:[#allocation3] sm:$0xff] }
0x21ff   :  { %2906 = vst.msk [vmem:[#allocation3 + $0x8] sm:$0xff] %vm232_vm15, %v2902_v48  ;;  %3500 = vmatmul.msk.f32.vlgmr.msrb.gmra.mxu2 %vm286_vm3, %v2907_v3 }
0x2200   :  { %3351 = vmatpush.msrb.mxu2 %v5005_v7 }
0x2202   :  { %3352 = vmatpush.msrb.mxu2 %v5013_v15 }
0x2204   :  { %3353 = vmatpush.msrb.mxu2 %v5019_v37 }
0x2206   :  { %v2908_v39 = vld [vmem:[#allocation3 + $0x8] sm:$0xff]  ;;  %3354 = vmatpush.msrb.mxu2 %v5024_v52 }
0x2207   :  { %3501 = vmatmul.msk.f32.gmra.mxu2 %vm286_vm3, %v2908_v39 }
0x2282   :  { %v2944_v51 = vpop.f32.mrf.mxu2 }
0x2283   :  { %v2945_v11 = vadd.f32 %v3575_v21, %v2944_v51 }
0x2285   :  { %2952 = vrot.lane.b32.xlu0 %v2945_v11, %s3713_s21 }
0x228a   :  { %v2947_v23 = vpop.f32.mrf.mxu2 }
0x228b   :  { %v2948_v17 = vadd.f32 %v3575_v21, %v2947_v23 }
0x228d   :  { %2954 = vrot.lane.b32.xlu1 %v2948_v17, %s3713_s21 }
0x22f7   :  { %v2953_v7 = vpop.permute.xlu0 %2952 }
0x22f8   :  { %v2958_v15 = vadd.f32 %v2953_v7, %v5127_v49  ;;  %v2962_v49 = vmul.f32 %v5133_v33, %v4430_v27 }
0x22fa   :  { %3693 = vtanh.f32 %v2958_v15 }
0x22ff   :  { %v2955_v37 = vpop.permute.xlu1 %2954 }
0x2300   :  { %v3694_v52 = vpop.eup %3693  ;;  %v2959_v32 = vadd.f32 %v2955_v37, %v5130_v50 }
0x2301   :  { %2968 = vrot.lane.b32.xlu2 %v3694_v52, %s3713_s21 }
0x2302   :  { %3695 = vtanh.f32 %v2959_v32 }
0x2308   :  { %v3696_v35 = vpop.eup %3695 }
0x2309   :  { %3079 = vrot.lane.b32.xlu2 %v3071_v36, %s3711_s22  ;;  %2970 = vrot.lane.b32.xlu0 %v3696_v35, %s3713_s21 }
0x235b   :  { %v2969_v47 = vpop.permute.xlu2 %2968 }
0x235c   :  { %v2974_v0 = vmul.f32 %v2969_v47, %v2964_v46 }
0x235e   :  { %v2976_v25 = vadd.f32 %v2974_v0, %v2962_v49 }
0x2360   :  { %v2978_v10 = vmax.f32 %v2976_v25, 0.0 }
0x2362   :  { %3502 = vmatmul.msk.f32.vlgmr.msrb.gmra.mxu3 %vm5326_vm9, %v2978_v10  ;;  %vm5331_vm9 = vmmov %vm5327_vm1 }
0x2363   :  { %v3080_v58 = vpop.permute.xlu2 %3079 }
0x2364   :  { %3085 = vst.msk [vmem:[#allocation5] sm:$0xff] %vm232_vm15, %v3080_v58 }
0x236b   :  { %v3124_v27 = vld [vmem:[#allocation5] sm:$0xff] }
0x237b   :  { %v2971_v16 = vpop.permute.xlu0 %2970 }
0x237c   :  { %v2975_v50 = vmul.f32 %v2971_v16, %v2965_v12 }
0x237e   :  { %v2977_v24 = vadd.f32 %v2975_v50, %v2963_v44 }
0x2380   :  { %v2979_v63 = vmax.f32 %v2977_v24, 0.0 }
0x2382   :  { %3503 = vmatmul.msk.f32.gmra.mxu3 %vm5327_vm1, %v2979_v63 }
0x238a   :  { %3510 = vmatmul.msk.f32.vlgmr.msra.gmra.mxu3 %vm286_vm3, %v3124_v27 }
0x23e5   :  { %v3011_v19 = vpop.f32.mrf.mxu3 }
0x23e6   :  { %v3012_v61 = vadd.f32 %v3576_v42, %v3011_v19 }
0x23e8   :  { %3017 = vst.msk [vmem:[#allocation4] sm:$0xff] %vm5328_vm12, %v3012_v61 }
0x2405   :  { %v3014_v54 = vpop.f32.mrf.mxu3 }
0x2406   :  { %v3015_v2 = vadd.f32 %v3576_v42, %v3014_v54 }
0x2408   :  { %3018 = vst.msk [vmem:[#allocation4 + $0x8] sm:$0xff] %vm5329_vm13, %v3015_v2  ;;  %3033 = vmatpush.msra.mxu0 %v3015_v2 }
0x240a   :  { %3034 = vmatpush.msra.mxu0 %v3012_v61 }
0x240b   :  { %3504 = vmatmul.msk.f32.vlgmr.msra.gmra.mxu0 %vm71_vm0, %v5086_v55 }
0x240d   :  { %v3161_v38 = vpop.f32.mrf.mxu3 }
0x240e   :  { %v3162_v56 = vadd.f32 %v3577_v59, %v3161_v38 }
0x2413   :  { %3505 = vmatmul.msk.f32.gmra.mxu0 %vm71_vm0, %v5095_v34 }
0x2488   :  { %v3036_v14 = vpop.f32.mrf.mxu0 }
0x2489   :  { %3044 = vrot.lane.b32.xlu1 %v3036_v14, %s3710_s0 }
0x2490   :  { %v3039_v26 = vpop.f32.mrf.mxu0 }
0x2491   :  { %3081 = vrot.lane.b32.xlu1 %v3074_v29, %s3711_s22  ;;  %3046 = vrot.lane.b32.xlu0 %v3039_v26, %s3710_s0 }
0x24fb   :  { %v3045_v1 = vpop.permute.xlu1 %3044 }
0x24fc   :  { %3050 = vst.msk [vmem:[#allocation4] sm:$0xff] %vm195_vm2, %v3045_v1 }
0x2503   :  { %v3082_v30 = vpop.permute.xlu1 %3081  ;;  %v3047_v28 = vpop.permute.xlu0 %3046  ;;  %v3087_v13 = vld [vmem:[#allocation4] sm:$0xff] }
0x2504   :  { %3086 = vst.msk [vmem:[#allocation5 + $0x8] sm:$0xff] %vm232_vm15, %v3082_v30  ;;  %3508 = vmatmul.msk.f32.vlgmr.msra.gmra.mxu2 %vm71_vm0, %v3087_v13 }
0x2505   :  { %3051 = vst.msk [vmem:[#allocation4 + $0x8] sm:$0xff] %vm195_vm2, %v3047_v28 }
0x250b   :  { %v3125_v62 = vld [vmem:[#allocation5 + $0x8] sm:$0xff] }
0x250c   :  { %v3088_v33 = vld [vmem:[#allocation4 + $0x8] sm:$0xff]  ;;  %3511 = vmatmul.msk.f32.gmra.mxu3 %vm286_vm3, %v3125_v62 }
0x250d   :  { %3509 = vmatmul.msk.f32.gmra.mxu2 %vm71_vm0, %v3088_v33 }
0x2587   :  { %v3118_v53 = vpop.f32.mrf.mxu2 }
0x2588   :  { %v5217_v57 = vadd.f32 %v3578_v20, %v3118_v53 }
0x258a   :  { %v3167_v60 = vadd.f32 %v3162_v56, %v5217_v57 }
0x258c   :  { %v3512_v6 = vmul.f32 -1.442695, %v3167_v60 }
0x258e   :  { %3697 = vpow2.f32 %v3512_v6 }
0x258f   :  { %v3164_v4 = vpop.f32.mrf.mxu3 }
0x2590   :  { %v3121_v41 = vpop.f32.mrf.mxu2  ;;  %v3165_v45 = vadd.f32 %v3577_v59, %v3164_v4 }
0x2591   :  { %v5220_v5 = vadd.f32 %v3578_v20, %v3121_v41  ;;  %v3580_v41 = vld [vmem:[%s5282_s19] ss:$0 sm:$0xff] }
0x2593   :  { %v3168_v8 = vadd.f32 %v3165_v45, %v5220_v5 }
0x2594   :  { %v3698_v22 = vpop.eup %3697 }
0x2595   :  { %v3175_v18 = vadd.f32 1.0, %v3698_v22  ;;  %v3513_v31 = vmul.f32 -1.442695, %v3168_v8 }
0x2597   :  { %3699 = vrcp.f32 %v3175_v18  ;;  %v3188_v51 = vand.u32 2147483648, %v3175_v18  ;;  %v3186_v23 = vand.u32 2147483647, %v3175_v18  ;;  %vm3182_vm4 = vweird.f32 %v3175_v18 }
0x2598   :  { %3701 = vpow2.f32 %v3513_v31 }
0x2599   :  { %v3189_v7 = vor.u32 1.1754944e-38, %v3188_v51  ;;  %vm3187_vm6 = vcmp.eq.f32.partialorder %v3186_v23, 8.507059e+37 }
0x259d   :  { %v3700_v40 = vpop.eup %3699 }
0x259e   :  { %v3702_v48 = vpop.eup %3701  ;;  %v3178_v3 = vmul.f32 %v3700_v40, %v3175_v18  ;;  %vm3183_vm2 = vweird.f32 %v3700_v40 }
0x259f   :  { %v3176_v39 = vadd.f32 1.0, %v3702_v48  ;;  %vm3184_vm5 = vmor %vm3182_vm4, %vm3183_vm2 }
0x25a0   :  { %v3179_v21 = vsub.f32 1.0, %v3178_v3 }
0x25a1   :  { %3703 = vrcp.f32 %v3176_v39  ;;  %v3203_v36 = vand.u32 2147483648, %v3176_v39  ;;  %v3201_v47 = vand.u32 2147483647, %v3176_v39  ;;  %vm3197_vm8 = vweird.f32 %v3176_v39 }
0x25a2   :  { %v3180_v11 = vmul.f32 %v3700_v40, %v3179_v21 }
0x25a3   :  { %v3204_v0 = vor.u32 1.1754944e-38, %v3203_v36  ;;  %vm3202_vm11 = vcmp.eq.f32.partialorder %v3201_v47, 8.507059e+37 }
0x25a4   :  { %v3181_v17 = vadd.f32 %v3700_v40, %v3180_v11 }
0x25a6   :  { %v3185_v15 = vsel %vm3184_vm5, %v3700_v40, %v3181_v17 }
0x25a7   :  { %v3704_v37 = vpop.eup %3703  ;;  %v3190_v52 = vsel %vm3187_vm6, %v3189_v7, %v3185_v15 }
0x25a8   :  { %3209 = vrot.lane.b32.xlu0 %v3190_v52, %s3712_s1  ;;  %v3193_v32 = vmul.f32 %v3704_v37, %v3176_v39  ;;  %vm3198_vm7 = vweird.f32 %v3704_v37  ;;  %v3309_v13 = vsub.f32 1.0, %v3190_v52  ;;  %v3307_v33 = vmul.f32 %v3190_v52, %v4554_v43 }
0x25a9   :  { %vm3199_vm10 = vmor %vm3197_vm8, %vm3198_vm7 }
0x25aa   :  { %v3194_v35 = vsub.f32 1.0, %v3193_v32 }
0x25ac   :  { %v3195_v46 = vmul.f32 %v3704_v37, %v3194_v35 }
0x25ae   :  { %v3196_v49 = vadd.f32 %v3704_v37, %v3195_v46 }
0x25b0   :  { %v3200_v25 = vsel %vm3199_vm10, %v3704_v37, %v3196_v49 }
0x25b1   :  { %v3205_v10 = vsel %vm3202_vm11, %v3204_v0, %v3200_v25 }
0x25b2   :  { %3211 = vrot.lane.b32.xlu2 %v3205_v10, %s3712_s1  ;;  %v3310_v53 = vsub.f32 1.0, %v3205_v10 }
0x260c   :  { %v3212_v58 = vpop.permute.xlu2 %3211 }
0x260d   :  { %v3216_v12 = vmul.f32 %v3212_v58, %v4563_v9 }
0x260f   :  { %3218 = vst.msk [vmem:[#allocation5 + $0x8] sm:$0xff] %vm5330_vm14, %v3216_v12  ;;  %3233 = vmatpush.msrb.mxu0 %v3216_v12 }
0x261a   :  { %v3210_v16 = vpop.permute.xlu0 %3209 }
0x261b   :  { %v3215_v44 = vmul.f32 %v3210_v16, %v4554_v43 }
0x261d   :  { %3217 = vst.msk [vmem:[#allocation5] sm:$0xff] %vm5331_vm9, %v3215_v44  ;;  %3234 = vmatpush.msrb.mxu0 %v3215_v44 }
0x261e   :  { %3514 = vmatmul.msk.f32.vlgmr.msrb.gmra.mxu0 %vm71_vm0, %v5086_v55  ;;  %v3579_v55 = vld [vmem:[%s5280_s17] ss:$0 sm:$0xff] }
0x2626   :  { %3515 = vmatmul.msk.f32.gmra.mxu0 %vm71_vm0, %v5095_v34  ;;  %vm5332_vm0 = vmmov %vm5327_vm1 }
0x269b   :  { %v3236_v50 = vpop.f32.mrf.mxu0 }
0x269c   :  { %3244 = vrot.lane.b32.xlu1 %v3236_v50, %s3711_s22 }
0x26a3   :  { %v3239_v24 = vpop.f32.mrf.mxu0 }
0x26a4   :  { %3246 = vrot.lane.b32.xlu2 %v3239_v24, %s3711_s22 }
0x26fe   :  { %v3247_v63 = vpop.permute.xlu2 %3246 }
0x26ff   :  { %3251 = vst.msk [vmem:[#allocation5 + $0x8] sm:$0xff] %vm232_vm15, %v3247_v63 }
0x2706   :  { %v3253_v19 = vld [vmem:[#allocation5 + $0x8] sm:$0xff] }
0x270e   :  { %v3245_v27 = vpop.permute.xlu1 %3244 }
0x270f   :  { %3250 = vst.msk [vmem:[#allocation5] sm:$0xff] %vm232_vm15, %v3245_v27  ;;  %vm5333_vm15 = vmmov %vm5332_vm0 }
0x2716   :  { %v3252_v42 = vld [vmem:[#allocation5] sm:$0xff] }
0x2717   :  { %3516 = vmatmul.msk.f32.vlgmr.msrb.gmra.mxu1 %vm286_vm3, %v3252_v42 }
0x271f   :  { %3517 = vmatmul.msk.f32.gmra.mxu1 %vm286_vm3, %v3253_v19  ;;  %vm5334_vm3 = vmmov %vm5328_vm12 }
0x2720   :  { %vm5335_vm1 = vmmov %vm5334_vm3 }
0x2794   :  { %v3289_v34 = vpop.f32.mrf.mxu1 }
0x2795   :  { %v3290_v61 = vadd.f32 %v3579_v55, %v3289_v34 }
0x2797   :  { %3297 = vrot.lane.b32.xlu0 %v3290_v61, %s3713_s21 }
0x279c   :  { %v3292_v54 = vpop.f32.mrf.mxu1 }
0x279d   :  { %v3293_v2 = vadd.f32 %v3579_v55, %v3292_v54 }
0x279f   :  { %3299 = vrot.lane.b32.xlu1 %v3293_v2, %s3713_s21 }
0x2809   :  { %v3298_v14 = vpop.permute.xlu0 %3297 }
0x280a   :  { %v3303_v29 = vadd.f32 %v3298_v14, %v5217_v57  ;;  %v3308_v57 = vmul.f32 %v3205_v10, %v4563_v9 }
0x280c   :  { %3705 = vtanh.f32 %v3303_v29 }
0x2811   :  { %v3300_v26 = vpop.permute.xlu1 %3299 }
0x2812   :  { %v3706_v1 = vpop.eup %3705  ;;  %v3304_v30 = vadd.f32 %v3300_v26, %v5220_v5 }
0x2813   :  { %3313 = vrot.lane.b32.xlu2 %v3706_v1, %s3713_s21 }
0x2814   :  { %3707 = vtanh.f32 %v3304_v30 }
0x281a   :  { %v3708_v28 = vpop.eup %3707 }
0x281b   :  { %3315 = vrot.lane.b32.xlu0 %v3708_v28, %s3713_s21 }
0x286d   :  { %v3314_v62 = vpop.permute.xlu2 %3313 }
0x286e   :  { %v3319_v59 = vmul.f32 %v3314_v62, %v3309_v13 }
0x2870   :  { %v3321_v20 = vadd.f32 %v3319_v59, %v3307_v33 }
0x2872   :  { %v3323_v38 = vmax.f32 %v3321_v20, 0.0 }
0x2874   :  { %3518 = vmatmul.msk.f32.vlgmr.msrb.gmra.mxu2 %vm5332_vm0, %v3323_v38 }
0x288d   :  { %v3316_v56 = vpop.permute.xlu0 %3315 }
0x288e   :  { %v3320_v60 = vmul.f32 %v3316_v56, %v3310_v53 }
0x2890   :  { %v3322_v6 = vadd.f32 %v3320_v60, %v3308_v57 }
0x2892   :  { %v3324_v4 = vmax.f32 %v3322_v6, 0.0 }
0x2894   :  { %3519 = vmatmul.msk.f32.gmra.mxu2 %vm5333_vm15, %v3324_v4 }
0x28f7   :  { %v3356_v45 = vpop.f32.mrf.mxu2 }
0x28f8   :  { %v3357_v43 = vadd.f32 %v3580_v41, %v3356_v45 }
0x28fa   :  { %3520 = vst.msk [vmem:[%s5283_s20 + $0x20] sm:$0xff] %vm5334_vm3, %v3357_v43 }
0x2917   :  { %v3359_v5 = vpop.f32.mrf.mxu2 }
0x2918   :  { %v3360_v8 = vadd.f32 %v3580_v41, %v3359_v5 }
0x291a   :  { %3521 = vst.msk [vmem:[%s5283_s20 + $0x28] sm:$0xff] %vm5335_vm1, %v3360_v8 }

</bundles_post_ra>
